<compile_context>
chip_gen: v7x
topology: tpu7x:2x2x1
jax: 0.10.0
libtpu: 0.0.40
codegen_flags: <defaults>
</compile_context>

<pallas_src>
import jax
import jax.numpy as jnp
from jax.experimental import pallas as pl
from jax.experimental.pallas import tpu as pltpu

_LANE = 128
_SUBLANE = 8

_LAYERS = ("enc_1", "enc_2", "enc_3", "z_layer",
           "dec_1", "dec_2", "dec_3", "x_bar_layer")


def _round_up(v, m):
    return ((v + m - 1) // m) * m


def _cdiv(a, b):
    return (a + b - 1) // b


def _vmem_capacity_bytes():
    try:
        return int(pltpu.get_tpu_info().vmem_capacity_bytes)
    except Exception:
        return 64 << 20  # conservative fallback (v7x per-TC VMEM)


# --------------------------------------------------------------------------
# Kernel
# --------------------------------------------------------------------------
def _ae_kernel(
    x_ref,
    w1_ref, b1_ref, w2_ref, b2_ref, w3_ref, b3_ref, wz_ref, bz_ref,
    w4_ref, b4_ref, w5_ref, b5_ref, w6_ref, b6_ref, wx_ref, bx_ref,
    xbar_ref, h1_ref, h2_ref, h3_ref, z_ref,
):
    def linear(a, w_ref, b_ref):
        # MXU matmul in the weight's dtype with f32 accumulation;
        # bias add / ReLU stay in f32 on the VPU.
        return (
            jnp.dot(a.astype(w_ref.dtype), w_ref[...],
                    preferred_element_type=jnp.float32)
            + b_ref[...]
        )

    x = x_ref[...]

    # ---- Encoder: store each activation as soon as it is produced --------
    h1 = jnp.maximum(linear(x, w1_ref, b1_ref), 0.0)
    h1_ref[...] = h1.astype(h1_ref.dtype)
    h2 = jnp.maximum(linear(h1, w2_ref, b2_ref), 0.0)
    h2_ref[...] = h2.astype(h2_ref.dtype)
    h3 = jnp.maximum(linear(h2, w3_ref, b3_ref), 0.0)
    h3_ref[...] = h3.astype(h3_ref.dtype)
    z = linear(h3, wz_ref, bz_ref)                      # no activation
    z_ref[...] = z.astype(z_ref.dtype)

    # ---- Decoder ----------------------------------------------------------
    d1 = jnp.maximum(linear(z, w4_ref, b4_ref), 0.0)
    d2 = jnp.maximum(linear(d1, w5_ref, b5_ref), 0.0)
    d3 = jnp.maximum(linear(d2, w6_ref, b6_ref), 0.0)
    xbar_ref[...] = linear(d3, wx_ref, bx_ref).astype(xbar_ref.dtype)


# --------------------------------------------------------------------------
# Wrapper
# --------------------------------------------------------------------------
def ae_forward(x, params, *, tile_m=None,
               operand_dtype=jnp.bfloat16, out_dtype=jnp.float32):
    """Fused AE forward.

    x: [N, n_input] float32.
    params: dict name -> (W, b), W stored as [in, out] (transposed Linear).
    operand_dtype: dtype of the MXU operands (weights + casted activations).
                   bf16 by default (f32 accumulation kept); pass jnp.float32
                   for exact parity with the PyTorch forward.
    Returns (x_bar, enc_h1, enc_h2, enc_h3, z) in `out_dtype`.
    """
    n, n_input = x.shape
    ws, bs = zip(*(params[name] for name in _LAYERS))

    in_dims = [w.shape[0] for w in ws]
    out_dims = [w.shape[1] for w in ws]
    out_pads = [_round_up(d, _LANE) for d in out_dims]
    # First layer K needs only sublane alignment; deeper K's must match the
    # previous layer's 128-padded activation width.
    in_pads = [_round_up(in_dims[0], 2 * _SUBLANE)] + out_pads[:-1]

    op_isz = jnp.dtype(operand_dtype).itemsize
    out_isz = jnp.dtype(out_dtype).itemsize

    # ---- zero-pad weights (operand dtype) and biases (f32) ----------------
    # Zero padding is exact: padded K rows / output columns contribute 0.
    w_pad, b_pad = [], []
    for w, b, ip, op in zip(ws, bs, in_pads, out_pads):
        wp = jnp.zeros((ip, op), operand_dtype)
        wp = wp.at[: w.shape[0], : w.shape[1]].set(w.astype(operand_dtype))
        bflat = jnp.asarray(b, jnp.float32).reshape(1, -1)
        bp = jnp.zeros((1, op), jnp.float32).at[:, : bflat.shape[1]].set(bflat)
        w_pad.append(wp)
        b_pad.append(bp)

    weight_args = []
    for wp, bp in zip(w_pad, b_pad):
        weight_args += [wp, bp]
    weight_args = tuple(weight_args)

    # outputs: x_bar, h1, h2, h3, z (all lane-dense padded widths)
    out_feats = [out_pads[7], out_pads[0], out_pads[1], out_pads[2], out_pads[3]]

    # ---- VMEM accounting -> tile_m cap and vmem_limit_bytes ---------------
    w_bytes = sum(wp.size for wp in w_pad) * op_isz        # single-buffered
    b_bytes = sum(bp.size for bp in b_pad) * 4
    per_row_bytes = (
        in_pads[0] * 4 * 2                     # input tile, double-buffered
        + sum(out_feats) * out_isz * 2         # 5 output tiles, double-buffered
        + sum(out_pads) * 4                    # f32 intermediates (rough)
    )
    cap_bytes = _vmem_capacity_bytes()
    budget = int(cap_bytes * 0.6)
    cap_rows = (budget - w_bytes - b_bytes) // max(per_row_bytes, 1)
    cap_rows = min(512, max(_SUBLANE, cap_rows))

    if tile_m is None:
        # Balanced tiling: avoid padding N=600 -> 1024 style blowups.
        steps = max(1, _cdiv(n, cap_rows))
        if steps == 1 and n >= 2 * _LANE:
            steps = 2            # keep both v7x TensorCores busy when N allows
        tile_m = _round_up(_cdiv(n, steps), _SUBLANE)
        if tile_m > _LANE:       # keep the MXU M dim aligned for larger tiles
            tile_m = min(_round_up(tile_m, _LANE),
                         _round_up(cap_rows, _SUBLANE))
    tile_m = max(_SUBLANE, _round_up(int(tile_m), _SUBLANE))
    n_pad = _round_up(n, tile_m)
    grid = (n_pad // tile_m,)

    # Budget: resident weights (x2 safety for the double-buffer fallback) +
    # activation tiles + headroom; clamped under physical VMEM.
    vmem_need = 2 * w_bytes + b_bytes + tile_m * per_row_bytes
    vmem_limit = int(min(max(int(vmem_need * 1.4) + (2 << 20), 32 << 20),
                         int(cap_bytes * 0.9)))

    # ---- batch padding (input kept f32; outputs f32 by default) -----------
    x_p = jnp.zeros((n_pad, in_pads[0]), jnp.float32)
    x_p = x_p.at[:n, :n_input].set(x.astype(jnp.float32))

    def act_spec(feat):
        return pl.BlockSpec((tile_m, feat), lambda i: (i, 0))

    out_specs = [act_spec(f) for f in out_feats]
    out_shape = [jax.ShapeDtypeStruct((n_pad, f), out_dtype) for f in out_feats]

    # Advisory cost estimate so XLA schedules the custom call sensibly.
    flops = 2 * n_pad * sum(ip * op for ip, op in zip(in_pads, out_pads))
    bytes_accessed = (
        x_p.size * 4
        + sum(a.size * a.dtype.itemsize for a in weight_args)
        + sum(n_pad * f for f in out_feats) * out_isz
    )
    cost = pl.CostEstimate(flops=flops, transcendentals=0,
                           bytes_accessed=bytes_accessed)

    def _call(weight_pipeline_mode):
        def resident_spec(arr):
            # Grid-invariant block: weights/biases stay resident in VMEM.
            if weight_pipeline_mode is None:
                return pl.BlockSpec(arr.shape, lambda i: (0,) * arr.ndim)
            return pl.BlockSpec(arr.shape, lambda i: (0,) * arr.ndim,
                                pipeline_mode=weight_pipeline_mode)

        in_specs = [act_spec(in_pads[0])] + [resident_spec(a)
                                             for a in weight_args]
        return pl.pallas_call(
            _ae_kernel,
            grid_spec=pltpu.PrefetchScalarGridSpec(
                num_scalar_prefetch=0,
                grid=grid,
                in_specs=in_specs,
                out_specs=out_specs,
            ),
            out_shape=out_shape,
            compiler_params=pltpu.CompilerParams(
                dimension_semantics=("parallel",),
                vmem_limit_bytes=vmem_limit,
            ),
            cost_estimate=cost,
        )(x_p, *weight_args)

    try:
        # Single-buffered resident weights (block index never changes).
        outs = _call(pl.Buffered(1))
    except Exception:
        # Fallback for Pallas versions that require >= 2 pipeline buffers.
        outs = _call(None)

    x_bar_p, h1_p, h2_p, h3_p, z_p = outs
    x_bar = x_bar_p[:n, :n_input]
    h1 = h1_p[:n, :out_dims[0]]
    h2 = h2_p[:n, :out_dims[1]]
    h3 = h3_p[:n, :out_dims[2]]
    z = z_p[:n, :out_dims[3]]
    return x_bar, h1, h2, h3, z


# --------------------------------------------------------------------------
# Deterministic init + pure-JAX reference
# --------------------------------------------------------------------------
def init_params(key, n_enc_1, n_enc_2, n_enc_3, n_dec_1, n_dec_2, n_dec_3,
                n_input, n_z):
    """PyTorch-Linear-style uniform init; weights returned as [in, out]."""
    dims = {
        "enc_1": (n_input, n_enc_1),
        "enc_2": (n_enc_1, n_enc_2),
        "enc_3": (n_enc_2, n_enc_3),
        "z_layer": (n_enc_3, n_z),
        "dec_1": (n_z, n_dec_1),
        "dec_2": (n_dec_1, n_dec_2),
        "dec_3": (n_dec_2, n_dec_3),
        "x_bar_layer": (n_dec_3, n_input),
    }
    params = {}
    for name, (fan_in, fan_out) in dims.items():
        key, kw, kb = jax.random.split(key, 3)
        bound = 1.0 / (fan_in ** 0.5)
        w = jax.random.uniform(kw, (fan_in, fan_out), jnp.float32, -bound, bound)
        b = jax.random.uniform(kb, (1, fan_out), jnp.float32, -bound, bound)
        params[name] = (w, b)
    return params


def ae_forward_ref(x, params):
    """Pure-JAX reference mirroring the PyTorch forward exactly."""
    def lin(a, name):
        w, b = params[name]
        return jnp.dot(a, w, precision=jax.lax.Precision.HIGHEST) + b
    h1 = jax.nn.relu(lin(x, "enc_1"))
    h2 = jax.nn.relu(lin(h1, "enc_2"))
    h3 = jax.nn.relu(lin(h2, "enc_3"))
    z = lin(h3, "z_layer")
    d1 = jax.nn.relu(lin(z, "dec_1"))
    d2 = jax.nn.relu(lin(d1, "dec_2"))
    d3 = jax.nn.relu(lin(d2, "dec_3"))
    x_bar = lin(d3, "x_bar_layer")
    return x_bar, h1, h2, h3, z


if __name__ == "__main__":
    # Small shapes consistent with the AE module's constructor.
    n_input, n_z = 16, 8
    n_enc_1, n_enc_2, n_enc_3 = 32, 32, 64
    n_dec_1, n_dec_2, n_dec_3 = 64, 32, 32
    batch = 100  # deliberately NOT a multiple of the tile -> exercises padding

    key = jax.random.PRNGKey(0)
    key, kx = jax.random.split(key)
    x = jax.random.normal(kx, (batch, n_input), jnp.float32)
    params = init_params(key, n_enc_1, n_enc_2, n_enc_3,
                         n_dec_1, n_dec_2, n_dec_3, n_input, n_z)

    refs = ae_forward_ref(x, params)

    # 1) f32-operand path (explicit small tile -> grid=(2,), batch padded):
    #    parity with the PyTorch/JAX reference.
    outs = ae_forward(x, params, tile_m=64, operand_dtype=jnp.float32)
    outs = jax.block_until_ready(outs)
    for o, r in zip(outs, refs):
        assert o.shape == r.shape and o.dtype == r.dtype
        assert jnp.allclose(o, r, atol=1e-3, rtol=1e-3), \
            float(jnp.max(jnp.abs(o - r)))

    # 2) Default fast path: bf16 MXU operands, f32 accumulation + f32 outputs,
    #    heuristic tile_m.  Loose tolerance (operand rounding only).
    outs_bf = ae_forward(x, params)
    outs_bf = jax.block_until_ready(outs_bf)
    for o, r in zip(outs_bf, refs):
        assert o.shape == r.shape and o.dtype == r.dtype
        assert jnp.allclose(o, r, atol=0.2, rtol=0.2)

    print("KERNEL_OK")
</pallas_src>

<mosaic_0001>
module attributes {stable_mosaic.version = 11 : i64} {
  func.func @_ae_kernel(%arg0: i32, %arg1: memref<64x16xf32, #tpu.memory_space<vmem>>, %arg2: memref<16x128xf32, #tpu.memory_space<vmem>>, %arg3: memref<1x128xf32, #tpu.memory_space<vmem>>, %arg4: memref<128x128xf32, #tpu.memory_space<vmem>>, %arg5: memref<1x128xf32, #tpu.memory_space<vmem>>, %arg6: memref<128x128xf32, #tpu.memory_space<vmem>>, %arg7: memref<1x128xf32, #tpu.memory_space<vmem>>, %arg8: memref<128x128xf32, #tpu.memory_space<vmem>>, %arg9: memref<1x128xf32, #tpu.memory_space<vmem>>, %arg10: memref<128x128xf32, #tpu.memory_space<vmem>>, %arg11: memref<1x128xf32, #tpu.memory_space<vmem>>, %arg12: memref<128x128xf32, #tpu.memory_space<vmem>>, %arg13: memref<1x128xf32, #tpu.memory_space<vmem>>, %arg14: memref<128x128xf32, #tpu.memory_space<vmem>>, %arg15: memref<1x128xf32, #tpu.memory_space<vmem>>, %arg16: memref<128x128xf32, #tpu.memory_space<vmem>>, %arg17: memref<1x128xf32, #tpu.memory_space<vmem>>, %arg18: memref<64x128xf32, #tpu.memory_space<vmem>>, %arg19: memref<64x128xf32, #tpu.memory_space<vmem>>, %arg20: memref<64x128xf32, #tpu.memory_space<vmem>>, %arg21: memref<64x128xf32, #tpu.memory_space<vmem>>, %arg22: memref<64x128xf32, #tpu.memory_space<vmem>>) attributes {dimension_semantics = [#tpu.dimension_semantics<parallel>], iteration_bounds = array<i64: 2>, scalar_prefetch = 0 : i64, scratch_operands = 0 : i64, tpu.core_type = #tpu.core_type<tc>, window_params = [{transform_indices = @transform_0, window_bounds = array<i64: 64, 16>}, {pipeline_mode = #tpu.pipeline_mode<synchronous>, transform_indices = @transform_1, window_bounds = array<i64: 16, 128>}, {pipeline_mode = #tpu.pipeline_mode<synchronous>, transform_indices = @transform_2, window_bounds = array<i64: 1, 128>}, {pipeline_mode = #tpu.pipeline_mode<synchronous>, transform_indices = @transform_3, window_bounds = array<i64: 128, 128>}, {pipeline_mode = #tpu.pipeline_mode<synchronous>, transform_indices = @transform_4, window_bounds = array<i64: 1, 128>}, {pipeline_mode = #tpu.pipeline_mode<synchronous>, transform_indices = @transform_5, window_bounds = array<i64: 128, 128>}, {pipeline_mode = #tpu.pipeline_mode<synchronous>, transform_indices = @transform_6, window_bounds = array<i64: 1, 128>}, {pipeline_mode = #tpu.pipeline_mode<synchronous>, transform_indices = @transform_7, window_bounds = array<i64: 128, 128>}, {pipeline_mode = #tpu.pipeline_mode<synchronous>, transform_indices = @transform_8, window_bounds = array<i64: 1, 128>}, {pipeline_mode = #tpu.pipeline_mode<synchronous>, transform_indices = @transform_9, window_bounds = array<i64: 128, 128>}, {pipeline_mode = #tpu.pipeline_mode<synchronous>, transform_indices = @transform_10, window_bounds = array<i64: 1, 128>}, {pipeline_mode = #tpu.pipeline_mode<synchronous>, transform_indices = @transform_11, window_bounds = array<i64: 128, 128>}, {pipeline_mode = #tpu.pipeline_mode<synchronous>, transform_indices = @transform_12, window_bounds = array<i64: 1, 128>}, {pipeline_mode = #tpu.pipeline_mode<synchronous>, transform_indices = @transform_13, window_bounds = array<i64: 128, 128>}, {pipeline_mode = #tpu.pipeline_mode<synchronous>, transform_indices = @transform_14, window_bounds = array<i64: 1, 128>}, {pipeline_mode = #tpu.pipeline_mode<synchronous>, transform_indices = @transform_15, window_bounds = array<i64: 128, 128>}, {pipeline_mode = #tpu.pipeline_mode<synchronous>, transform_indices = @transform_16, window_bounds = array<i64: 1, 128>}, {transform_indices = @transform_17, window_bounds = array<i64: 64, 128>}, {transform_indices = @transform_18, window_bounds = array<i64: 64, 128>}, {transform_indices = @transform_19, window_bounds = array<i64: 64, 128>}, {transform_indices = @transform_20, window_bounds = array<i64: 64, 128>}, {transform_indices = @transform_21, window_bounds = array<i64: 64, 128>}]} {
    %c0 = arith.constant 0 : index
    %c0_0 = arith.constant 0 : index
    %0 = vector.load %arg1[%c0, %c0_0] : memref<64x16xf32, #tpu.memory_space<vmem>>, vector<64x16xf32>
    %c0_1 = arith.constant 0 : index
    %c0_2 = arith.constant 0 : index
    %1 = vector.load %arg2[%c0_1, %c0_2] : memref<16x128xf32, #tpu.memory_space<vmem>>, vector<16x128xf32>
    %cst = arith.constant dense<0.000000e+00> : vector<64x128xf32>
    %2 = tpu.matmul %0, %1, %cst {dimension_numbers = #tpu.dot_dimension_numbers<[1], [0], [0], [1], [0, 0, 1, 1], [], []>} : vector<64x16xf32>, vector<16x128xf32>, vector<64x128xf32> -> vector<64x128xf32>
    %c0_3 = arith.constant 0 : index
    %c0_4 = arith.constant 0 : index
    %3 = vector.load %arg3[%c0_3, %c0_4] : memref<1x128xf32, #tpu.memory_space<vmem>>, vector<1x128xf32>
    %4 = vector.broadcast %3 : vector<1x128xf32> to vector<64x128xf32>
    %5 = arith.addf %2, %4 : vector<64x128xf32>
    %cst_5 = arith.constant 0.000000e+00 : f32
    %6 = vector.broadcast %cst_5 : f32 to vector<64x128xf32>
    %7 = arith.maximumf %5, %6 : vector<64x128xf32>
    %c0_6 = arith.constant 0 : index
    %c0_7 = arith.constant 0 : index
    %8 = vector.load %arg19[%c0_6, %c0_7] : memref<64x128xf32, #tpu.memory_space<vmem>>, vector<64x128xf32>
    tpu.vector_store %arg19[%c0_6, %c0_7], %7 {strides = array<i32>} : memref<64x128xf32, #tpu.memory_space<vmem>>, vector<64x128xf32>,
    %c0_8 = arith.constant 0 : index
    %c0_9 = arith.constant 0 : index
    %9 = vector.load %arg4[%c0_8, %c0_9] : memref<128x128xf32, #tpu.memory_space<vmem>>, vector<128x128xf32>
    %cst_10 = arith.constant dense<0.000000e+00> : vector<64x128xf32>
    %10 = tpu.matmul %7, %9, %cst_10 {dimension_numbers = #tpu.dot_dimension_numbers<[1], [0], [0], [1], [0, 0, 1, 1], [], []>} : vector<64x128xf32>, vector<128x128xf32>, vector<64x128xf32> -> vector<64x128xf32>
    %c0_11 = arith.constant 0 : index
    %c0_12 = arith.constant 0 : index
    %11 = vector.load %arg5[%c0_11, %c0_12] : memref<1x128xf32, #tpu.memory_space<vmem>>, vector<1x128xf32>
    %12 = vector.broadcast %11 : vector<1x128xf32> to vector<64x128xf32>
    %13 = arith.addf %10, %12 : vector<64x128xf32>
    %cst_13 = arith.constant 0.000000e+00 : f32
    %14 = vector.broadcast %cst_13 : f32 to vector<64x128xf32>
    %15 = arith.maximumf %13, %14 : vector<64x128xf32>
    %c0_14 = arith.constant 0 : index
    %c0_15 = arith.constant 0 : index
    %16 = vector.load %arg20[%c0_14, %c0_15] : memref<64x128xf32, #tpu.memory_space<vmem>>, vector<64x128xf32>
    tpu.vector_store %arg20[%c0_14, %c0_15], %15 {strides = array<i32>} : memref<64x128xf32, #tpu.memory_space<vmem>>, vector<64x128xf32>,
    %c0_16 = arith.constant 0 : index
    %c0_17 = arith.constant 0 : index
    %17 = vector.load %arg6[%c0_16, %c0_17] : memref<128x128xf32, #tpu.memory_space<vmem>>, vector<128x128xf32>
    %cst_18 = arith.constant dense<0.000000e+00> : vector<64x128xf32>
    %18 = tpu.matmul %15, %17, %cst_18 {dimension_numbers = #tpu.dot_dimension_numbers<[1], [0], [0], [1], [0, 0, 1, 1], [], []>} : vector<64x128xf32>, vector<128x128xf32>, vector<64x128xf32> -> vector<64x128xf32>
    %c0_19 = arith.constant 0 : index
    %c0_20 = arith.constant 0 : index
    %19 = vector.load %arg7[%c0_19, %c0_20] : memref<1x128xf32, #tpu.memory_space<vmem>>, vector<1x128xf32>
    %20 = vector.broadcast %19 : vector<1x128xf32> to vector<64x128xf32>
    %21 = arith.addf %18, %20 : vector<64x128xf32>
    %cst_21 = arith.constant 0.000000e+00 : f32
    %22 = vector.broadcast %cst_21 : f32 to vector<64x128xf32>
    %23 = arith.maximumf %21, %22 : vector<64x128xf32>
    %c0_22 = arith.constant 0 : index
    %c0_23 = arith.constant 0 : index
    %24 = vector.load %arg21[%c0_22, %c0_23] : memref<64x128xf32, #tpu.memory_space<vmem>>, vector<64x128xf32>
    tpu.vector_store %arg21[%c0_22, %c0_23], %23 {strides = array<i32>} : memref<64x128xf32, #tpu.memory_space<vmem>>, vector<64x128xf32>,
    %c0_24 = arith.constant 0 : index
    %c0_25 = arith.constant 0 : index
    %25 = vector.load %arg8[%c0_24, %c0_25] : memref<128x128xf32, #tpu.memory_space<vmem>>, vector<128x128xf32>
    %cst_26 = arith.constant dense<0.000000e+00> : vector<64x128xf32>
    %26 = tpu.matmul %23, %25, %cst_26 {dimension_numbers = #tpu.dot_dimension_numbers<[1], [0], [0], [1], [0, 0, 1, 1], [], []>} : vector<64x128xf32>, vector<128x128xf32>, vector<64x128xf32> -> vector<64x128xf32>
    %c0_27 = arith.constant 0 : index
    %c0_28 = arith.constant 0 : index
    %27 = vector.load %arg9[%c0_27, %c0_28] : memref<1x128xf32, #tpu.memory_space<vmem>>, vector<1x128xf32>
    %28 = vector.broadcast %27 : vector<1x128xf32> to vector<64x128xf32>
    %29 = arith.addf %26, %28 : vector<64x128xf32>
    %c0_29 = arith.constant 0 : index
    %c0_30 = arith.constant 0 : index
    %30 = vector.load %arg22[%c0_29, %c0_30] : memref<64x128xf32, #tpu.memory_space<vmem>>, vector<64x128xf32>
    tpu.vector_store %arg22[%c0_29, %c0_30], %29 {strides = array<i32>} : memref<64x128xf32, #tpu.memory_space<vmem>>, vector<64x128xf32>,
    %c0_31 = arith.constant 0 : index
    %c0_32 = arith.constant 0 : index
    %31 = vector.load %arg10[%c0_31, %c0_32] : memref<128x128xf32, #tpu.memory_space<vmem>>, vector<128x128xf32>
    %cst_33 = arith.constant dense<0.000000e+00> : vector<64x128xf32>
    %32 = tpu.matmul %29, %31, %cst_33 {dimension_numbers = #tpu.dot_dimension_numbers<[1], [0], [0], [1], [0, 0, 1, 1], [], []>} : vector<64x128xf32>, vector<128x128xf32>, vector<64x128xf32> -> vector<64x128xf32>
    %c0_34 = arith.constant 0 : index
    %c0_35 = arith.constant 0 : index
    %33 = vector.load %arg11[%c0_34, %c0_35] : memref<1x128xf32, #tpu.memory_space<vmem>>, vector<1x128xf32>
    %34 = vector.broadcast %33 : vector<1x128xf32> to vector<64x128xf32>
    %35 = arith.addf %32, %34 : vector<64x128xf32>
    %cst_36 = arith.constant 0.000000e+00 : f32
    %36 = vector.broadcast %cst_36 : f32 to vector<64x128xf32>
    %37 = arith.maximumf %35, %36 : vector<64x128xf32>
    %c0_37 = arith.constant 0 : index
    %c0_38 = arith.constant 0 : index
    %38 = vector.load %arg12[%c0_37, %c0_38] : memref<128x128xf32, #tpu.memory_space<vmem>>, vector<128x128xf32>
    %cst_39 = arith.constant dense<0.000000e+00> : vector<64x128xf32>
    %39 = tpu.matmul %37, %38, %cst_39 {dimension_numbers = #tpu.dot_dimension_numbers<[1], [0], [0], [1], [0, 0, 1, 1], [], []>} : vector<64x128xf32>, vector<128x128xf32>, vector<64x128xf32> -> vector<64x128xf32>
    %c0_40 = arith.constant 0 : index
    %c0_41 = arith.constant 0 : index
    %40 = vector.load %arg13[%c0_40, %c0_41] : memref<1x128xf32, #tpu.memory_space<vmem>>, vector<1x128xf32>
    %41 = vector.broadcast %40 : vector<1x128xf32> to vector<64x128xf32>
    %42 = arith.addf %39, %41 : vector<64x128xf32>
    %cst_42 = arith.constant 0.000000e+00 : f32
    %43 = vector.broadcast %cst_42 : f32 to vector<64x128xf32>
    %44 = arith.maximumf %42, %43 : vector<64x128xf32>
    %c0_43 = arith.constant 0 : index
    %c0_44 = arith.constant 0 : index
    %45 = vector.load %arg14[%c0_43, %c0_44] : memref<128x128xf32, #tpu.memory_space<vmem>>, vector<128x128xf32>
    %cst_45 = arith.constant dense<0.000000e+00> : vector<64x128xf32>
    %46 = tpu.matmul %44, %45, %cst_45 {dimension_numbers = #tpu.dot_dimension_numbers<[1], [0], [0], [1], [0, 0, 1, 1], [], []>} : vector<64x128xf32>, vector<128x128xf32>, vector<64x128xf32> -> vector<64x128xf32>
    %c0_46 = arith.constant 0 : index
    %c0_47 = arith.constant 0 : index
    %47 = vector.load %arg15[%c0_46, %c0_47] : memref<1x128xf32, #tpu.memory_space<vmem>>, vector<1x128xf32>
    %48 = vector.broadcast %47 : vector<1x128xf32> to vector<64x128xf32>
    %49 = arith.addf %46, %48 : vector<64x128xf32>
    %cst_48 = arith.constant 0.000000e+00 : f32
    %50 = vector.broadcast %cst_48 : f32 to vector<64x128xf32>
    %51 = arith.maximumf %49, %50 : vector<64x128xf32>
    %c0_49 = arith.constant 0 : index
    %c0_50 = arith.constant 0 : index
    %52 = vector.load %arg16[%c0_49, %c0_50] : memref<128x128xf32, #tpu.memory_space<vmem>>, vector<128x128xf32>
    %cst_51 = arith.constant dense<0.000000e+00> : vector<64x128xf32>
    %53 = tpu.matmul %51, %52, %cst_51 {dimension_numbers = #tpu.dot_dimension_numbers<[1], [0], [0], [1], [0, 0, 1, 1], [], []>} : vector<64x128xf32>, vector<128x128xf32>, vector<64x128xf32> -> vector<64x128xf32>
    %c0_52 = arith.constant 0 : index
    %c0_53 = arith.constant 0 : index
    %54 = vector.load %arg17[%c0_52, %c0_53] : memref<1x128xf32, #tpu.memory_space<vmem>>, vector<1x128xf32>
    %55 = vector.broadcast %54 : vector<1x128xf32> to vector<64x128xf32>
    %56 = arith.addf %53, %55 : vector<64x128xf32>
    %c0_54 = arith.constant 0 : index
    %c0_55 = arith.constant 0 : index
    %57 = vector.load %arg18[%c0_54, %c0_55] : memref<64x128xf32, #tpu.memory_space<vmem>>, vector<64x128xf32>
    tpu.vector_store %arg18[%c0_54, %c0_55], %56 {strides = array<i32>} : memref<64x128xf32, #tpu.memory_space<vmem>>, vector<64x128xf32>,
    return
  }
  func.func @transform_0(%arg0: i32) -> (i32, i32) {
    %c0_i32 = arith.constant 0 : i32
    %c0_i32_0 = arith.constant 0 : i32
    return %arg0, %c0_i32 : i32, i32
  }
  func.func @transform_1(%arg0: i32) -> (i32, i32) {
    %c0_i32 = arith.constant 0 : i32
    %c0_i32_0 = arith.constant 0 : i32
    %c0_i32_1 = arith.constant 0 : i32
    return %c0_i32, %c0_i32_0 : i32, i32
  }
  func.func @transform_2(%arg0: i32) -> (i32, i32) {
    %c0_i32 = arith.constant 0 : i32
    %c0_i32_0 = arith.constant 0 : i32
    %c0_i32_1 = arith.constant 0 : i32
    return %c0_i32, %c0_i32_0 : i32, i32
  }
  func.func @transform_3(%arg0: i32) -> (i32, i32) {
    %c0_i32 = arith.constant 0 : i32
    %c0_i32_0 = arith.constant 0 : i32
    %c0_i32_1 = arith.constant 0 : i32
    return %c0_i32, %c0_i32_0 : i32, i32
  }
  func.func @transform_4(%arg0: i32) -> (i32, i32) {
    %c0_i32 = arith.constant 0 : i32
    %c0_i32_0 = arith.constant 0 : i32
    %c0_i32_1 = arith.constant 0 : i32
    return %c0_i32, %c0_i32_0 : i32, i32
  }
  func.func @transform_5(%arg0: i32) -> (i32, i32) {
    %c0_i32 = arith.constant 0 : i32
    %c0_i32_0 = arith.constant 0 : i32
    %c0_i32_1 = arith.constant 0 : i32
    return %c0_i32, %c0_i32_0 : i32, i32
  }
  func.func @transform_6(%arg0: i32) -> (i32, i32) {
    %c0_i32 = arith.constant 0 : i32
    %c0_i32_0 = arith.constant 0 : i32
    %c0_i32_1 = arith.constant 0 : i32
    return %c0_i32, %c0_i32_0 : i32, i32
  }
  func.func @transform_7(%arg0: i32) -> (i32, i32) {
    %c0_i32 = arith.constant 0 : i32
    %c0_i32_0 = arith.constant 0 : i32
    %c0_i32_1 = arith.constant 0 : i32
    return %c0_i32, %c0_i32_0 : i32, i32
  }
  func.func @transform_8(%arg0: i32) -> (i32, i32) {
    %c0_i32 = arith.constant 0 : i32
    %c0_i32_0 = arith.constant 0 : i32
    %c0_i32_1 = arith.constant 0 : i32
    return %c0_i32, %c0_i32_0 : i32, i32
  }
  func.func @transform_9(%arg0: i32) -> (i32, i32) {
    %c0_i32 = arith.constant 0 : i32
    %c0_i32_0 = arith.constant 0 : i32
    %c0_i32_1 = arith.constant 0 : i32
    return %c0_i32, %c0_i32_0 : i32, i32
  }
  func.func @transform_10(%arg0: i32) -> (i32, i32) {
    %c0_i32 = arith.constant 0 : i32
    %c0_i32_0 = arith.constant 0 : i32
    %c0_i32_1 = arith.constant 0 : i32
    return %c0_i32, %c0_i32_0 : i32, i32
  }
  func.func @transform_11(%arg0: i32) -> (i32, i32) {
    %c0_i32 = arith.constant 0 : i32
    %c0_i32_0 = arith.constant 0 : i32
    %c0_i32_1 = arith.constant 0 : i32
    return %c0_i32, %c0_i32_0 : i32, i32
  }
  func.func @transform_12(%arg0: i32) -> (i32, i32) {
    %c0_i32 = arith.constant 0 : i32
    %c0_i32_0 = arith.constant 0 : i32
    %c0_i32_1 = arith.constant 0 : i32
    return %c0_i32, %c0_i32_0 : i32, i32
  }
  func.func @transform_13(%arg0: i32) -> (i32, i32) {
    %c0_i32 = arith.constant 0 : i32
    %c0_i32_0 = arith.constant 0 : i32
    %c0_i32_1 = arith.constant 0 : i32
    return %c0_i32, %c0_i32_0 : i32, i32
  }
  func.func @transform_14(%arg0: i32) -> (i32, i32) {
    %c0_i32 = arith.constant 0 : i32
    %c0_i32_0 = arith.constant 0 : i32
    %c0_i32_1 = arith.constant 0 : i32
    return %c0_i32, %c0_i32_0 : i32, i32
  }
  func.func @transform_15(%arg0: i32) -> (i32, i32) {
    %c0_i32 = arith.constant 0 : i32
    %c0_i32_0 = arith.constant 0 : i32
    %c0_i32_1 = arith.constant 0 : i32
    return %c0_i32, %c0_i32_0 : i32, i32
  }
  func.func @transform_16(%arg0: i32) -> (i32, i32) {
    %c0_i32 = arith.constant 0 : i32
    %c0_i32_0 = arith.constant 0 : i32
    %c0_i32_1 = arith.constant 0 : i32
    return %c0_i32, %c0_i32_0 : i32, i32
  }
  func.func @transform_17(%arg0: i32) -> (i32, i32) {
    %c0_i32 = arith.constant 0 : i32
    %c0_i32_0 = arith.constant 0 : i32
    return %arg0, %c0_i32 : i32, i32
  }
  func.func @transform_18(%arg0: i32) -> (i32, i32) {
    %c0_i32 = arith.constant 0 : i32
    %c0_i32_0 = arith.constant 0 : i32
    return %arg0, %c0_i32 : i32, i32
  }
  func.func @transform_19(%arg0: i32) -> (i32, i32) {
    %c0_i32 = arith.constant 0 : i32
    %c0_i32_0 = arith.constant 0 : i32
    return %arg0, %c0_i32 : i32, i32
  }
  func.func @transform_20(%arg0: i32) -> (i32, i32) {
    %c0_i32 = arith.constant 0 : i32
    %c0_i32_0 = arith.constant 0 : i32
    return %arg0, %c0_i32 : i32, i32
  }
  func.func @transform_21(%arg0: i32) -> (i32, i32) {
    %c0_i32 = arith.constant 0 : i32
    %c0_i32_0 = arith.constant 0 : i32
    return %arg0, %c0_i32 : i32, i32
  }
}

module attributes {stable_mosaic.version = 11 : i64} {
  func.func @_ae_kernel(%arg0: i32, %arg1: memref<64x16xf32, #tpu.memory_space<vmem>>, %arg2: memref<16x128xf32, #tpu.memory_space<vmem>>, %arg3: memref<1x128xf32, #tpu.memory_space<vmem>>, %arg4: memref<128x128xf32, #tpu.memory_space<vmem>>, %arg5: memref<1x128xf32, #tpu.memory_space<vmem>>, %arg6: memref<128x128xf32, #tpu.memory_space<vmem>>, %arg7: memref<1x128xf32, #tpu.memory_space<vmem>>, %arg8: memref<128x128xf32, #tpu.memory_space<vmem>>, %arg9: memref<1x128xf32, #tpu.memory_space<vmem>>, %arg10: memref<128x128xf32, #tpu.memory_space<vmem>>, %arg11: memref<1x128xf32, #tpu.memory_space<vmem>>, %arg12: memref<128x128xf32, #tpu.memory_space<vmem>>, %arg13: memref<1x128xf32, #tpu.memory_space<vmem>>, %arg14: memref<128x128xf32, #tpu.memory_space<vmem>>, %arg15: memref<1x128xf32, #tpu.memory_space<vmem>>, %arg16: memref<128x128xf32, #tpu.memory_space<vmem>>, %arg17: memref<1x128xf32, #tpu.memory_space<vmem>>, %arg18: memref<64x128xf32, #tpu.memory_space<vmem>>, %arg19: memref<64x128xf32, #tpu.memory_space<vmem>>, %arg20: memref<64x128xf32, #tpu.memory_space<vmem>>, %arg21: memref<64x128xf32, #tpu.memory_space<vmem>>, %arg22: memref<64x128xf32, #tpu.memory_space<vmem>>) attributes {dimension_semantics = [#tpu.dimension_semantics<parallel>], iteration_bounds = array<i64: 2>, scalar_prefetch = 0 : i64, scratch_operands = 0 : i64, tpu.core_type = #tpu.core_type<tc>, window_params = [{transform_indices = @transform_0, window_bounds = array<i64: 64, 16>}, {pipeline_mode = #tpu.pipeline_mode<synchronous>, transform_indices = @transform_1, window_bounds = array<i64: 16, 128>}, {pipeline_mode = #tpu.pipeline_mode<synchronous>, transform_indices = @transform_2, window_bounds = array<i64: 1, 128>}, {pipeline_mode = #tpu.pipeline_mode<synchronous>, transform_indices = @transform_3, window_bounds = array<i64: 128, 128>}, {pipeline_mode = #tpu.pipeline_mode<synchronous>, transform_indices = @transform_4, window_bounds = array<i64: 1, 128>}, {pipeline_mode = #tpu.pipeline_mode<synchronous>, transform_indices = @transform_5, window_bounds = array<i64: 128, 128>}, {pipeline_mode = #tpu.pipeline_mode<synchronous>, transform_indices = @transform_6, window_bounds = array<i64: 1, 128>}, {pipeline_mode = #tpu.pipeline_mode<synchronous>, transform_indices = @transform_7, window_bounds = array<i64: 128, 128>}, {pipeline_mode = #tpu.pipeline_mode<synchronous>, transform_indices = @transform_8, window_bounds = array<i64: 1, 128>}, {pipeline_mode = #tpu.pipeline_mode<synchronous>, transform_indices = @transform_9, window_bounds = array<i64: 128, 128>}, {pipeline_mode = #tpu.pipeline_mode<synchronous>, transform_indices = @transform_10, window_bounds = array<i64: 1, 128>}, {pipeline_mode = #tpu.pipeline_mode<synchronous>, transform_indices = @transform_11, window_bounds = array<i64: 128, 128>}, {pipeline_mode = #tpu.pipeline_mode<synchronous>, transform_indices = @transform_12, window_bounds = array<i64: 1, 128>}, {pipeline_mode = #tpu.pipeline_mode<synchronous>, transform_indices = @transform_13, window_bounds = array<i64: 128, 128>}, {pipeline_mode = #tpu.pipeline_mode<synchronous>, transform_indices = @transform_14, window_bounds = array<i64: 1, 128>}, {pipeline_mode = #tpu.pipeline_mode<synchronous>, transform_indices = @transform_15, window_bounds = array<i64: 128, 128>}, {pipeline_mode = #tpu.pipeline_mode<synchronous>, transform_indices = @transform_16, window_bounds = array<i64: 1, 128>}, {transform_indices = @transform_17, window_bounds = array<i64: 64, 128>}, {transform_indices = @transform_18, window_bounds = array<i64: 64, 128>}, {transform_indices = @transform_19, window_bounds = array<i64: 64, 128>}, {transform_indices = @transform_20, window_bounds = array<i64: 64, 128>}, {transform_indices = @transform_21, window_bounds = array<i64: 64, 128>}]} {
    %c0 = arith.constant 0 : index
    %c0_0 = arith.constant 0 : index
    %0 = vector.load %arg1[%c0, %c0_0] : memref<64x16xf32, #tpu.memory_space<vmem>>, vector<64x16xf32>
    %c0_1 = arith.constant 0 : index
    %c0_2 = arith.constant 0 : index
    %1 = vector.load %arg2[%c0_1, %c0_2] : memref<16x128xf32, #tpu.memory_space<vmem>>, vector<16x128xf32>
    %cst = arith.constant dense<0.000000e+00> : vector<64x128xf32>
    %2 = tpu.matmul %0, %1, %cst {dimension_numbers = #tpu.dot_dimension_numbers<[1], [0], [0], [1], [0, 0, 1, 1], [], []>} : vector<64x16xf32>, vector<16x128xf32>, vector<64x128xf32> -> vector<64x128xf32>
    %c0_3 = arith.constant 0 : index
    %c0_4 = arith.constant 0 : index
    %3 = vector.load %arg3[%c0_3, %c0_4] : memref<1x128xf32, #tpu.memory_space<vmem>>, vector<1x128xf32>
    %4 = vector.broadcast %3 : vector<1x128xf32> to vector<64x128xf32>
    %5 = arith.addf %2, %4 : vector<64x128xf32>
    %cst_5 = arith.constant 0.000000e+00 : f32
    %6 = vector.broadcast %cst_5 : f32 to vector<64x128xf32>
    %7 = arith.maximumf %5, %6 : vector<64x128xf32>
    %c0_6 = arith.constant 0 : index
    %c0_7 = arith.constant 0 : index
    %8 = vector.load %arg19[%c0_6, %c0_7] : memref<64x128xf32, #tpu.memory_space<vmem>>, vector<64x128xf32>
    tpu.vector_store %arg19[%c0_6, %c0_7], %7 {strides = array<i32>} : memref<64x128xf32, #tpu.memory_space<vmem>>, vector<64x128xf32>,
    %c0_8 = arith.constant 0 : index
    %c0_9 = arith.constant 0 : index
    %9 = vector.load %arg4[%c0_8, %c0_9] : memref<128x128xf32, #tpu.memory_space<vmem>>, vector<128x128xf32>
    %cst_10 = arith.constant dense<0.000000e+00> : vector<64x128xf32>
    %10 = tpu.matmul %7, %9, %cst_10 {dimension_numbers = #tpu.dot_dimension_numbers<[1], [0], [0], [1], [0, 0, 1, 1], [], []>} : vector<64x128xf32>, vector<128x128xf32>, vector<64x128xf32> -> vector<64x128xf32>
    %c0_11 = arith.constant 0 : index
    %c0_12 = arith.constant 0 : index
    %11 = vector.load %arg5[%c0_11, %c0_12] : memref<1x128xf32, #tpu.memory_space<vmem>>, vector<1x128xf32>
    %12 = vector.broadcast %11 : vector<1x128xf32> to vector<64x128xf32>
    %13 = arith.addf %10, %12 : vector<64x128xf32>
    %cst_13 = arith.constant 0.000000e+00 : f32
    %14 = vector.broadcast %cst_13 : f32 to vector<64x128xf32>
    %15 = arith.maximumf %13, %14 : vector<64x128xf32>
    %c0_14 = arith.constant 0 : index
    %c0_15 = arith.constant 0 : index
    %16 = vector.load %arg20[%c0_14, %c0_15] : memref<64x128xf32, #tpu.memory_space<vmem>>, vector<64x128xf32>
    tpu.vector_store %arg20[%c0_14, %c0_15], %15 {strides = array<i32>} : memref<64x128xf32, #tpu.memory_space<vmem>>, vector<64x128xf32>,
    %c0_16 = arith.constant 0 : index
    %c0_17 = arith.constant 0 : index
    %17 = vector.load %arg6[%c0_16, %c0_17] : memref<128x128xf32, #tpu.memory_space<vmem>>, vector<128x128xf32>
    %cst_18 = arith.constant dense<0.000000e+00> : vector<64x128xf32>
    %18 = tpu.matmul %15, %17, %cst_18 {dimension_numbers = #tpu.dot_dimension_numbers<[1], [0], [0], [1], [0, 0, 1, 1], [], []>} : vector<64x128xf32>, vector<128x128xf32>, vector<64x128xf32> -> vector<64x128xf32>
    %c0_19 = arith.constant 0 : index
    %c0_20 = arith.constant 0 : index
    %19 = vector.load %arg7[%c0_19, %c0_20] : memref<1x128xf32, #tpu.memory_space<vmem>>, vector<1x128xf32>
    %20 = vector.broadcast %19 : vector<1x128xf32> to vector<64x128xf32>
    %21 = arith.addf %18, %20 : vector<64x128xf32>
    %cst_21 = arith.constant 0.000000e+00 : f32
    %22 = vector.broadcast %cst_21 : f32 to vector<64x128xf32>
    %23 = arith.maximumf %21, %22 : vector<64x128xf32>
    %c0_22 = arith.constant 0 : index
    %c0_23 = arith.constant 0 : index
    %24 = vector.load %arg21[%c0_22, %c0_23] : memref<64x128xf32, #tpu.memory_space<vmem>>, vector<64x128xf32>
    tpu.vector_store %arg21[%c0_22, %c0_23], %23 {strides = array<i32>} : memref<64x128xf32, #tpu.memory_space<vmem>>, vector<64x128xf32>,
    %c0_24 = arith.constant 0 : index
    %c0_25 = arith.constant 0 : index
    %25 = vector.load %arg8[%c0_24, %c0_25] : memref<128x128xf32, #tpu.memory_space<vmem>>, vector<128x128xf32>
    %cst_26 = arith.constant dense<0.000000e+00> : vector<64x128xf32>
    %26 = tpu.matmul %23, %25, %cst_26 {dimension_numbers = #tpu.dot_dimension_numbers<[1], [0], [0], [1], [0, 0, 1, 1], [], []>} : vector<64x128xf32>, vector<128x128xf32>, vector<64x128xf32> -> vector<64x128xf32>
    %c0_27 = arith.constant 0 : index
    %c0_28 = arith.constant 0 : index
    %27 = vector.load %arg9[%c0_27, %c0_28] : memref<1x128xf32, #tpu.memory_space<vmem>>, vector<1x128xf32>
    %28 = vector.broadcast %27 : vector<1x128xf32> to vector<64x128xf32>
    %29 = arith.addf %26, %28 : vector<64x128xf32>
    %c0_29 = arith.constant 0 : index
    %c0_30 = arith.constant 0 : index
    %30 = vector.load %arg22[%c0_29, %c0_30] : memref<64x128xf32, #tpu.memory_space<vmem>>, vector<64x128xf32>
    tpu.vector_store %arg22[%c0_29, %c0_30], %29 {strides = array<i32>} : memref<64x128xf32, #tpu.memory_space<vmem>>, vector<64x128xf32>,
    %c0_31 = arith.constant 0 : index
    %c0_32 = arith.constant 0 : index
    %31 = vector.load %arg10[%c0_31, %c0_32] : memref<128x128xf32, #tpu.memory_space<vmem>>, vector<128x128xf32>
    %cst_33 = arith.constant dense<0.000000e+00> : vector<64x128xf32>
    %32 = tpu.matmul %29, %31, %cst_33 {dimension_numbers = #tpu.dot_dimension_numbers<[1], [0], [0], [1], [0, 0, 1, 1], [], []>} : vector<64x128xf32>, vector<128x128xf32>, vector<64x128xf32> -> vector<64x128xf32>
    %c0_34 = arith.constant 0 : index
    %c0_35 = arith.constant 0 : index
    %33 = vector.load %arg11[%c0_34, %c0_35] : memref<1x128xf32, #tpu.memory_space<vmem>>, vector<1x128xf32>
    %34 = vector.broadcast %33 : vector<1x128xf32> to vector<64x128xf32>
    %35 = arith.addf %32, %34 : vector<64x128xf32>
    %cst_36 = arith.constant 0.000000e+00 : f32
    %36 = vector.broadcast %cst_36 : f32 to vector<64x128xf32>
    %37 = arith.maximumf %35, %36 : vector<64x128xf32>
    %c0_37 = arith.constant 0 : index
    %c0_38 = arith.constant 0 : index
    %38 = vector.load %arg12[%c0_37, %c0_38] : memref<128x128xf32, #tpu.memory_space<vmem>>, vector<128x128xf32>
    %cst_39 = arith.constant dense<0.000000e+00> : vector<64x128xf32>
    %39 = tpu.matmul %37, %38, %cst_39 {dimension_numbers = #tpu.dot_dimension_numbers<[1], [0], [0], [1], [0, 0, 1, 1], [], []>} : vector<64x128xf32>, vector<128x128xf32>, vector<64x128xf32> -> vector<64x128xf32>
    %c0_40 = arith.constant 0 : index
    %c0_41 = arith.constant 0 : index
    %40 = vector.load %arg13[%c0_40, %c0_41] : memref<1x128xf32, #tpu.memory_space<vmem>>, vector<1x128xf32>
    %41 = vector.broadcast %40 : vector<1x128xf32> to vector<64x128xf32>
    %42 = arith.addf %39, %41 : vector<64x128xf32>
    %cst_42 = arith.constant 0.000000e+00 : f32
    %43 = vector.broadcast %cst_42 : f32 to vector<64x128xf32>
    %44 = arith.maximumf %42, %43 : vector<64x128xf32>
    %c0_43 = arith.constant 0 : index
    %c0_44 = arith.constant 0 : index
    %45 = vector.load %arg14[%c0_43, %c0_44] : memref<128x128xf32, #tpu.memory_space<vmem>>, vector<128x128xf32>
    %cst_45 = arith.constant dense<0.000000e+00> : vector<64x128xf32>
    %46 = tpu.matmul %44, %45, %cst_45 {dimension_numbers = #tpu.dot_dimension_numbers<[1], [0], [0], [1], [0, 0, 1, 1], [], []>} : vector<64x128xf32>, vector<128x128xf32>, vector<64x128xf32> -> vector<64x128xf32>
    %c0_46 = arith.constant 0 : index
    %c0_47 = arith.constant 0 : index
    %47 = vector.load %arg15[%c0_46, %c0_47] : memref<1x128xf32, #tpu.memory_space<vmem>>, vector<1x128xf32>
    %48 = vector.broadcast %47 : vector<1x128xf32> to vector<64x128xf32>
    %49 = arith.addf %46, %48 : vector<64x128xf32>
    %cst_48 = arith.constant 0.000000e+00 : f32
    %50 = vector.broadcast %cst_48 : f32 to vector<64x128xf32>
    %51 = arith.maximumf %49, %50 : vector<64x128xf32>
    %c0_49 = arith.constant 0 : index
    %c0_50 = arith.constant 0 : index
    %52 = vector.load %arg16[%c0_49, %c0_50] : memref<128x128xf32, #tpu.memory_space<vmem>>, vector<128x128xf32>
    %cst_51 = arith.constant dense<0.000000e+00> : vector<64x128xf32>
    %53 = tpu.matmul %51, %52, %cst_51 {dimension_numbers = #tpu.dot_dimension_numbers<[1], [0], [0], [1], [0, 0, 1, 1], [], []>} : vector<64x128xf32>, vector<128x128xf32>, vector<64x128xf32> -> vector<64x128xf32>
    %c0_52 = arith.constant 0 : index
    %c0_53 = arith.constant 0 : index
    %54 = vector.load %arg17[%c0_52, %c0_53] : memref<1x128xf32, #tpu.memory_space<vmem>>, vector<1x128xf32>
    %55 = vector.broadcast %54 : vector<1x128xf32> to vector<64x128xf32>
    %56 = arith.addf %53, %55 : vector<64x128xf32>
    %c0_54 = arith.constant 0 : index
    %c0_55 = arith.constant 0 : index
    %57 = vector.load %arg18[%c0_54, %c0_55] : memref<64x128xf32, #tpu.memory_space<vmem>>, vector<64x128xf32>
    tpu.vector_store %arg18[%c0_54, %c0_55], %56 {strides = array<i32>} : memref<64x128xf32, #tpu.memory_space<vmem>>, vector<64x128xf32>,
    return
  }
  func.func @transform_0(%arg0: i32) -> (i32, i32) {
    %c0_i32 = arith.constant 0 : i32
    %c0_i32_0 = arith.constant 0 : i32
    return %arg0, %c0_i32 : i32, i32
  }
  func.func @transform_1(%arg0: i32) -> (i32, i32) {
    %c0_i32 = arith.constant 0 : i32
    %c0_i32_0 = arith.constant 0 : i32
    %c0_i32_1 = arith.constant 0 : i32
    return %c0_i32, %c0_i32_0 : i32, i32
  }
  func.func @transform_2(%arg0: i32) -> (i32, i32) {
    %c0_i32 = arith.constant 0 : i32
    %c0_i32_0 = arith.constant 0 : i32
    %c0_i32_1 = arith.constant 0 : i32
    return %c0_i32, %c0_i32_0 : i32, i32
  }
  func.func @transform_3(%arg0: i32) -> (i32, i32) {
    %c0_i32 = arith.constant 0 : i32
    %c0_i32_0 = arith.constant 0 : i32
    %c0_i32_1 = arith.constant 0 : i32
    return %c0_i32, %c0_i32_0 : i32, i32
  }
  func.func @transform_4(%arg0: i32) -> (i32, i32) {
    %c0_i32 = arith.constant 0 : i32
    %c0_i32_0 = arith.constant 0 : i32
    %c0_i32_1 = arith.constant 0 : i32
    return %c0_i32, %c0_i32_0 : i32, i32
  }
  func.func @transform_5(%arg0: i32) -> (i32, i32) {
    %c0_i32 = arith.constant 0 : i32
    %c0_i32_0 = arith.constant 0 : i32
    %c0_i32_1 = arith.constant 0 : i32
    return %c0_i32, %c0_i32_0 : i32, i32
  }
  func.func @transform_6(%arg0: i32) -> (i32, i32) {
    %c0_i32 = arith.constant 0 : i32
    %c0_i32_0 = arith.constant 0 : i32
    %c0_i32_1 = arith.constant 0 : i32
    return %c0_i32, %c0_i32_0 : i32, i32
  }
  func.func @transform_7(%arg0: i32) -> (i32, i32) {
    %c0_i32 = arith.constant 0 : i32
    %c0_i32_0 = arith.constant 0 : i32
    %c0_i32_1 = arith.constant 0 : i32
    return %c0_i32, %c0_i32_0 : i32, i32
  }
  func.func @transform_8(%arg0: i32) -> (i32, i32) {
    %c0_i32 = arith.constant 0 : i32
    %c0_i32_0 = arith.constant 0 : i32
    %c0_i32_1 = arith.constant 0 : i32
    return %c0_i32, %c0_i32_0 : i32, i32
  }
  func.func @transform_9(%arg0: i32) -> (i32, i32) {
    %c0_i32 = arith.constant 0 : i32
    %c0_i32_0 = arith.constant 0 : i32
    %c0_i32_1 = arith.constant 0 : i32
    return %c0_i32, %c0_i32_0 : i32, i32
  }
  func.func @transform_10(%arg0: i32) -> (i32, i32) {
    %c0_i32 = arith.constant 0 : i32
    %c0_i32_0 = arith.constant 0 : i32
    %c0_i32_1 = arith.constant 0 : i32
    return %c0_i32, %c0_i32_0 : i32, i32
  }
  func.func @transform_11(%arg0: i32) -> (i32, i32) {
    %c0_i32 = arith.constant 0 : i32
    %c0_i32_0 = arith.constant 0 : i32
    %c0_i32_1 = arith.constant 0 : i32
    return %c0_i32, %c0_i32_0 : i32, i32
  }
  func.func @transform_12(%arg0: i32) -> (i32, i32) {
    %c0_i32 = arith.constant 0 : i32
    %c0_i32_0 = arith.constant 0 : i32
    %c0_i32_1 = arith.constant 0 : i32
    return %c0_i32, %c0_i32_0 : i32, i32
  }
  func.func @transform_13(%arg0: i32) -> (i32, i32) {
    %c0_i32 = arith.constant 0 : i32
    %c0_i32_0 = arith.constant 0 : i32
    %c0_i32_1 = arith.constant 0 : i32
    return %c0_i32, %c0_i32_0 : i32, i32
  }
  func.func @transform_14(%arg0: i32) -> (i32, i32) {
    %c0_i32 = arith.constant 0 : i32
    %c0_i32_0 = arith.constant 0 : i32
    %c0_i32_1 = arith.constant 0 : i32
    return %c0_i32, %c0_i32_0 : i32, i32
  }
  func.func @transform_15(%arg0: i32) -> (i32, i32) {
    %c0_i32 = arith.constant 0 : i32
    %c0_i32_0 = arith.constant 0 : i32
    %c0_i32_1 = arith.constant 0 : i32
    return %c0_i32, %c0_i32_0 : i32, i32
  }
  func.func @transform_16(%arg0: i32) -> (i32, i32) {
    %c0_i32 = arith.constant 0 : i32
    %c0_i32_0 = arith.constant 0 : i32
    %c0_i32_1 = arith.constant 0 : i32
    return %c0_i32, %c0_i32_0 : i32, i32
  }
  func.func @transform_17(%arg0: i32) -> (i32, i32) {
    %c0_i32 = arith.constant 0 : i32
    %c0_i32_0 = arith.constant 0 : i32
    return %arg0, %c0_i32 : i32, i32
  }
  func.func @transform_18(%arg0: i32) -> (i32, i32) {
    %c0_i32 = arith.constant 0 : i32
    %c0_i32_0 = arith.constant 0 : i32
    return %arg0, %c0_i32 : i32, i32
  }
  func.func @transform_19(%arg0: i32) -> (i32, i32) {
    %c0_i32 = arith.constant 0 : i32
    %c0_i32_0 = arith.constant 0 : i32
    return %arg0, %c0_i32 : i32, i32
  }
  func.func @transform_20(%arg0: i32) -> (i32, i32) {
    %c0_i32 = arith.constant 0 : i32
    %c0_i32_0 = arith.constant 0 : i32
    return %arg0, %c0_i32 : i32, i32
  }
  func.func @transform_21(%arg0: i32) -> (i32, i32) {
    %c0_i32 = arith.constant 0 : i32
    %c0_i32_0 = arith.constant 0 : i32
    return %arg0, %c0_i32 : i32, i32
  }
}

</mosaic_0001>

<bundles_post_ra>
// kernel: tpu_custom_call.1
= control target key start
LH: loop header
LB: loop body
LE: loop exit
PB: predicated region body
PF: predicated region fallthrough
CT: control target
= control target key end

     0   :  { %s4268_s0 = inlined_call_operand.vmem [shape: f32[128,16], index: 0, kind: input, shape index: {}]   ;;  %s4269_s1 = inlined_call_operand.vmem [shape: f32[16,128], index: 1, kind: input, shape index: {}]   ;;  %s4270_s2 = inlined_call_operand.vmem [shape: f32[1,128], index: 2, kind: input, shape index: {}]   ;;  %s4271_s3 = inlined_call_operand.vmem [shape: f32[128,128], index: 3, kind: input, shape index: {}]   ;;  %s4272_s4 = inlined_call_operand.vmem [shape: f32[1,128], index: 4, kind: input, shape index: {}]   ;;  %s4273_s5 = inlined_call_operand.hbm [shape: f32[128,128], index: 5, kind: input, shape index: {}]   ;;  %s4274_s6 = inlined_call_operand.vmem [shape: f32[1,128], index: 6, kind: input, shape index: {}]   ;;  %s4275_s7 = inlined_call_operand.hbm [shape: f32[128,128], index: 7, kind: input, shape index: {}]   ;;  %s4276_s8 = inlined_call_operand.vmem [shape: f32[1,128], index: 8, kind: input, shape index: {}]   ;;  %s4277_s9 = inlined_call_operand.hbm [shape: f32[128,128], index: 9, kind: input, shape index: {}]   ;;  %s4278_s10 = inlined_call_operand.vmem [shape: f32[1,128], index: 10, kind: input, shape index: {}]   ;;  %s4279_s11 = inlined_call_operand.hbm [shape: f32[128,128], index: 11, kind: input, shape index: {}]   ;;  %s4280_s12 = inlined_call_operand.vmem [shape: f32[1,128], index: 12, kind: input, shape index: {}]   ;;  %s4281_s13 = inlined_call_operand.hbm [shape: f32[128,128], index: 13, kind: input, shape index: {}]   ;;  %s4282_s14 = inlined_call_operand.vmem [shape: f32[1,128], index: 14, kind: input, shape index: {}]   ;;  %s4283_s15 = inlined_call_operand.hbm [shape: f32[128,128], index: 15, kind: input, shape index: {}]   ;;  %s4284_s16 = inlined_call_operand.vmem [shape: f32[1,128], index: 16, kind: input, shape index: {}]   ;;  %s4285_s17 = inlined_call_operand.hbm [shape: f32[128,128], index: 17, kind: output, shape index: {0}]   ;;  %s4286_s18 = inlined_call_operand.hbm [shape: f32[128,128], index: 18, kind: output, shape index: {1}]   ;;  %s4287_s19 = inlined_call_operand.hbm [shape: f32[128,128], index: 19, kind: output, shape index: {2}]   ;;  %s4288_s20 = inlined_call_operand.hbm [shape: f32[128,128], index: 20, kind: output, shape index: {3}]   ;;  %s4289_s21 = inlined_call_operand.hbm [shape: f32[128,128], index: 21, kind: output, shape index: {4}]  }
   0x1   :  { %4310 = sst [smem:[#allocation33_spill]] %s4268_s0 }
   0x2   :  { %4311 = sst [smem:[#allocation34_spill]] %s4269_s1 }
   0x3   :  { %4312 = sst [smem:[#allocation35_spill]] %s4270_s2 }
   0x4   :  { %4313 = sst [smem:[#allocation36_spill]] %s4271_s3 }
   0x5   :  { %4314 = sst [smem:[#allocation37_spill]] %s4272_s4 }
   0x6   :  { %4315 = sst [smem:[#allocation38_spill]] %s4273_s5 }
   0x7   :  { %4316 = sst [smem:[#allocation39_spill]] %s4274_s6 }
   0x8   :  { %4317 = sst [smem:[#allocation40_spill]] %s4275_s7 }
   0x9   :  { %4318 = sst [smem:[#allocation41_spill]] %s4276_s8 }
   0xa   :  { %4319 = sst [smem:[#allocation42_spill]] %s4277_s9 }
   0xb   :  { %4320 = sst [smem:[#allocation43_spill]] %s4278_s10 }
   0xc   :  { %4321 = sst [smem:[#allocation44_spill]] %s4279_s11 }
   0xd   :  { %4322 = sst [smem:[#allocation45_spill]] %s4284_s16 }
   0xe   :  { %4323 = sst [smem:[#allocation46_spill]] %s4285_s17 }
   0xf   :  { %4324 = sst [smem:[#allocation47_spill]] %s4287_s19 }
  0x10   :  { %4325 = sst [smem:[#allocation48_spill]] %s4288_s20 }
  0x11   :  { %4326 = sst [smem:[#allocation49_spill]] %s4289_s21 }
  0x12   :  { %27 = vsyncpa [#allocation3], 0 }
  0x13   :  { %28 = vsyncpa [#allocation6], 0 }
  0x14   :  { %29 = vsyncpa [#allocation9], 0 }
  0x15   :  { %30 = vsyncpa [#allocation12], 0 }
  0x16   :  { %31 = vsyncpa [#allocation4], 0 }
  0x17   :  { %33 = vsyncpa [#allocation4 + $0x1], 0 }
  0x18   :  { %34 = vsyncpa [#allocation15], 0 }
  0x19   :  { %36 = vsyncpa [#allocation15 + $0x1], 0 }
  0x1a   :  { %37 = vsyncpa [#allocation18], 0 }
  0x1b   :  { %39 = vsyncpa [#allocation18 + $0x1], 0  ;;  %s3682_s2 = smov 0   ;;  %s3684_s25 = smov 0  }
  0x1c   :  { %s3686_s26 = smov 0   ;;  %s3688_s27 = smov 0  }
  0x1d LB: > { %4327 = sst [smem:[#allocation27_spill]] %s3543_s2  ;;  %s3703_s3 = sadd.s32 4294967295, %s3555_s27   ;;  %s3555_s27 = sphi %s3688_s27, %s4373_s27   ;;  %s3551_s26 = sphi %s3686_s26, %s4375_s26   ;;  %s3547_s25 = sphi %s3684_s25, %s4377_s25   ;;  %s3543_s2 = sphi %s3682_s2, %s4376_s2  }
  0x1e   : > { %4328 = sst [smem:[#allocation28_spill]] %s3551_s26  ;;  %s4293_s28 = sadd.s32 4294967294, %s3555_s27  }
  0x1f   : > { %4329 = sst [smem:[#allocation29_spill]] %s3555_s27  ;;  %s3707_s29 = sadd.s32 1, %s3555_s27  }
  0x20   : > { %4330 = sst [smem:[#allocation30_spill]] %s3707_s29  ;;  %s414_s0 = sadd.s32 1, %s3551_s26 }
  0x21   : > { %s411_s4 = ssub.s32 %s3555_s27, %s3707_s29  ;;  %p424_p0 = scmp.ne.s32.totalorder %s3551_s26, %s3547_s25 }
  0x22   : > { %p412_p1 = scmp.eq.s32.totalorder %s411_s4, 0  ;;  %p425_p2 = scmp.eq.s32.totalorder %s3703_s3, 1 }
  0x23   : > { %p430_p3 = scmp.ne.s32.totalorder %s3547_s25, %s3543_s2  ;;  %p431_p4 = scmp.eq.s32.totalorder %s4293_s28, 1 }
  0x24   : > { %s3720_s30 = scalar_select %p412_p1, %s3551_s26, %s414_s0  }
  0x25   : > { %p3722_p5 = por %p425_p2, %p424_p0  ;;  %p3726_p6 = por %p431_p4, %p430_p3 }
  0x26   : > { %4331 = sst [smem:[#allocation31_spill]] %s3720_s30  ;;  %p2259_p7 = scmp.ge.s32.totalorder %s3555_s27, 1 }
  0x27   : > { %s4332_s5 = scalar_select %p3722_p5, 1, 0 }
  0x28   : > { %s4333_s22 = scalar_select %p3726_p6, 1, 0 }
  0x29   : > { %p542_p8 = scmp.lt.s32.totalorder %s3555_s27, 3  ;;  %p4302_p9 = scmp.eq.s32.totalorder %s3703_s3, 0 }
  0x2a   : > { %4334 = sst [smem:[#allocation32_spill]] %s4333_s22  ;;  %s3557_s1 = smov [#allocation5]  }
  0x2b   : > { %p3733_p10 = pnand %p2259_p7, %p542_p8  ;;  %s582_s24 = sshll.u32 %s3557_s1, 4  ;;  %s3739_s24 = int_to_ptr.vmem [resolvable:$true] %s582_s24 }
  0x2c   : > { %s3558_s4 = smov [#allocation8]   ;;  %s3559_s30 = smov [#allocation2]  }
  0x2d   : > { %s4335_s23 = scalar_select %p3733_p10, 1, 0 }
  0x2e   : > { %p3099_p11 = pneg %p3733_p10  ;;  %s614_s28 = sshll.u32 %s3558_s4, 4  ;;  %s3747_s28 = int_to_ptr.vmem [resolvable:$true] %s614_s28 }
  0x2f   : > { %s3749_s26 = sshll.u32 %s3559_s30, 4  ;;  %s4337_s7 = sld [smem:[#allocation40_spill]]  ;;  %s567_s26 = int_to_ptr.vmem [resolvable:$true] %s3749_s26 }
  0x30   : > { %p3743_p12 = pnand %p4302_p9, %p3099_p11 }
  0x32   : > { %p3759_p0 = pneg %p3743_p12 }
  0x35   : > { %s3189_s2 = scalar_lea.hbm %s4337_s7, 2048 }
  0x36   : > { %p3190_p13 = scmp.ne.s32.totalorder %s4337_s7, %s3189_s2  ;;  %p3196_p3 = scmp.lt.u32.totalorder %s3189_s2, %s4337_s7 }
  0x38   : > { %p3192_p1 = pnand %p3759_p0, %p3190_p13 }
  0x3a   : > { %p3193_p2 = pneg %p3192_p1 }
  0x3c   : > { %p3198_p4 = pnand %p3196_p3, %p3193_p2 }
  0x3e   : > { %3201 = shalt.err (!%p3198_p4)
}
  0x3f   : > { %s3202_s27 = scalar_lea.vmem %s3739_s24, 2048  ;;  %p3210_p9 = scmp.lt.s32.totalorder %s3739_s24, %s3739_s24 }
  0x40   : > { %p3203_p7 = scmp.ne.s32.totalorder %s3739_s24, %s3202_s27  ;;  %p3211_p6 = scmp.lt.s32.totalorder %s3202_s27, %s3202_s27 }
  0x42   : > { %p3205_p8 = pnand %p3203_p7, %p3759_p0  ;;  %p3212_p13 = por %p3211_p6, %p3210_p9 }
  0x44   : > { %p3206_p11 = pneg %p3205_p8 }
  0x46   : > { %p3213_p1 = pnand %p3212_p13, %p3206_p11 }
  0x48   : > { %3216 = shalt.err (!%p3213_p1)
}
  0x49   : > { %s3560_s29 = smov 128   ;;  %s3561_s2 = smov 8  }
  0x4a   : > { %3105 = dma.hbm_to_vmem [thread:$0]  (!%p3743_p12), %s4337_s7, 2048, %s3739_s24, [#allocation6], %s3560_s29, %s3560_s29, %s3561_s2  }
  0x4b   : > { %s4339_s11 = sld [smem:[#allocation44_spill]] }
  0x51   : > { %s3217_s27 = scalar_lea.hbm %s4339_s11, 2048 }
  0x52   : > { %p3218_p6 = scmp.ne.s32.totalorder %s4339_s11, %s3217_s27  ;;  %p3224_p3 = scmp.lt.u32.totalorder %s3217_s27, %s4339_s11 }
  0x54   : > { %p3220_p9 = pnand %p3218_p6, %p3759_p0 }
  0x56   : > { %p3221_p2 = pneg %p3220_p9 }
  0x58   : > { %p3226_p4 = pnand %p3224_p3, %p3221_p2 }
  0x5a   : > { %3229 = shalt.err (!%p3226_p4)
}
  0x5b   : > { %s3230_s24 = scalar_lea.vmem %s3747_s28, 2048  ;;  %p3238_p13 = scmp.lt.s32.totalorder %s3747_s28, %s3747_s28 }
  0x5c   : > { %p3231_p7 = scmp.ne.s32.totalorder %s3747_s28, %s3230_s24  ;;  %p3239_p1 = scmp.lt.s32.totalorder %s3230_s24, %s3230_s24 }
  0x5e   : > { %p3233_p8 = pnand %p3231_p7, %p3759_p0  ;;  %p3240_p6 = por %p3239_p1, %p3238_p13 }
  0x60   : > { %p3234_p11 = pneg %p3233_p8 }
  0x62   : > { %p3241_p9 = pnand %p3240_p6, %p3234_p11 }
  0x64   : > { %3244 = shalt.err (!%p3241_p9)
}
  0x65   : > { %3111 = dma.hbm_to_vmem [thread:$0]  (!%p3743_p12), %s4339_s11, 2048, %s3747_s28, [#allocation9], %s3560_s29, %s3560_s29, %s3561_s2  }
  0x66   : > { %s4340_s22 = sld [smem:[#allocation38_spill]] }
  0x6c   : > { %s3245_s1 = scalar_lea.hbm %s4340_s22, 2048 }
  0x6d   : > { %p3246_p2 = scmp.ne.s32.totalorder %s4340_s22, %s3245_s1  ;;  %p3252_p7 = scmp.lt.u32.totalorder %s3245_s1, %s4340_s22 }
  0x6f   : > { %p3248_p3 = pnand %p3246_p2, %p3759_p0 }
  0x71   : > { %p3249_p4 = pneg %p3248_p3 }
  0x73   : > { %p3254_p8 = pnand %p3252_p7, %p3249_p4 }
  0x75   : > { %3257 = shalt.err (!%p3254_p8)
}
  0x76   : > { %s3258_s16 = scalar_lea.vmem %s567_s26, 2048  ;;  %p3266_p6 = scmp.lt.s32.totalorder %s567_s26, %s567_s26 }
  0x77   : > { %p3259_p11 = scmp.ne.s32.totalorder %s567_s26, %s3258_s16  ;;  %p3267_p9 = scmp.lt.s32.totalorder %s3258_s16, %s3258_s16 }
  0x79   : > { %p3261_p13 = pnand %p3259_p11, %p3759_p0  ;;  %p3268_p5 = por %p3267_p9, %p3266_p6 }
  0x7b   : > { %p3262_p1 = pneg %p3261_p13 }
  0x7d   : > { %p3269_p10 = pnand %p3268_p5, %p3262_p1 }
  0x7f   : > { %3272 = shalt.err (!%p3269_p10)
}
  0x80   : > { %3102 = dma.hbm_to_vmem [thread:$0]  (!%p3743_p12), %s4340_s22, 2048, %s567_s26, [#allocation3], %s3560_s29, %s3560_s29, %s3561_s2  }
  0x81   : > { %s3562_s20 = smov [#allocation7]   ;;  %s3563_s1 = smov [#allocation10]  }
  0x82   : > { %s598_s21 = sshll.u32 %s3562_s20, 4  ;;  %s630_s4 = sshll.u32 %s3563_s1, 4  ;;  %s599_s21 = int_to_ptr.vmem [resolvable:$true] %s598_s21  ;;  %s631_s4 = int_to_ptr.vmem [resolvable:$true] %s630_s4 }
  0x83   : > { %s4341_s9 = sld [smem:[#allocation42_spill]] }
  0x89   : > { %s3273_s24 = scalar_lea.hbm %s4341_s9, 2048 }
  0x8a   : > { %p3274_p5 = scmp.ne.s32.totalorder %s4341_s9, %s3273_s24  ;;  %p3280_p3 = scmp.lt.u32.totalorder %s3273_s24, %s4341_s9 }
  0x8c   : > { %p3276_p10 = pnand %p3274_p5, %p3759_p0 }
  0x8e   : > { %p3277_p2 = pneg %p3276_p10 }
  0x90   : > { %p3282_p4 = pnand %p3280_p3, %p3277_p2 }
  0x92   : > { %3285 = shalt.err (!%p3282_p4)
}
  0x93   : > { %s3286_s26 = scalar_lea.vmem %s599_s21, 2048  ;;  %p3294_p13 = scmp.lt.s32.totalorder %s599_s21, %s599_s21 }
  0x94   : > { %p3287_p7 = scmp.ne.s32.totalorder %s599_s21, %s3286_s26  ;;  %p3295_p1 = scmp.lt.s32.totalorder %s3286_s26, %s3286_s26 }
  0x96   : > { %p3289_p8 = pnand %p3287_p7, %p3759_p0  ;;  %p3296_p6 = por %p3295_p1, %p3294_p13 }
  0x98   : > { %p3290_p11 = pneg %p3289_p8 }
  0x9a   : > { %p3297_p9 = pnand %p3296_p6, %p3290_p11 }
  0x9c   : > { %3300 = shalt.err (!%p3297_p9)
}
  0x9d   : > { %3108 = dma.hbm_to_vmem [thread:$0]  (!%p3743_p12), %s4341_s9, 2048, %s599_s21, [#allocation6], %s3560_s29, %s3560_s29, %s3561_s2  }
  0x9e   : > { %s3301_s1 = scalar_lea.hbm %s4281_s13, 2048 }
  0x9f   : > { %p3302_p5 = scmp.ne.s32.totalorder %s4281_s13, %s3301_s1  ;;  %p3308_p3 = scmp.lt.u32.totalorder %s3301_s1, %s4281_s13 }
  0xa1   : > { %p3304_p10 = pnand %p3302_p5, %p3759_p0 }
  0xa3   : > { %p3305_p2 = pneg %p3304_p10 }
  0xa5   : > { %p3310_p4 = pnand %p3308_p3, %p3305_p2 }
  0xa7   : > { %3313 = shalt.err (!%p3310_p4)
}
  0xa8   : > { %s3314_s28 = scalar_lea.vmem %s631_s4, 2048  ;;  %p3322_p13 = scmp.lt.s32.totalorder %s631_s4, %s631_s4 }
  0xa9   : > { %p3315_p7 = scmp.ne.s32.totalorder %s631_s4, %s3314_s28  ;;  %p3323_p1 = scmp.lt.s32.totalorder %s3314_s28, %s3314_s28 }
  0xab   : > { %p3317_p8 = pnand %p3315_p7, %p3759_p0  ;;  %p3324_p6 = por %p3323_p1, %p3322_p13 }
  0xad   : > { %p3318_p11 = pneg %p3317_p8 }
  0xaf   : > { %p3325_p9 = pnand %p3324_p6, %p3318_p11 }
  0xb1   : > { %3328 = shalt.err (!%p3325_p9)
}
  0xb2   : > { %3114 = dma.hbm_to_vmem [thread:$0]  (!%p3743_p12), %s4281_s13, 2048, %s631_s4, [#allocation9], %s3560_s29, %s3560_s29, %s3561_s2  }
  0xb3   : > { %s3564_s7 = smov [#allocation11]   ;;  %s3329_s1 = scalar_lea.hbm %s4283_s15, 2048 }
  0xb4   : > { %s646_s11 = sshll.u32 %s3564_s7, 4  ;;  %p3330_p5 = scmp.ne.s32.totalorder %s4283_s15, %s3329_s1  ;;  %s647_s11 = int_to_ptr.vmem [resolvable:$true] %s646_s11 }
  0xb5   : > { %p3336_p3 = scmp.lt.u32.totalorder %s3329_s1, %s4283_s15 }
  0xb6   : > { %p3332_p10 = pnand %p3330_p5, %p3759_p0 }
  0xb8   : > { %p3333_p2 = pneg %p3332_p10 }
  0xba   : > { %p3338_p4 = pnand %p3336_p3, %p3333_p2 }
  0xbc   : > { %3341 = shalt.err (!%p3338_p4)
}
  0xbd   : > { %s3342_s4 = scalar_lea.vmem %s647_s11, 2048  ;;  %p3350_p13 = scmp.lt.s32.totalorder %s647_s11, %s647_s11 }
  0xbe   : > { %p3343_p7 = scmp.ne.s32.totalorder %s647_s11, %s3342_s4  ;;  %p3351_p1 = scmp.lt.s32.totalorder %s3342_s4, %s3342_s4 }
  0xc0   : > { %p3345_p8 = pnand %p3343_p7, %p3759_p0  ;;  %p3352_p6 = por %p3351_p1, %p3350_p13 }
  0xc2   : > { %p3346_p11 = pneg %p3345_p8 }
  0xc4   : > { %p3353_p9 = pnand %p3352_p6, %p3346_p11 }
  0xc6   : > { %3356 = shalt.err (!%p3353_p9)
}
  0xc7   : > { %3117 = dma.hbm_to_vmem [thread:$0]  (!%p3743_p12), %s4283_s15, 2048, %s647_s11, [#allocation12], %s3560_s29, %s3560_s29, %s3561_s2  }
  0xc8   : > { %p4342_p5 = scmp.ne.s32.totalorder %s4335_s23, 0 }
  0xc9   : > { %p4343_p0 = scmp.eq.s32.totalorder (!%p4342_p5), %s3703_s3, 0 }
  0xca   : > { %674 = sbr.rel (%p4342_p5) target bundleno = 1998 (0x7ce), region = 88 }
  0xd1   : > { %3514 = dma.done.wait (%p4343_p0), [#allocation3], 2048   ;;  %p4344_p10 = pmov %p4343_p0 }
  0xd2   : > { %p4345_p2 = pmov %p4343_p0 }
  0xd3   : > { %3516 = vsyncadd (%p4344_p10), [#allocation3], 4294965248 }
  0xd4   : > { %3518 = dma.done.wait (%p4345_p2), [#allocation6], 4096   ;;  %p4346_p3 = pmov %p4343_p0 }
  0xd5   : > { %p4347_p4 = pmov %p4343_p0 }
  0xd6   : > { %3520 = vsyncadd (%p4346_p3), [#allocation6], 4294963200 }
  0xd7   : > { %3522 = dma.done.wait (%p4347_p4), [#allocation9], 4096   ;;  %p4348_p12 = pmov %p4343_p0 }
  0xd8   : > { %p4349_p7 = pmov %p4343_p0 }
  0xd9   : > { %3524 = vsyncadd (%p4348_p12), [#allocation9], 4294963200 }
  0xda   : > { %3526 = dma.done.wait (%p4349_p7), [#allocation12], 2048   ;;  %p4350_p8 = pmov %p4343_p0 }
  0xdb   : > { %s2279_s17 = sshll.u32 %s3703_s3, 3  ;;  %vm802_vm0 = vcmask 130048   ;;  %s4351_s2 = sld [smem:[#allocation33_spill]]  ;;  %v1092_v35 = vld [vmem:[#allocation2] sm:$0xff]  ;;  %v1093_v36 = vld [vmem:[#allocation2 + $0x8] sm:$0xff]  ;;  %v1094_v37 = vld [vmem:[#allocation2 + $0x10] sm:$0xff] }
  0xdc   : > { %3528 = vsyncadd (%p4350_p8), [#allocation12], 4294965248  ;;  %p775_p11 = scmp.lt.s32.totalorder %s2279_s17, 15  ;;  %s4352_s19 = sld [smem:[#allocation34_spill]]  ;;  %v2857_v38 = vpack.c.bf16 %v1093_v36, %v1092_v35  ;;  %v1095_v39 = vld [vmem:[#allocation2 + $0x18] sm:$0xff]  ;;  %v1096_v41 = vld [vmem:[#allocation2 + $0x20] sm:$0xff] }
  0xdd   : > { %s4353_s24 = sld [smem:[#allocation36_spill]]  ;;  %v2861_v40 = vpack.c.bf16 %v1095_v39, %v1094_v37  ;;  %v1097_v42 = vld [vmem:[#allocation2 + $0x28] sm:$0xff]  ;;  %v1098_v44 = vld [vmem:[#allocation2 + $0x30] sm:$0xff]  ;;  %v1099_v45 = vld [vmem:[#allocation2 + $0x38] sm:$0xff]  ;;  %s4308_s27 = sand.u32 1, %s3547_s25  }
  0xde   : > { %s4379_s17 = smov (!%p775_p11, %s2279_s17), 15  ;;  %v2865_v43 = vpack.c.bf16 %v1097_v42, %v1096_v41  ;;  %v2869_v46 = vpack.c.bf16 %v1099_v45, %v1098_v44  ;;  %v1100_v47 = vld [vmem:[#allocation2 + $0x40] sm:$0xff]  ;;  %v1101_v48 = vld [vmem:[#allocation2 + $0x48] sm:$0xff]  ;;  %v1102_v50 = vld [vmem:[#allocation2 + $0x50] sm:$0xff]  ;;  %s4354_s28 = sld [smem:[#allocation35_spill]] }
  0xdf   : > { %s2280_s23 = sshll.u32 %s4379_s17, 3  ;;  %v2873_v49 = vpack.c.bf16 %v1101_v48, %v1100_v47  ;;  %v1103_v51 = vld [vmem:[#allocation2 + $0x58] sm:$0xff]  ;;  %v1104_v53 = vld [vmem:[#allocation2 + $0x60] sm:$0xff]  ;;  %v1105_v54 = vld [vmem:[#allocation2 + $0x68] sm:$0xff]  ;;  %s3994_s21 = sshll.u32 %s4308_s27, 6 }
  0xe0   : > { %v2877_v52 = vpack.c.bf16 %v1103_v51, %v1102_v50  ;;  %v2881_v55 = vpack.c.bf16 %v1105_v54, %v1104_v53  ;;  %s3997_s17 = scalar_lea.vmem [#allocation14], %s3994_s21  ;;  %v1246_v35 = vld [vmem:[#allocation5 + $0x50] sm:$0xff]  ;;  %v1247_v36 = vld [vmem:[#allocation5 + $0x58] sm:$0xff]  ;;  %v1249_v39 = vld [vmem:[#allocation5 + $0x68] sm:$0xff]  ;;  %s4355_s29 = sld [smem:[#allocation37_spill]] }
  0xe1   : > { %s3916_s26 = scalar_lea.vmem %s4351_s2, %s2280_s23  ;;  %v2909_v37 = vpack.c.bf16 %v1247_v36, %v1246_v35  ;;  %s4011_s2 = scalar_lea.vmem [#allocation16], %s3994_s21 }
  0xe2   : > { %v793_v0 = vld [vmem:[%s4352_s19] sm:$0xff]  ;;  %v794_v1 = vld [vmem:[%s4352_s19 + $0x8] sm:$0xff]  ;;  %v787_v10 = vld [vmem:[%s3916_s26 + $0x10] sm:$0xff]  ;;  %s4356_s6 = sld [smem:[#allocation39_spill]]  ;;  %s4025_s11 = scalar_lea.vmem [#allocation17], %s3994_s21 }
  0xe3   : > { %v785_v2 = vld [vmem:[%s3916_s26] sm:$0xff]  ;;  %v2821_v3 = vpack.c.bf16 %v794_v1, %v793_v0  ;;  %v949_v5 = vld [vmem:[%s4353_s24 + $0x8] sm:$0xff]  ;;  %v950_v8 = vld [vmem:[%s4353_s24 + $0x10] sm:$0xff]  ;;  %s4357_s8 = sld [smem:[#allocation41_spill]]  ;;  %s4039_s30 = scalar_lea.vmem [#allocation19], %s3994_s21 }
  0xe4   : > { %2501 = vmatprep.mubr.msk.f32.mxu0 %vm802_vm0, %v785_v2  ;;  %v948_v4 = vld [vmem:[%s4353_s24] sm:$0xff]  ;;  %v786_v6 = vld [vmem:[%s3916_s26 + $0x8] sm:$0xff]  ;;  %v951_v9 = vld [vmem:[%s4353_s24 + $0x18] sm:$0xff]  ;;  %s4358_s10 = sld [smem:[#allocation43_spill]]  ;;  %s1982_s7 = sshll.u32 %s4011_s2, 4  ;;  %s4063_s7 = int_to_ptr.vmem [resolvable:$true] %s1982_s7 }
  0xe5   : > { %2822 = vmatprep.subr.bf16.mxu0 %v2821_v3  ;;  %v2825_v7 = vpack.c.bf16 %v949_v5, %v948_v4  ;;  %v2829_v11 = vpack.c.bf16 %v951_v9, %v950_v8  ;;  %v952_v12 = vld [vmem:[%s4353_s24 + $0x20] sm:$0xff]  ;;  %v953_v13 = vld [vmem:[%s4353_s24 + $0x28] sm:$0xff]  ;;  %v788_v14 = vld [vmem:[%s3916_s26 + $0x18] sm:$0xff]  ;;  %s1998_s20 = sshll.u32 %s4025_s11, 4  ;;  %s4309_s16 = sand.u32 1, %s3703_s3   ;;  %s4065_s20 = int_to_ptr.vmem [resolvable:$true] %s1998_s20 }
  0xe6   : > { %2824 = vmatpush3.bf16.msra.mxu0 %v2821_v3  ;;  %v2833_v15 = vpack.c.bf16 %v953_v13, %v952_v12  ;;  %v789_v16 = vld [vmem:[%s3916_s26 + $0x20] sm:$0xff]  ;;  %v954_v17 = vld [vmem:[%s4353_s24 + $0x30] sm:$0xff]  ;;  %v955_v18 = vld [vmem:[%s4353_s24 + $0x38] sm:$0xff]  ;;  %s4070_s4 = sshll.u32 %s3703_s3, 10  ;;  %p4359_p1 = scmp.ne.s32.totalorder %s4332_s5, 0 }
  0xe7   : > { %2826 = vmatprep.subr.bf16.mxu1 %v2825_v7  ;;  %v790_v19 = vld [vmem:[%s3916_s26 + $0x28] sm:$0xff]  ;;  %v2837_v20 = vpack.c.bf16 %v955_v18, %v954_v17  ;;  %v791_v21 = vld [vmem:[%s3916_s26 + $0x30] sm:$0xff]  ;;  %v956_v22 = vld [vmem:[%s4353_s24 + $0x40] sm:$0xff]  ;;  %2858 = vmatprep.subr.bf16.mxu0 %v2857_v38  ;;  %s3565_s0 = smov [#allocation14]  }
  0xe8   : > { %2828 = vmatpush3.bf16.msra.mxu1 %v2825_v7  ;;  %v957_v23 = vld [vmem:[%s4353_s24 + $0x48] sm:$0xff]  ;;  %v792_v24 = vld [vmem:[%s3916_s26 + $0x38] sm:$0xff]  ;;  %v958_v26 = vld [vmem:[%s4353_s24 + $0x50] sm:$0xff]  ;;  %s1966_s26 = sshll.u32 %s3997_s17, 4  ;;  %s4061_s26 = int_to_ptr.vmem [resolvable:$true] %s1966_s26 }
  0xe9   : > { %2502 = vmatmul.mubr.msk.f32.vlgmr.msra.gmra.mrb[0].mxu0 %vm802_vm0, %v786_v6  ;;  %2830 = vmatprep.subr.bf16.mxu1 %v2829_v11  ;;  %v2841_v25 = vpack.c.bf16 %v957_v23, %v956_v22  ;;  %v959_v27 = vld [vmem:[%s4353_s24 + $0x58] sm:$0xff]  ;;  %v960_v29 = vld [vmem:[%s4353_s24 + $0x60] sm:$0xff]  ;;  %v961_v30 = vld [vmem:[%s4353_s24 + $0x68] sm:$0xff] }
  0xea   : > { %2504 = vmatprep.mubr.msk.f32.mxu0 %vm802_vm0, %v787_v10  ;;  %v2845_v28 = vpack.c.bf16 %v959_v27, %v958_v26  ;;  %v2849_v31 = vpack.c.bf16 %v961_v30, %v960_v29  ;;  %v962_v32 = vld [vmem:[%s4353_s24 + $0x70] sm:$0xff]  ;;  %v963_v33 = vld [vmem:[%s4353_s24 + $0x78] sm:$0xff]  ;;  %2860 = vmatpush3.bf16.msra.mxu0 %v2857_v38  ;;  %v2281_v56 = vld [vmem:[%s4354_s28] ss:$0 sm:$0xff] }
  0xeb   : > { %v2853_v34 = vpack.c.bf16 %v963_v33, %v962_v32  ;;  %2862 = vmatprep.subr.bf16.mxu0 %v2861_v40  ;;  %v1106_v17 = vld [vmem:[#allocation2 + $0x70] sm:$0xff]  ;;  %v1107_v18 = vld [vmem:[#allocation2 + $0x78] sm:$0xff]  ;;  %v1240_v26 = vld [vmem:[#allocation5 + $0x20] sm:$0xff] }
  0xec   : > { %2832 = vmatpush3.bf16.msra.mxu1 %v2829_v11  ;;  %v1238_v22 = vld [vmem:[#allocation5 + $0x10] sm:$0xff]  ;;  %v1241_v27 = vld [vmem:[#allocation5 + $0x28] sm:$0xff]  ;;  %v1243_v30 = vld [vmem:[#allocation5 + $0x38] sm:$0xff] }
  0xed   : > { %2505 = vmatmul.mubr.msk.f32.gmra.mrb[2].mxu0 %vm802_vm0, %v788_v14  ;;  %2834 = vmatprep.subr.bf16.mxu1 %v2833_v15  ;;  %v1242_v29 = vld [vmem:[#allocation5 + $0x30] sm:$0xff]  ;;  %v1244_v32 = vld [vmem:[#allocation5 + $0x40] sm:$0xff]  ;;  %v1245_v33 = vld [vmem:[#allocation5 + $0x48] sm:$0xff] }
  0xee   : > { %2507 = vmatprep.mubr.msk.f32.mxu0 %vm802_vm0, %v789_v16  ;;  %2864 = vmatpush3.bf16.msra.mxu0 %v2861_v40  ;;  %v1248_v38 = vld [vmem:[#allocation5 + $0x60] sm:$0xff] }
  0xef   : > { %2866 = vmatprep.subr.bf16.mxu0 %v2865_v43  ;;  %v2913_v40 = vpack.c.bf16 %v1249_v39, %v1248_v38  ;;  %v2290_v41 = vld [vmem:[%s4355_s29] ss:$0 sm:$0xff]  ;;  %s3361_s29 = sshll.u32 %s3565_s0, 4  ;;  %s3362_s29 = int_to_ptr.vmem [resolvable:$false] %s3361_s29 }
  0xf0   : > { %2836 = vmatpush3.bf16.msra.mxu1 %v2833_v15  ;;  %s3363_s27 = scalar_lea.vmem %s3362_s29, 2048  ;;  %p3364_p5 = scmp.lt.s32.totalorder %s4061_s26, %s3362_s29 }
  0xf1   : > { %2508 = vmatmul.mubr.msk.f32.gmra.mrb[4].mxu0 %vm802_vm0, %v790_v19  ;;  %2838 = vmatprep.subr.bf16.mxu1 %v2837_v20  ;;  %v2885_v19 = vpack.c.bf16 %v1107_v18, %v1106_v17  ;;  %v1380_v17 = vld [vmem:[#allocation7 + $0x40] sm:$0xff]  ;;  %v1381_v18 = vld [vmem:[#allocation7 + $0x48] sm:$0xff] }
  0xf2   : > { %2510 = vmatprep.mubr.msk.f32.mxu0 %vm802_vm0, %v791_v21  ;;  %2868 = vmatpush3.bf16.msra.mxu0 %v2865_v43  ;;  %v1237_v21 = vld [vmem:[#allocation5 + $0x8] sm:$0xff] }
  0xf3   : > { %2870 = vmatprep.subr.bf16.mxu0 %v2869_v46 }
  0xf4   : > { %2840 = vmatpush3.bf16.msra.mxu1 %v2837_v20  ;;  %v1236_v20 = vld [vmem:[#allocation5] sm:$0xff] }
  0xf5   : > { %2511 = vmatmul.mubr.msk.f32.gmra.mrb[6].mxu0 %vm802_vm0, %v792_v24  ;;  %2842 = vmatprep.subr.bf16.mxu1 %v2841_v25  ;;  %v2889_v23 = vpack.c.bf16 %v1237_v21, %v1236_v20  ;;  %v1239_v24 = vld [vmem:[#allocation5 + $0x18] sm:$0xff]  ;;  %v1382_v20 = vld [vmem:[#allocation7 + $0x50] sm:$0xff] }
  0xf6   : > { %2872 = vmatpush3.bf16.msra.mxu0 %v2869_v46  ;;  %v1383_v21 = vld [vmem:[#allocation7 + $0x58] sm:$0xff] }
  0xf7   : > { %2874 = vmatprep.subr.bf16.mxu0 %v2873_v49 }
  0xf8   : > { %2844 = vmatpush3.bf16.msra.mxu1 %v2841_v25  ;;  %v2893_v25 = vpack.c.bf16 %v1239_v24, %v1238_v22  ;;  %v2941_v22 = vpack.c.bf16 %v1383_v21, %v1382_v20  ;;  %v1385_v24 = vld [vmem:[#allocation7 + $0x68] sm:$0xff] }
  0xf9   : > { %2846 = vmatprep.subr.bf16.mxu1 %v2845_v28 }
  0xfa   : > { %2876 = vmatpush3.bf16.msra.mxu0 %v2873_v49 }
  0xfb   : > { %2878 = vmatprep.subr.bf16.mxu0 %v2877_v52 }
  0xfc   : > { %2848 = vmatpush3.bf16.msra.mxu1 %v2845_v28  ;;  %v2897_v28 = vpack.c.bf16 %v1241_v27, %v1240_v26  ;;  %v2291_v26 = vld [vmem:[%s4356_s6] ss:$0 sm:$0xff] }
  0xfd   : > { %2850 = vmatprep.subr.bf16.mxu1 %v2849_v31 }
  0xfe   : > { %2880 = vmatpush3.bf16.msra.mxu0 %v2877_v52 }
  0xff   : > { %2882 = vmatprep.subr.bf16.mxu0 %v2881_v55 }
 0x100   : > { %2852 = vmatpush3.bf16.msra.mxu1 %v2849_v31  ;;  %v2901_v31 = vpack.c.bf16 %v1243_v30, %v1242_v29 }
 0x101   : > { %2854 = vmatprep.subr.bf16.mxu1 %v2853_v34 }
 0x102   : > { %2884 = vmatpush3.bf16.msra.mxu0 %v2881_v55 }
 0x103   : > { %2886 = vmatprep.subr.bf16.mxu0 %v2885_v19 }
 0x104   : > { %2856 = vmatpush3.bf16.msra.mxu1 %v2853_v34  ;;  %v2905_v34 = vpack.c.bf16 %v1245_v33, %v1244_v32 }
 0x105   : > { %2890 = vmatprep.subr.bf16.mxu1 %v2889_v23 }
 0x106   : > { %2888 = vmatpush3.bf16.msra.mxu0 %v2885_v19  ;;  %v2937_v19 = vpack.c.bf16 %v1381_v18, %v1380_v17 }
 0x1bc   : > { %v2503_v57 = vpop.f32.mrb[0].mxu0 }
 0x1bd   : > { %v899_v58 = vadd.f32 %v2503_v57, %v2281_v56  ;;  %v893_v59 = vpop.f32.mrb[1].mxu0 }
 0x1be   : > { %v894_v60 = vadd.f32 %v2281_v56, %v893_v59 }
 0x1bf   : > { %v933_v61 = vmax.f32 %v899_v58, 0.0 }
 0x1c0   : > { %v932_v62 = vmax.f32 %v894_v60, 0.0  ;;  %v2506_v63 = vpop.f32.mrb[2].mxu0 }
 0x1c1   : > { %941 = vst [vmem:[%s3997_s17 + $0x8] sm:$0xff] %v933_v61  ;;  %v909_v0 = vadd.f32 %v2506_v63, %v2281_v56  ;;  %v903_v1 = vpop.f32.mrb[3].mxu0 }
 0x1c2   : > { %940 = vst [vmem:[%s3997_s17] sm:$0xff] %v932_v62  ;;  %v904_v2 = vadd.f32 %v2281_v56, %v903_v1  ;;  %2545 = vmatprep.mubr.f32.mxu1 %v932_v62 }
 0x1c3   : > { %v935_v3 = vmax.f32 %v909_v0, 0.0  ;;  %2546 = vmatmul.mubr.f32.vlgmr.msra.gmra.mrb[0].mxu1 %v933_v61 }
 0x1c4   : > { %v934_v4 = vmax.f32 %v904_v2, 0.0  ;;  %v2509_v5 = vpop.f32.mrb[4].mxu0  ;;  %2892 = vmatpush3.bf16.msra.mxu1 %v2889_v23  ;;  %v1250_v2 = vld [vmem:[#allocation5 + $0x70] sm:$0xff]  ;;  %v1384_v23 = vld [vmem:[#allocation7 + $0x60] sm:$0xff] }
 0x1c5   : > { %943 = vst [vmem:[%s3997_s17 + $0x18] sm:$0xff] %v935_v3  ;;  %v919_v6 = vadd.f32 %v2509_v5, %v2281_v56  ;;  %v913_v7 = vpop.f32.mrb[5].mxu0  ;;  %2894 = vmatprep.subr.bf16.mxu1 %v2893_v25  ;;  %v1372_v5 = vld [vmem:[#allocation7] sm:$0xff] }
 0x1c6   : > { %942 = vst [vmem:[%s3997_s17 + $0x10] sm:$0xff] %v934_v4  ;;  %v914_v8 = vadd.f32 %v2281_v56, %v913_v7  ;;  %2548 = vmatprep.mubr.f32.mxu1 %v934_v4  ;;  %v1374_v7 = vld [vmem:[#allocation7 + $0x10] sm:$0xff] }
 0x1c7   : > { %v937_v9 = vmax.f32 %v919_v6, 0.0  ;;  %2549 = vmatmul.mubr.f32.gmra.mrb[2].mxu1 %v935_v3  ;;  %v1251_v3 = vld [vmem:[#allocation5 + $0x78] sm:$0xff]  ;;  %v1373_v6 = vld [vmem:[#allocation7 + $0x8] sm:$0xff] }
 0x1c8   : > { %v936_v10 = vmax.f32 %v914_v8, 0.0  ;;  %v2512_v11 = vpop.f32.mrb[6].mxu0  ;;  %2896 = vmatpush3.bf16.msra.mxu1 %v2893_v25  ;;  %v2917_v4 = vpack.c.bf16 %v1251_v3, %v1250_v2  ;;  %v2921_v8 = vpack.c.bf16 %v1373_v6, %v1372_v5  ;;  %v2945_v25 = vpack.c.bf16 %v1385_v24, %v1384_v23  ;;  %v1516_v2 = vld [vmem:[#allocation8 + $0x40] sm:$0xff]  ;;  %v1517_v3 = vld [vmem:[#allocation8 + $0x48] sm:$0xff]  ;;  %v1518_v5 = vld [vmem:[#allocation8 + $0x50] sm:$0xff] }
 0x1c9   : > { %945 = vst [vmem:[%s3997_s17 + $0x28] sm:$0xff] %v937_v9  ;;  %v929_v12 = vadd.f32 %v2512_v11, %v2281_v56  ;;  %v923_v13 = vpop.f32.mrb[7].mxu0  ;;  %2898 = vmatprep.subr.bf16.mxu1 %v2897_v28  ;;  %v1376_v11 = vld [vmem:[#allocation7 + $0x20] sm:$0xff]  ;;  %v1519_v6 = vld [vmem:[#allocation8 + $0x58] sm:$0xff] }
 0x1ca   : > { %944 = vst [vmem:[%s3997_s17 + $0x20] sm:$0xff] %v936_v10  ;;  %v924_v14 = vadd.f32 %v2281_v56, %v923_v13  ;;  %2551 = vmatprep.mubr.f32.mxu1 %v936_v10  ;;  %2922 = vmatprep.subr.bf16.mxu0 %v2921_v8 }
 0x1cb   : > { %v939_v15 = vmax.f32 %v929_v12, 0.0  ;;  %2552 = vmatmul.mubr.f32.gmra.mrb[4].mxu1 %v937_v9  ;;  %v1375_v9 = vld [vmem:[#allocation7 + $0x18] sm:$0xff]  ;;  %v1377_v12 = vld [vmem:[#allocation7 + $0x28] sm:$0xff] }
 0x1cc   : > { %v938_v16 = vmax.f32 %v924_v14, 0.0  ;;  %2900 = vmatpush3.bf16.msra.mxu1 %v2897_v28  ;;  %v2925_v10 = vpack.c.bf16 %v1375_v9, %v1374_v7  ;;  %v2929_v13 = vpack.c.bf16 %v1377_v12, %v1376_v11  ;;  %v1378_v14 = vld [vmem:[#allocation7 + $0x30] sm:$0xff]  ;;  %v2973_v7 = vpack.c.bf16 %v1519_v6, %v1518_v5  ;;  %v1521_v9 = vld [vmem:[#allocation8 + $0x68] sm:$0xff]  ;;  %v2292_v11 = vld [vmem:[%s4357_s8] ss:$0 sm:$0xff] }
 0x1cd   : > { %947 = vst [vmem:[%s3997_s17 + $0x38] sm:$0xff] %v939_v15  ;;  %2902 = vmatprep.subr.bf16.mxu1 %v2901_v31 }
 0x1ce   : > { %946 = vst [vmem:[%s3997_s17 + $0x30] sm:$0xff] %v938_v16  ;;  %2554 = vmatprep.mubr.f32.mxu1 %v938_v16  ;;  %s4076_s17 = scalar_lea.hbm %s4286_s18, %s4070_s4 }
 0x1cf   : > { %2555 = vmatmul.mubr.f32.gmra.mrb[6].mxu1 %v939_v15  ;;  %v1379_v15 = vld [vmem:[#allocation7 + $0x38] sm:$0xff] }
 0x1d0   : > { %2904 = vmatpush3.bf16.msra.mxu1 %v2901_v31  ;;  %v2933_v16 = vpack.c.bf16 %v1379_v15, %v1378_v14 }
 0x1d1   : > { %2906 = vmatprep.subr.bf16.mxu1 %v2905_v34 }
 0x1d4   : > { %2908 = vmatpush3.bf16.msra.mxu1 %v2905_v34 }
 0x1d5   : > { %2910 = vmatprep.subr.bf16.mxu1 %v2909_v37 }
 0x1d8   : > { %2912 = vmatpush3.bf16.msra.mxu1 %v2909_v37 }
 0x1d9   : > { %2914 = vmatprep.subr.bf16.mxu1 %v2913_v40 }
 0x1dc   : > { %2916 = vmatpush3.bf16.msra.mxu1 %v2913_v40 }
 0x1dd   : > { %2918 = vmatprep.subr.bf16.mxu1 %v2917_v4 }
 0x1e0   : > { %2920 = vmatpush3.bf16.msra.mxu1 %v2917_v4  ;;  %v2969_v4 = vpack.c.bf16 %v1517_v3, %v1516_v2 }
 0x296   : > { %v2547_v42 = vpop.f32.mrb[0].mxu1 }
 0x297   : > { %v1043_v43 = vadd.f32 %v2547_v42, %v2290_v41  ;;  %v1037_v44 = vpop.f32.mrb[1].mxu1 }
 0x298   : > { %v1038_v45 = vadd.f32 %v2290_v41, %v1037_v44 }
 0x299   : > { %v1077_v46 = vmax.f32 %v1043_v43, 0.0 }
 0x29a   : > { %v1076_v47 = vmax.f32 %v1038_v45, 0.0  ;;  %v2550_v48 = vpop.f32.mrb[2].mxu1 }
 0x29b   : > { %1085 = vst [vmem:[%s4011_s2 + $0x8] sm:$0xff] %v1077_v46  ;;  %v1053_v49 = vadd.f32 %v2550_v48, %v2290_v41  ;;  %v1047_v50 = vpop.f32.mrb[3].mxu1 }
 0x29c   : > { %1084 = vst [vmem:[%s4011_s2] sm:$0xff] %v1076_v47  ;;  %v1048_v51 = vadd.f32 %v2290_v41, %v1047_v50  ;;  %2589 = vmatprep.mubr.f32.mxu0 %v1076_v47 }
 0x29d   : > { %v1079_v52 = vmax.f32 %v1053_v49, 0.0  ;;  %2590 = vmatmul.mubr.f32.vlgmr.msra.gmra.mrb[8].mxu0 %v1077_v46 }
 0x29e   : > { %v1078_v53 = vmax.f32 %v1048_v51, 0.0  ;;  %v2553_v54 = vpop.f32.mrb[4].mxu1  ;;  %2924 = vmatpush3.bf16.msra.mxu0 %v2921_v8  ;;  %v1386_v51 = vld [vmem:[#allocation7 + $0x70] sm:$0xff]  ;;  %v1520_v8 = vld [vmem:[#allocation8 + $0x60] sm:$0xff] }
 0x29f   : > { %1087 = vst [vmem:[%s4011_s2 + $0x18] sm:$0xff] %v1079_v52  ;;  %v1063_v55 = vadd.f32 %v2553_v54, %v2290_v41  ;;  %v1057_v56 = vpop.f32.mrb[5].mxu1  ;;  %2926 = vmatprep.subr.bf16.mxu0 %v2925_v10  ;;  %v1508_v54 = vld [vmem:[#allocation8] sm:$0xff] }
 0x2a0   : > { %1086 = vst [vmem:[%s4011_s2 + $0x10] sm:$0xff] %v1078_v53  ;;  %v1058_v57 = vadd.f32 %v2290_v41, %v1057_v56  ;;  %2592 = vmatprep.mubr.f32.mxu0 %v1078_v53  ;;  %v1510_v56 = vld [vmem:[#allocation8 + $0x10] sm:$0xff] }
 0x2a1   : > { %v1081_v58 = vmax.f32 %v1063_v55, 0.0  ;;  %2593 = vmatmul.mubr.f32.gmra.mrb[10].mxu0 %v1079_v52  ;;  %v1387_v52 = vld [vmem:[#allocation7 + $0x78] sm:$0xff]  ;;  %v1509_v55 = vld [vmem:[#allocation8 + $0x8] sm:$0xff] }
 0x2a2   : > { %v1080_v59 = vmax.f32 %v1058_v57, 0.0  ;;  %v2556_v60 = vpop.f32.mrb[6].mxu1  ;;  %2928 = vmatpush3.bf16.msra.mxu0 %v2925_v10  ;;  %v2949_v53 = vpack.c.bf16 %v1387_v52, %v1386_v51  ;;  %v2953_v57 = vpack.c.bf16 %v1509_v55, %v1508_v54  ;;  %v2977_v10 = vpack.c.bf16 %v1521_v9, %v1520_v8  ;;  %v2293_v52 = vld [vmem:[%s4358_s10] ss:$0 sm:$0xff] }
 0x2a3   : > { %1089 = vst [vmem:[%s4011_s2 + $0x28] sm:$0xff] %v1081_v58  ;;  %v1073_v61 = vadd.f32 %v2556_v60, %v2290_v41  ;;  %v1067_v62 = vpop.f32.mrb[7].mxu1  ;;  %2930 = vmatprep.subr.bf16.mxu0 %v2929_v13  ;;  %v1512_v60 = vld [vmem:[#allocation8 + $0x20] sm:$0xff] }
 0x2a4   : > { %1088 = vst [vmem:[%s4011_s2 + $0x20] sm:$0xff] %v1080_v59  ;;  %v1068_v63 = vadd.f32 %v2290_v41, %v1067_v62  ;;  %2595 = vmatprep.mubr.f32.mxu0 %v1080_v59  ;;  %2954 = vmatprep.subr.bf16.mxu1 %v2953_v57 }
 0x2a5   : > { %v1083_v0 = vmax.f32 %v1073_v61, 0.0  ;;  %2596 = vmatmul.mubr.f32.gmra.mrb[12].mxu0 %v1081_v58  ;;  %v1511_v58 = vld [vmem:[#allocation8 + $0x18] sm:$0xff]  ;;  %v1513_v61 = vld [vmem:[#allocation8 + $0x28] sm:$0xff] }
 0x2a6   : > { %v1082_v1 = vmax.f32 %v1068_v63, 0.0  ;;  %2932 = vmatpush3.bf16.msra.mxu0 %v2929_v13  ;;  %v2957_v59 = vpack.c.bf16 %v1511_v58, %v1510_v56  ;;  %v2961_v62 = vpack.c.bf16 %v1513_v61, %v1512_v60  ;;  %v1514_v63 = vld [vmem:[#allocation8 + $0x30] sm:$0xff] }
 0x2a7   : > { %1091 = vst [vmem:[%s4011_s2 + $0x38] sm:$0xff] %v1083_v0  ;;  %2934 = vmatprep.subr.bf16.mxu0 %v2933_v16 }
 0x2a8   : > { %1090 = vst [vmem:[%s4011_s2 + $0x30] sm:$0xff] %v1082_v1  ;;  %2598 = vmatprep.mubr.f32.mxu0 %v1082_v1  ;;  %s4080_s2 = scalar_lea.sflag [#allocation15], %s4309_s16 }
 0x2a9   : > { %2599 = vmatmul.mubr.f32.gmra.mrb[14].mxu0 %v1083_v0  ;;  %v1515_v0 = vld [vmem:[#allocation8 + $0x38] sm:$0xff] }
 0x2aa   : > { %2936 = vmatpush3.bf16.msra.mxu0 %v2933_v16  ;;  %v2965_v1 = vpack.c.bf16 %v1515_v0, %v1514_v63 }
 0x2ab   : > { %2938 = vmatprep.subr.bf16.mxu0 %v2937_v19 }
 0x2ae   : > { %2940 = vmatpush3.bf16.msra.mxu0 %v2937_v19 }
 0x2af   : > { %2942 = vmatprep.subr.bf16.mxu0 %v2941_v22 }
 0x2b2   : > { %2944 = vmatpush3.bf16.msra.mxu0 %v2941_v22 }
 0x2b3   : > { %2946 = vmatprep.subr.bf16.mxu0 %v2945_v25 }
 0x2b6   : > { %2948 = vmatpush3.bf16.msra.mxu0 %v2945_v25 }
 0x2b7   : > { %2950 = vmatprep.subr.bf16.mxu0 %v2949_v53 }
 0x2ba   : > { %2952 = vmatpush3.bf16.msra.mxu0 %v2949_v53 }
 0x370   : > { %v2591_v27 = vpop.f32.mrb[8].mxu0 }
 0x371   : > { %v1187_v28 = vadd.f32 %v2591_v27, %v2291_v26  ;;  %v1181_v29 = vpop.f32.mrb[9].mxu0 }
 0x372   : > { %v1182_v30 = vadd.f32 %v2291_v26, %v1181_v29  ;;  %v1523_v29 = vld [vmem:[#allocation8 + $0x78] sm:$0xff] }
 0x373   : > { %v1221_v31 = vmax.f32 %v1187_v28, 0.0  ;;  %v1522_v28 = vld [vmem:[#allocation8 + $0x70] sm:$0xff] }
 0x374   : > { %v1220_v32 = vmax.f32 %v1182_v30, 0.0  ;;  %v2594_v33 = vpop.f32.mrb[10].mxu0  ;;  %v2981_v30 = vpack.c.bf16 %v1523_v29, %v1522_v28  ;;  %v1788_v28 = vld [vmem:[#allocation11 + $0x40] sm:$0xff]  ;;  %v1789_v29 = vld [vmem:[#allocation11 + $0x48] sm:$0xff] }
 0x375   : > { %1229 = vst [vmem:[%s4025_s11 + $0x8] sm:$0xff] %v1221_v31  ;;  %v1197_v34 = vadd.f32 %v2594_v33, %v2291_v26  ;;  %v1191_v35 = vpop.f32.mrb[11].mxu0  ;;  %v1646_v33 = vld [vmem:[#allocation10 + $0x10] sm:$0xff] }
 0x376   : > { %1228 = vst [vmem:[%s4025_s11] sm:$0xff] %v1220_v32  ;;  %v1192_v36 = vadd.f32 %v2291_v26, %v1191_v35  ;;  %2633 = vmatprep.mubr.f32.mxu1 %v1220_v32  ;;  %v1645_v32 = vld [vmem:[#allocation10 + $0x8] sm:$0xff]  ;;  %v1647_v35 = vld [vmem:[#allocation10 + $0x18] sm:$0xff] }
 0x377   : > { %v1223_v37 = vmax.f32 %v1197_v34, 0.0  ;;  %2634 = vmatmul.mubr.f32.vlgmr.msra.gmra.mrb[8].mxu1 %v1221_v31  ;;  %v1644_v31 = vld [vmem:[#allocation10] sm:$0xff] }
 0x378   : > { %v1222_v38 = vmax.f32 %v1192_v36, 0.0  ;;  %v2597_v39 = vpop.f32.mrb[12].mxu0  ;;  %2956 = vmatpush3.bf16.msra.mxu1 %v2953_v57  ;;  %v2985_v34 = vpack.c.bf16 %v1645_v32, %v1644_v31  ;;  %v2989_v36 = vpack.c.bf16 %v1647_v35, %v1646_v33  ;;  %v1790_v31 = vld [vmem:[#allocation11 + $0x50] sm:$0xff]  ;;  %v1791_v32 = vld [vmem:[#allocation11 + $0x58] sm:$0xff]  ;;  %v1793_v35 = vld [vmem:[#allocation11 + $0x68] sm:$0xff] }
 0x379   : > { %1231 = vst [vmem:[%s4025_s11 + $0x18] sm:$0xff] %v1223_v37  ;;  %v1207_v40 = vadd.f32 %v2597_v39, %v2291_v26  ;;  %v1201_v41 = vpop.f32.mrb[13].mxu0  ;;  %2958 = vmatprep.subr.bf16.mxu1 %v2957_v59  ;;  %v3037_v33 = vpack.c.bf16 %v1791_v32, %v1790_v31 }
 0x37a   : > { %1230 = vst [vmem:[%s4025_s11 + $0x10] sm:$0xff] %v1222_v38  ;;  %v1202_v42 = vadd.f32 %v2291_v26, %v1201_v41  ;;  %2636 = vmatprep.mubr.f32.mxu1 %v1222_v38  ;;  %v1649_v38 = vld [vmem:[#allocation10 + $0x28] sm:$0xff]  ;;  %2986 = vmatprep.subr.bf16.mxu0 %v2985_v34  ;;  %v1651_v41 = vld [vmem:[#allocation10 + $0x38] sm:$0xff] }
 0x37b   : > { %v1225_v43 = vmax.f32 %v1207_v40, 0.0  ;;  %2637 = vmatmul.mubr.f32.gmra.mrb[10].mxu1 %v1223_v37  ;;  %v1648_v37 = vld [vmem:[#allocation10 + $0x20] sm:$0xff]  ;;  %v1650_v40 = vld [vmem:[#allocation10 + $0x30] sm:$0xff] }
 0x37c   : > { %v1224_v44 = vmax.f32 %v1202_v42, 0.0  ;;  %v2600_v45 = vpop.f32.mrb[14].mxu0  ;;  %2960 = vmatpush3.bf16.msra.mxu1 %v2957_v59  ;;  %v2993_v39 = vpack.c.bf16 %v1649_v38, %v1648_v37  ;;  %v2997_v42 = vpack.c.bf16 %v1651_v41, %v1650_v40  ;;  %v2294_v37 = vld [vmem:[%s4280_s12] ss:$0 sm:$0xff] }
 0x37d   : > { %1233 = vst [vmem:[%s4025_s11 + $0x28] sm:$0xff] %v1225_v43  ;;  %v1217_v46 = vadd.f32 %v2600_v45, %v2291_v26  ;;  %v1211_v47 = vpop.f32.mrb[15].mxu0  ;;  %2962 = vmatprep.subr.bf16.mxu1 %v2961_v62 }
 0x37e   : > { %1232 = vst [vmem:[%s4025_s11 + $0x20] sm:$0xff] %v1224_v44  ;;  %v1212_v48 = vadd.f32 %v2291_v26, %v1211_v47  ;;  %2639 = vmatprep.mubr.f32.mxu1 %v1224_v44  ;;  %v1653_v44 = vld [vmem:[#allocation10 + $0x48] sm:$0xff]  ;;  %v1655_v47 = vld [vmem:[#allocation10 + $0x58] sm:$0xff] }
 0x37f   : > { %v1227_v49 = vmax.f32 %v1217_v46, 0.0  ;;  %2640 = vmatmul.mubr.f32.gmra.mrb[12].mxu1 %v1225_v43  ;;  %v1652_v43 = vld [vmem:[#allocation10 + $0x40] sm:$0xff]  ;;  %v1654_v46 = vld [vmem:[#allocation10 + $0x50] sm:$0xff] }
 0x380   : > { %v1226_v50 = vmax.f32 %v1212_v48, 0.0  ;;  %2964 = vmatpush3.bf16.msra.mxu1 %v2961_v62  ;;  %v3001_v45 = vpack.c.bf16 %v1653_v44, %v1652_v43  ;;  %v3005_v48 = vpack.c.bf16 %v1655_v47, %v1654_v46 }
 0x381   : > { %1235 = vst [vmem:[%s4025_s11 + $0x38] sm:$0xff] %v1227_v49  ;;  %2966 = vmatprep.subr.bf16.mxu1 %v2965_v1 }
 0x382   : > { %1234 = vst [vmem:[%s4025_s11 + $0x30] sm:$0xff] %v1226_v50  ;;  %2642 = vmatprep.mubr.f32.mxu1 %v1226_v50  ;;  %v1657_v50 = vld [vmem:[#allocation10 + $0x68] sm:$0xff]  ;;  %s3357_s11 = scalar_lea.vmem %s4061_s26, 1024 }
 0x383   : > { %2643 = vmatmul.mubr.f32.gmra.mrb[14].mxu1 %v1227_v49  ;;  %v1656_v49 = vld [vmem:[#allocation10 + $0x60] sm:$0xff]  ;;  %p3358_p13 = scmp.ne.s32.totalorder %s4061_s26, %s3357_s11  ;;  %p3365_p0 = scmp.lt.s32.totalorder %s3363_s27, %s3357_s11 }
 0x384   : > { %2968 = vmatpush3.bf16.msra.mxu1 %v2965_v1  ;;  %v3009_v51 = vpack.c.bf16 %v1657_v50, %v1656_v49 }
 0x385   : > { %2970 = vmatprep.subr.bf16.mxu1 %v2969_v4  ;;  %p3359_p6 = pnand %p3358_p13, %p4359_p1  ;;  %p3366_p10 = por %p3365_p0, %p3364_p5 }
 0x387   : > { %p3360_p9 = pneg %p3359_p6 }
 0x388   : > { %2972 = vmatpush3.bf16.msra.mxu1 %v2969_v4 }
 0x389   : > { %2974 = vmatprep.subr.bf16.mxu1 %v2973_v7  ;;  %p3367_p2 = pnand %p3366_p10, %p3360_p9 }
 0x38c   : > { %2976 = vmatpush3.bf16.msra.mxu1 %v2973_v7 }
 0x38d   : > { %2978 = vmatprep.subr.bf16.mxu1 %v2977_v10 }
 0x390   : > { %2980 = vmatpush3.bf16.msra.mxu1 %v2977_v10 }
 0x391   : > { %2982 = vmatprep.subr.bf16.mxu1 %v2981_v30 }
 0x394   : > { %2984 = vmatpush3.bf16.msra.mxu1 %v2981_v30  ;;  %v3033_v30 = vpack.c.bf16 %v1789_v29, %v1788_v28 }
 0x44a   : > { %v2635_v12 = vpop.f32.mrb[8].mxu1 }
 0x44b   : > { %v1331_v13 = vadd.f32 %v2635_v12, %v2292_v11  ;;  %v1325_v14 = vpop.f32.mrb[9].mxu1 }
 0x44c   : > { %v1326_v15 = vadd.f32 %v2292_v11, %v1325_v14  ;;  %v1659_v14 = vld [vmem:[#allocation10 + $0x78] sm:$0xff] }
 0x44d   : > { %1365 = vst [vmem:[%s4039_s30 + $0x8] sm:$0xff] %v1331_v13 }
 0x44e   : > { %1364 = vst [vmem:[%s4039_s30] sm:$0xff] %v1326_v15  ;;  %v2638_v16 = vpop.f32.mrb[10].mxu1  ;;  %2677 = vmatprep.mubr.f32.mxu0 %v1326_v15 }
 0x44f   : > { %v1341_v17 = vadd.f32 %v2638_v16, %v2292_v11  ;;  %v1335_v18 = vpop.f32.mrb[11].mxu1  ;;  %2678 = vmatmul.mubr.f32.vlgmr.msra.gmra.mrb[16].mxu0 %v1331_v13  ;;  %v1658_v13 = vld [vmem:[#allocation10 + $0x70] sm:$0xff]  ;;  %v1780_v16 = vld [vmem:[#allocation11] sm:$0xff] }
 0x450   : > { %v1336_v19 = vadd.f32 %v2292_v11, %v1335_v18  ;;  %2988 = vmatpush3.bf16.msra.mxu0 %v2985_v34  ;;  %v3013_v15 = vpack.c.bf16 %v1659_v14, %v1658_v13  ;;  %v1782_v18 = vld [vmem:[#allocation11 + $0x10] sm:$0xff]  ;;  %v1792_v34 = vld [vmem:[#allocation11 + $0x60] sm:$0xff] }
 0x451   : > { %1367 = vst [vmem:[%s4039_s30 + $0x18] sm:$0xff] %v1341_v17  ;;  %2990 = vmatprep.subr.bf16.mxu0 %v2989_v36 }
 0x452   : > { %1366 = vst [vmem:[%s4039_s30 + $0x10] sm:$0xff] %v1336_v19  ;;  %v2641_v20 = vpop.f32.mrb[12].mxu1  ;;  %2680 = vmatprep.mubr.f32.mxu0 %v1336_v19 }
 0x453   : > { %v1351_v21 = vadd.f32 %v2641_v20, %v2292_v11  ;;  %v1345_v22 = vpop.f32.mrb[13].mxu1  ;;  %2681 = vmatmul.mubr.f32.gmra.mrb[18].mxu0 %v1341_v17  ;;  %v1781_v17 = vld [vmem:[#allocation11 + $0x8] sm:$0xff]  ;;  %v1783_v20 = vld [vmem:[#allocation11 + $0x18] sm:$0xff] }
 0x454   : > { %v1346_v23 = vadd.f32 %v2292_v11, %v1345_v22  ;;  %2992 = vmatpush3.bf16.msra.mxu0 %v2989_v36  ;;  %v3017_v19 = vpack.c.bf16 %v1781_v17, %v1780_v16  ;;  %v1784_v22 = vld [vmem:[#allocation11 + $0x20] sm:$0xff]  ;;  %v3041_v36 = vpack.c.bf16 %v1793_v35, %v1792_v34 }
 0x455   : > { %1369 = vst [vmem:[%s4039_s30 + $0x28] sm:$0xff] %v1351_v21  ;;  %2994 = vmatprep.subr.bf16.mxu0 %v2993_v39 }
 0x456   : > { %1368 = vst [vmem:[%s4039_s30 + $0x20] sm:$0xff] %v1346_v23  ;;  %v2644_v24 = vpop.f32.mrb[14].mxu1  ;;  %2683 = vmatprep.mubr.f32.mxu0 %v1346_v23  ;;  %3049 = vmatprep.subr.bf16.mxu1 %v3017_v19  ;;  %v1785_v23 = vld [vmem:[#allocation11 + $0x28] sm:$0xff] }
 0x457   : > { %v1361_v25 = vadd.f32 %v2644_v24, %v2292_v11  ;;  %v1355_v26 = vpop.f32.mrb[15].mxu1  ;;  %2684 = vmatmul.mubr.f32.gmra.mrb[20].mxu0 %v1351_v21  ;;  %v3021_v21 = vpack.c.bf16 %v1783_v20, %v1782_v18  ;;  %v3025_v24 = vpack.c.bf16 %v1785_v23, %v1784_v22 }
 0x458   : > { %v1356_v27 = vadd.f32 %v2292_v11, %v1355_v26  ;;  %2996 = vmatpush3.bf16.msra.mxu0 %v2993_v39  ;;  %v1787_v26 = vld [vmem:[#allocation11 + $0x38] sm:$0xff] }
 0x459   : > { %1371 = vst [vmem:[%s4039_s30 + $0x38] sm:$0xff] %v1361_v25  ;;  %2998 = vmatprep.subr.bf16.mxu0 %v2997_v42 }
 0x45a   : > { %1370 = vst [vmem:[%s4039_s30 + $0x30] sm:$0xff] %v1356_v27  ;;  %2686 = vmatprep.mubr.f32.mxu0 %v1356_v27 }
 0x45b   : > { %2687 = vmatmul.mubr.f32.gmra.mrb[22].mxu0 %v1361_v25  ;;  %v1786_v25 = vld [vmem:[#allocation11 + $0x30] sm:$0xff] }
 0x45c   : > { %3000 = vmatpush3.bf16.msra.mxu0 %v2997_v42  ;;  %v3029_v27 = vpack.c.bf16 %v1787_v26, %v1786_v25 }
 0x45d   : > { %3002 = vmatprep.subr.bf16.mxu0 %v3001_v45 }
 0x460   : > { %3004 = vmatpush3.bf16.msra.mxu0 %v3001_v45 }
 0x461   : > { %3006 = vmatprep.subr.bf16.mxu0 %v3005_v48 }
 0x464   : > { %3008 = vmatpush3.bf16.msra.mxu0 %v3005_v48 }
 0x465   : > { %3010 = vmatprep.subr.bf16.mxu0 %v3009_v51 }
 0x468   : > { %3012 = vmatpush3.bf16.msra.mxu0 %v3009_v51 }
 0x469   : > { %3014 = vmatprep.subr.bf16.mxu0 %v3013_v15 }
 0x46c   : > { %3016 = vmatpush3.bf16.msra.mxu0 %v3013_v15 }
 0x46d   : > { %3018 = vmatprep.subr.bf16.mxu0 %v3017_v19 }
 0x522   : > { %v2679_v53 = vpop.f32.mrb[16].mxu0 }
 0x523   : > { %v1467_v54 = vadd.f32 %v2679_v53, %v2293_v52  ;;  %v1461_v55 = vpop.f32.mrb[17].mxu0 }
 0x524   : > { %v1462_v56 = vadd.f32 %v2293_v52, %v1461_v55 }
 0x525   : > { %v1501_v59 = vmax.f32 %v1467_v54, 0.0 }
 0x526   : > { %v1500_v57 = vmax.f32 %v1462_v56, 0.0  ;;  %v2682_v58 = vpop.f32.mrb[18].mxu0 }
 0x527   : > { %v1477_v60 = vadd.f32 %v2682_v58, %v2293_v52  ;;  %v1471_v61 = vpop.f32.mrb[19].mxu0 }
 0x528   : > { %v1472_v62 = vadd.f32 %v2293_v52, %v1471_v61  ;;  %2721 = vmatprep.mubr.f32.mxu1 %v1500_v57 }
 0x529   : > { %2722 = vmatmul.mubr.f32.vlgmr.msra.gmra.mrb[16].mxu1 %v1501_v59  ;;  %v1503_v1 = vmax.f32 %v1477_v60, 0.0 }
 0x52a   : > { %v1502_v63 = vmax.f32 %v1472_v62, 0.0  ;;  %v2685_v0 = vpop.f32.mrb[20].mxu0  ;;  %3057 = vmatpush3.bf16.msra.mxu1 %v3017_v19  ;;  %v1794_v62 = vld [vmem:[#allocation11 + $0x70] sm:$0xff] }
 0x52b   : > { %v1487_v2 = vadd.f32 %v2685_v0, %v2293_v52  ;;  %v1481_v3 = vpop.f32.mrb[21].mxu0  ;;  %3050 = vmatprep.subr.bf16.mxu1 %v3021_v21 }
 0x52c   : > { %v1482_v4 = vadd.f32 %v2293_v52, %v1481_v3  ;;  %2724 = vmatprep.mubr.f32.mxu1 %v1502_v63  ;;  %v1795_v63 = vld [vmem:[#allocation11 + $0x78] sm:$0xff] }
 0x52d   : > { %2725 = vmatmul.mubr.f32.gmra.mrb[18].mxu1 %v1503_v1  ;;  %v1505_v7 = vmax.f32 %v1487_v2, 0.0  ;;  %v3045_v0 = vpack.c.bf16 %v1795_v63, %v1794_v62  ;;  %v2295_v1 = vld [vmem:[%s4282_s14] ss:$0 sm:$0xff] }
 0x52e   : > { %v1504_v5 = vmax.f32 %v1482_v4, 0.0  ;;  %v2688_v6 = vpop.f32.mrb[22].mxu0  ;;  %3058 = vmatpush3.bf16.msra.mxu1 %v3021_v21 }
 0x52f   : > { %v1497_v8 = vadd.f32 %v2688_v6, %v2293_v52  ;;  %v1491_v9 = vpop.f32.mrb[23].mxu0  ;;  %3051 = vmatprep.subr.bf16.mxu1 %v3025_v24 }
 0x530   : > { %v1492_v10 = vadd.f32 %v2293_v52, %v1491_v9  ;;  %2727 = vmatprep.mubr.f32.mxu1 %v1504_v5 }
 0x531   : > { %2728 = vmatmul.mubr.f32.gmra.mrb[20].mxu1 %v1505_v7  ;;  %v1507_v12 = vmax.f32 %v1497_v8, 0.0 }
 0x532   : > { %v1506_v11 = vmax.f32 %v1492_v10, 0.0  ;;  %3059 = vmatpush3.bf16.msra.mxu1 %v3025_v24 }
 0x533   : > { %3052 = vmatprep.subr.bf16.mxu1 %v3029_v27 }
 0x534   : > { %2730 = vmatprep.mubr.f32.mxu1 %v1506_v11 }
 0x535   : > { %2731 = vmatmul.mubr.f32.gmra.mrb[22].mxu1 %v1507_v12 }
 0x536   : > { %3060 = vmatpush3.bf16.msra.mxu1 %v3029_v27 }
 0x537   : > { %3053 = vmatprep.subr.bf16.mxu1 %v3033_v30 }
 0x53a   : > { %3061 = vmatpush3.bf16.msra.mxu1 %v3033_v30 }
 0x53b   : > { %3054 = vmatprep.subr.bf16.mxu1 %v3037_v33 }
 0x53e   : > { %3062 = vmatpush3.bf16.msra.mxu1 %v3037_v33 }
 0x53f   : > { %3055 = vmatprep.subr.bf16.mxu1 %v3041_v36 }
 0x542   : > { %3063 = vmatpush3.bf16.msra.mxu1 %v3041_v36 }
 0x543   : > { %3056 = vmatprep.subr.bf16.mxu1 %v3045_v0 }
 0x546   : > { %3064 = vmatpush3.bf16.msra.mxu1 %v3045_v0 }
 0x5fc   : > { %v2723_v38 = vpop.f32.mrb[16].mxu1 }
 0x5fd   : > { %v1603_v39 = vadd.f32 %v2723_v38, %v2294_v37  ;;  %v1597_v40 = vpop.f32.mrb[17].mxu1 }
 0x5fe   : > { %v1598_v41 = vadd.f32 %v2294_v37, %v1597_v40 }
 0x5ff   : > { %v1637_v44 = vmax.f32 %v1603_v39, 0.0 }
 0x600   : > { %v1636_v42 = vmax.f32 %v1598_v41, 0.0  ;;  %v2726_v43 = vpop.f32.mrb[18].mxu1 }
 0x601   : > { %v1613_v45 = vadd.f32 %v2726_v43, %v2294_v37  ;;  %v1607_v46 = vpop.f32.mrb[19].mxu1 }
 0x602   : > { %v1608_v47 = vadd.f32 %v2294_v37, %v1607_v46  ;;  %2765 = vmatprep.mubr.f32.mxu0 %v1636_v42 }
 0x603   : > { %2766 = vmatmul.mubr.f32.vlgmr.msra.gmra.mrb[24].mxu0 %v1637_v44  ;;  %v1639_v50 = vmax.f32 %v1613_v45, 0.0 }
 0x604   : > { %v1638_v48 = vmax.f32 %v1608_v47, 0.0  ;;  %v2729_v49 = vpop.f32.mrb[20].mxu1  ;;  %3020 = vmatpush3.bf16.msra.mxu0 %v3017_v19 }
 0x605   : > { %v1623_v51 = vadd.f32 %v2729_v49, %v2294_v37  ;;  %v1617_v52 = vpop.f32.mrb[21].mxu1  ;;  %3022 = vmatprep.subr.bf16.mxu0 %v3021_v21 }
 0x606   : > { %v1618_v53 = vadd.f32 %v2294_v37, %v1617_v52  ;;  %2768 = vmatprep.mubr.f32.mxu0 %v1638_v48 }
 0x607   : > { %2769 = vmatmul.mubr.f32.gmra.mrb[26].mxu0 %v1639_v50  ;;  %v1641_v56 = vmax.f32 %v1623_v51, 0.0 }
 0x608   : > { %v1640_v54 = vmax.f32 %v1618_v53, 0.0  ;;  %v2732_v55 = vpop.f32.mrb[22].mxu1  ;;  %3024 = vmatpush3.bf16.msra.mxu0 %v3021_v21 }
 0x609   : > { %v1633_v57 = vadd.f32 %v2732_v55, %v2294_v37  ;;  %v1627_v58 = vpop.f32.mrb[23].mxu1  ;;  %3026 = vmatprep.subr.bf16.mxu0 %v3025_v24 }
 0x60a   : > { %v1628_v59 = vadd.f32 %v2294_v37, %v1627_v58  ;;  %2771 = vmatprep.mubr.f32.mxu0 %v1640_v54 }
 0x60b   : > { %2772 = vmatmul.mubr.f32.gmra.mrb[28].mxu0 %v1641_v56  ;;  %v1643_v61 = vmax.f32 %v1633_v57, 0.0 }
 0x60c   : > { %v1642_v60 = vmax.f32 %v1628_v59, 0.0  ;;  %3028 = vmatpush3.bf16.msra.mxu0 %v3025_v24 }
 0x60d   : > { %3030 = vmatprep.subr.bf16.mxu0 %v3029_v27 }
 0x60e   : > { %2774 = vmatprep.mubr.f32.mxu0 %v1642_v60 }
 0x60f   : > { %2775 = vmatmul.mubr.f32.gmra.mrb[30].mxu0 %v1643_v61 }
 0x610   : > { %3032 = vmatpush3.bf16.msra.mxu0 %v3029_v27 }
 0x611   : > { %3034 = vmatprep.subr.bf16.mxu0 %v3033_v30 }
 0x614   : > { %3036 = vmatpush3.bf16.msra.mxu0 %v3033_v30 }
 0x615   : > { %3038 = vmatprep.subr.bf16.mxu0 %v3037_v33 }
 0x618   : > { %3040 = vmatpush3.bf16.msra.mxu0 %v3037_v33 }
 0x619   : > { %3042 = vmatprep.subr.bf16.mxu0 %v3041_v36 }
 0x61c   : > { %3044 = vmatpush3.bf16.msra.mxu0 %v3041_v36 }
 0x61d   : > { %3046 = vmatprep.subr.bf16.mxu0 %v3045_v0 }
 0x620   : > { %3048 = vmatpush3.bf16.msra.mxu0 %v3045_v0 }
 0x6d6   : > { %v2767_v2 = vpop.f32.mrb[24].mxu0 }
 0x6d7   : > { %v1739_v3 = vadd.f32 %v2767_v2, %v2295_v1  ;;  %v1733_v4 = vpop.f32.mrb[25].mxu0 }
 0x6d8   : > { %v1734_v5 = vadd.f32 %v2295_v1, %v1733_v4 }
 0x6d9   : > { %v1773_v8 = vmax.f32 %v1739_v3, 0.0 }
 0x6da   : > { %v1772_v6 = vmax.f32 %v1734_v5, 0.0  ;;  %v2770_v7 = vpop.f32.mrb[26].mxu0 }
 0x6db   : > { %v1749_v9 = vadd.f32 %v2770_v7, %v2295_v1  ;;  %v1743_v10 = vpop.f32.mrb[27].mxu0 }
 0x6dc   : > { %v1744_v11 = vadd.f32 %v2295_v1, %v1743_v10  ;;  %2809 = vmatprep.mubr.f32.mxu0 %v1772_v6 }
 0x6dd   : > { %2810 = vmatmul.mubr.f32.vlgmr.msra.gmra.mrb[32].mxu0 %v1773_v8  ;;  %v1775_v14 = vmax.f32 %v1749_v9, 0.0 }
 0x6de   : > { %v1774_v12 = vmax.f32 %v1744_v11, 0.0  ;;  %v2773_v13 = vpop.f32.mrb[28].mxu0 }
 0x6df   : > { %v1759_v15 = vadd.f32 %v2773_v13, %v2295_v1  ;;  %v1753_v16 = vpop.f32.mrb[29].mxu0 }
 0x6e0   : > { %v1754_v17 = vadd.f32 %v2295_v1, %v1753_v16  ;;  %2812 = vmatprep.mubr.f32.mxu1 %v1774_v12 }
 0x6e1   : > { %2813 = vmatmul.mubr.f32.vlgmr.msra.gmra.mrb[24].mxu1 %v1775_v14  ;;  %v1777_v20 = vmax.f32 %v1759_v15, 0.0 }
 0x6e2   : > { %v1776_v18 = vmax.f32 %v1754_v17, 0.0  ;;  %v2776_v19 = vpop.f32.mrb[30].mxu0 }
 0x6e3   : > { %v1769_v21 = vadd.f32 %v2776_v19, %v2295_v1  ;;  %v1763_v22 = vpop.f32.mrb[31].mxu0 }
 0x6e4   : > { %v1764_v23 = vadd.f32 %v2295_v1, %v1763_v22  ;;  %2815 = vmatprep.mubr.f32.mxu1 %v1776_v18 }
 0x6e5   : > { %2816 = vmatmul.mubr.f32.gmra.mrb[26].mxu1 %v1777_v20  ;;  %v1779_v25 = vmax.f32 %v1769_v21, 0.0 }
 0x6e6   : > { %v1778_v24 = vmax.f32 %v1764_v23, 0.0 }
 0x6e8   : > { %2818 = vmatprep.mubr.f32.mxu1 %v1778_v24 }
 0x6e9   : > { %2819 = vmatmul.mubr.f32.gmra.mrb[28].mxu1 %v1779_v25 }
 0x6ea   : > { %3370 = shalt.err (!%p3367_p2)
}
 0x6eb   : > { %s3371_s28 = scalar_lea.hbm %s4076_s17, 1024  ;;  %s3375_s0 = scalar_lea.hbm %s4286_s18, 2048 }
 0x6ec   : > { %p3372_p3 = scmp.ne.s32.totalorder %s4076_s17, %s3371_s28  ;;  %p3376_p7 = scmp.lt.u32.totalorder %s4076_s17, %s4286_s18 }
 0x6ed   : > { %p3377_p8 = scmp.lt.u32.totalorder %s3375_s0, %s3371_s28  ;;  %p3379_p13 = scmp.lt.u32.totalorder %s3371_s28, %s4076_s17 }
 0x6ee   : > { %p3373_p4 = pnand %p3372_p3, %p4359_p1 }
 0x6ef   : > { %p3378_p11 = por %p3377_p8, %p3376_p7 }
 0x6f0   : > { %p3374_p12 = pneg %p3373_p4 }
 0x6f1   : > { %p3380_p6 = por %p3379_p13, %p3378_p11 }
 0x6f3   : > { %p3381_p9 = pnand %p3380_p6, %p3374_p12 }
 0x6f5   : > { %3384 = shalt.err (!%p3381_p9)
}
 0x6f6   : > { %s3566_s27 = smov 128   ;;  %s3567_s1 = smov 8  }
 0x6f7   : > { %3090 = dma.vmem_to_hbm [thread:$0]  (%p4359_p1), %s4061_s26, 1024, %s4076_s17, %s4080_s2, %s3566_s27, %s3566_s27, %s3567_s1  }
 0x6f8   : > { %s4360_s28 = sld [smem:[#allocation48_spill]]  ;;  %s4361_s0 = sand.u32 1, %s3703_s3  }
 0x6f9   : > { %s4115_s29 = scalar_lea.sflag [#allocation18], %s4361_s0  ;;  %s3385_s6 = scalar_lea.vmem %s4065_s20, 1024 }
 0x6fa   : > { %p3386_p5 = scmp.ne.s32.totalorder %s4065_s20, %s3385_s6  ;;  %s3568_s8 = smov [#allocation17]  }
 0x6fb   : > { %s3389_s9 = sshll.u32 %s3568_s8, 4  ;;  %s3390_s9 = int_to_ptr.vmem [resolvable:$false] %s3389_s9 }
 0x6fc   : > { %p3387_p0 = pnand %p3386_p5, %p4359_p1  ;;  %s3391_s10 = scalar_lea.vmem %s3390_s9, 2048 }
 0x6fd   : > { %p3392_p2 = scmp.lt.s32.totalorder %s4065_s20, %s3390_s9  ;;  %p3393_p3 = scmp.lt.s32.totalorder %s3391_s10, %s3385_s6 }
 0x6fe   : > { %s4111_s23 = scalar_lea.hbm %s4360_s28, %s4070_s4  ;;  %p3388_p10 = pneg %p3387_p0 }
 0x6ff   : > { %p3394_p4 = por %p3393_p3, %p3392_p2 }
 0x701   : > { %p3395_p12 = pnand %p3394_p4, %p3388_p10 }
 0x703   : > { %3398 = shalt.err (!%p3395_p12)
}
 0x704   : > { %s3399_s3 = scalar_lea.hbm %s4111_s23, 1024  ;;  %s3403_s8 = scalar_lea.hbm %s4360_s28, 2048 }
 0x705   : > { %p3400_p7 = scmp.ne.s32.totalorder %s4111_s23, %s3399_s3  ;;  %p3404_p13 = scmp.lt.u32.totalorder %s4111_s23, %s4360_s28 }
 0x706   : > { %p3405_p6 = scmp.lt.u32.totalorder %s3403_s8, %s3399_s3  ;;  %p3407_p5 = scmp.lt.u32.totalorder %s3399_s3, %s4111_s23 }
 0x707   : > { %p3401_p8 = pnand %p3400_p7, %p4359_p1 }
 0x708   : > { %p3406_p9 = por %p3405_p6, %p3404_p13 }
 0x709   : > { %p3402_p11 = pneg %p3401_p8 }
 0x70a   : > { %p3408_p0 = por %p3407_p5, %p3406_p9 }
 0x70c   : > { %p3409_p10 = pnand %p3408_p0, %p3402_p11 }
 0x70e   : > { %3412 = shalt.err (!%p3409_p10)
}
 0x70f   : > { %3092 = dma.vmem_to_hbm [thread:$0]  (%p4359_p1), %s4065_s20, 1024, %s4111_s23, %s4115_s29, %s3566_s27, %s3566_s27, %s3567_s1  }
 0x710   : > { %s4362_s6 = sshll.u32 %s4039_s30, 4  ;;  %s4363_s0 = sld [smem:[#allocation47_spill]]  ;;  %s4144_s6 = int_to_ptr.vmem [resolvable:$true] %s4362_s6 }
 0x711   : > { %s3413_s26 = scalar_lea.vmem %s4063_s7, 1024  ;;  %s3569_s17 = smov [#allocation16]  }
 0x712   : > { %p3414_p2 = scmp.ne.s32.totalorder %s4063_s7, %s3413_s26  ;;  %s3417_s8 = sshll.u32 %s3569_s17, 4  ;;  %s3418_s8 = int_to_ptr.vmem [resolvable:$false] %s3417_s8 }
 0x713   : > { %s3419_s16 = scalar_lea.vmem %s3418_s8, 2048  ;;  %p3420_p12 = scmp.lt.s32.totalorder %s4063_s7, %s3418_s8 }
 0x714   : > { %p3415_p3 = pnand %p3414_p2, %p4359_p1  ;;  %p3421_p7 = scmp.lt.s32.totalorder %s3419_s16, %s3413_s26 }
 0x716   : > { %s4150_s3 = scalar_lea.hbm %s4363_s0, %s4070_s4  ;;  %p3416_p4 = pneg %p3415_p3 }
 0x717   : > { %p3422_p8 = por %p3421_p7, %p3420_p12 }
 0x719   : > { %p3423_p11 = pnand %p3422_p8, %p3416_p4 }
 0x71b   : > { %3426 = shalt.err (!%p3423_p11)
}
 0x71c   : > { %s3427_s30 = scalar_lea.hbm %s4150_s3, 1024  ;;  %s3431_s9 = scalar_lea.hbm %s4363_s0, 2048 }
 0x71d   : > { %p3428_p13 = scmp.ne.s32.totalorder %s4150_s3, %s3427_s30  ;;  %p3432_p5 = scmp.lt.u32.totalorder %s4150_s3, %s4363_s0 }
 0x71e   : > { %p3433_p0 = scmp.lt.u32.totalorder %s3431_s9, %s3427_s30  ;;  %p3435_p2 = scmp.lt.u32.totalorder %s3427_s30, %s4150_s3 }
 0x71f   : > { %p3429_p6 = pnand %p3428_p13, %p4359_p1 }
 0x720   : > { %p3434_p10 = por %p3433_p0, %p3432_p5 }
 0x721   : > { %p3430_p9 = pneg %p3429_p6 }
 0x722   : > { %p3436_p3 = por %p3435_p2, %p3434_p10 }
 0x724   : > { %p3437_p4 = pnand %p3436_p3, %p3430_p9 }
 0x726   : > { %3440 = shalt.err (!%p3437_p4)
}
 0x727   : > { %3091 = dma.vmem_to_hbm [thread:$0]  (%p4359_p1), %s4063_s7, 1024, %s4150_s3, %s4080_s2, %s3566_s27, %s3566_s27, %s3567_s1  }
 0x728   : > { %s4364_s8 = sld [smem:[#allocation49_spill]]  ;;  %s3441_s30 = scalar_lea.vmem %s4144_s6, 1024 }
 0x729   : > { %p3442_p12 = scmp.ne.s32.totalorder %s4144_s6, %s3441_s30  ;;  %s3570_s20 = smov [#allocation19]  }
 0x72a   : > { %s3445_s23 = sshll.u32 %s3570_s20, 4  ;;  %s3446_s23 = int_to_ptr.vmem [resolvable:$false] %s3445_s23 }
 0x72b   : > { %p3443_p7 = pnand %p3442_p12, %p4359_p1  ;;  %s3447_s9 = scalar_lea.vmem %s3446_s23, 2048 }
 0x72c   : > { %p3448_p11 = scmp.lt.s32.totalorder %s4144_s6, %s3446_s23  ;;  %p3449_p13 = scmp.lt.s32.totalorder %s3447_s9, %s3441_s30 }
 0x72d   : > { %p3444_p8 = pneg %p3443_p7 }
 0x72e   : > { %s4181_s16 = scalar_lea.hbm %s4364_s8, %s4070_s4  ;;  %p3450_p6 = por %p3449_p13, %p3448_p11 }
 0x730   : > { %p3451_p9 = pnand %p3450_p6, %p3444_p8 }
 0x732   : > { %3454 = shalt.err (!%p3451_p9)
}
 0x733   : > { %s3455_s7 = scalar_lea.hbm %s4181_s16, 1024  ;;  %s3459_s10 = scalar_lea.hbm %s4364_s8, 2048 }
 0x734   : > { %p3456_p5 = scmp.ne.s32.totalorder %s4181_s16, %s3455_s7  ;;  %p3460_p2 = scmp.lt.u32.totalorder %s4181_s16, %s4364_s8 }
 0x735   : > { %p3461_p3 = scmp.lt.u32.totalorder %s3459_s10, %s3455_s7  ;;  %p3463_p12 = scmp.lt.u32.totalorder %s3455_s7, %s4181_s16 }
 0x736   : > { %p3457_p0 = pnand %p3456_p5, %p4359_p1 }
 0x737   : > { %p3462_p4 = por %p3461_p3, %p3460_p2 }
 0x738   : > { %p3458_p10 = pneg %p3457_p0 }
 0x739   : > { %p3464_p7 = por %p3463_p12, %p3462_p4 }
 0x73b   : > { %p3465_p8 = pnand %p3464_p7, %p3458_p10 }
 0x73d   : > { %3468 = shalt.err (!%p3465_p8)
}
 0x73e   : > { %3093 = dma.vmem_to_hbm [thread:$0]  (%p4359_p1), %s4144_s6, 1024, %s4181_s16, %s4115_s29, %s3566_s27, %s3566_s27, %s3567_s1  }
 0x73f   : > { %s4365_s20 = sld [smem:[#allocation45_spill]]  ;;  %s745_s23 = scalar_lea.vmem [#allocation13], %s3994_s21 }
 0x740   : > { %s1950_s29 = sshll.u32 %s745_s23, 4  ;;  %s4366_s16 = sld [smem:[#allocation46_spill]]  ;;  %s4212_s29 = int_to_ptr.vmem [resolvable:$true] %s1950_s29 }
 0x741   : > { %s4367_s7 = sand.u32 1, %s3547_s25   ;;  %s3469_s3 = scalar_lea.vmem %s4212_s29, 1024 }
 0x742   : > { %s4222_s2 = scalar_lea.sflag [#allocation4], %s4367_s7  ;;  %p3470_p11 = scmp.ne.s32.totalorder %s4212_s29, %s3469_s3 }
 0x743   : > { %s3571_s10 = smov [#allocation13]  }
 0x744   : > { %p3471_p13 = pnand %p3470_p11, %p4359_p1  ;;  %s3473_s11 = sshll.u32 %s3571_s10, 4  ;;  %s3474_s11 = int_to_ptr.vmem [resolvable:$false] %s3473_s11 }
 0x745   : > { %v2296_v26 = vld [vmem:[%s4365_s20] ss:$0 sm:$0xff]  ;;  %s3475_s26 = scalar_lea.vmem %s3474_s11, 2048  ;;  %p3476_p9 = scmp.lt.s32.totalorder %s4212_s29, %s3474_s11 }
 0x746   : > { %s4218_s9 = scalar_lea.hbm %s4366_s16, %s4070_s4  ;;  %p3472_p6 = pneg %p3471_p13 }
 0x747   : > { %p3477_p5 = scmp.lt.s32.totalorder %s3475_s26, %s3469_s3 }
 0x749   : > { %p3478_p0 = por %p3477_p5, %p3476_p9 }
 0x74b   : > { %p3479_p10 = pnand %p3478_p0, %p3472_p6 }
 0x7b0   : > { %v2811_v27 = vpop.f32.mrb[32].mxu0 }
 0x7b1   : > { %v1875_v28 = vadd.f32 %v2811_v27, %v2296_v26  ;;  %v1869_v29 = vpop.f32.mrb[33].mxu0 }
 0x7b2   : > { %v1870_v30 = vadd.f32 %v2296_v26, %v1869_v29 }
 0x7b3   : > { %1909 = vst [vmem:[%s745_s23 + $0x8] sm:$0xff] %v1875_v28 }
 0x7b4   : > { %1908 = vst [vmem:[%s745_s23] sm:$0xff] %v1870_v30  ;;  %v2814_v31 = vpop.f32.mrb[24].mxu1 }
 0x7b5   : > { %v1885_v32 = vadd.f32 %v2814_v31, %v2296_v26  ;;  %v1879_v33 = vpop.f32.mrb[25].mxu1 }
 0x7b6   : > { %v1880_v34 = vadd.f32 %v2296_v26, %v1879_v33 }
 0x7b7   : > { %1911 = vst [vmem:[%s745_s23 + $0x18] sm:$0xff] %v1885_v32 }
 0x7b8   : > { %1910 = vst [vmem:[%s745_s23 + $0x10] sm:$0xff] %v1880_v34  ;;  %v2817_v35 = vpop.f32.mrb[26].mxu1 }
 0x7b9   : > { %v1895_v36 = vadd.f32 %v2817_v35, %v2296_v26  ;;  %v1889_v37 = vpop.f32.mrb[27].mxu1 }
 0x7ba   : > { %v1890_v38 = vadd.f32 %v2296_v26, %v1889_v37 }
 0x7bb   : > { %1913 = vst [vmem:[%s745_s23 + $0x28] sm:$0xff] %v1895_v36 }
 0x7bc   : > { %1912 = vst [vmem:[%s745_s23 + $0x20] sm:$0xff] %v1890_v38  ;;  %v2820_v39 = vpop.f32.mrb[28].mxu1 }
 0x7bd   : > { %v1905_v40 = vadd.f32 %v2820_v39, %v2296_v26  ;;  %v1899_v41 = vpop.f32.mrb[29].mxu1 }
 0x7be   : > { %v1900_v42 = vadd.f32 %v2296_v26, %v1899_v41 }
 0x7bf   : > { %1915 = vst [vmem:[%s745_s23 + $0x38] sm:$0xff] %v1905_v40 }
 0x7c0   : > { %1914 = vst [vmem:[%s745_s23 + $0x30] sm:$0xff] %v1900_v42 }
 0x7c1   : > { %3482 = shalt.err (!%p3479_p10)
}
 0x7c2   : > { %s3483_s4 = scalar_lea.hbm %s4218_s9, 1024  ;;  %s3487_s20 = scalar_lea.hbm %s4366_s16, 2048 }
 0x7c3   : > { %p3484_p2 = scmp.ne.s32.totalorder %s4218_s9, %s3483_s4  ;;  %p3488_p12 = scmp.lt.u32.totalorder %s4218_s9, %s4366_s16 }
 0x7c4   : > { %p3489_p7 = scmp.lt.u32.totalorder %s3487_s20, %s3483_s4  ;;  %p3491_p11 = scmp.lt.u32.totalorder %s3483_s4, %s4218_s9 }
 0x7c5   : > { %p3485_p3 = pnand %p3484_p2, %p4359_p1 }
 0x7c6   : > { %p3490_p8 = por %p3489_p7, %p3488_p12 }
 0x7c7   : > { %p3486_p4 = pneg %p3485_p3 }
 0x7c8   : > { %p3492_p13 = por %p3491_p11, %p3490_p8 }
 0x7ca   : > { %p3493_p6 = pnand %p3492_p13, %p3486_p4 }
 0x7cc   : > { %3496 = shalt.err (!%p3493_p6)
}
 0x7cd   : > { %3089 = dma.vmem_to_hbm [thread:$0]  (%p4359_p1), %s4212_s29, 1024, %s4218_s9, %s4222_s2, %s3566_s27, %s3566_s27, %s3567_s1  }
 0x7ce PF: > { %s4368_s6 = sld [smem:[#allocation29_spill]]  ;;  %s4369_s7 = sld [smem:[#allocation27_spill]] }
 0x7cf   : > { %s4370_s3 = sld [smem:[#allocation32_spill]] }
 0x7d4   : > { %p3146_p9 = scmp.ge.s32.totalorder %s4368_s6, 2  ;;  %s2029_s10 = sand.u32 1, %s4369_s7  }
 0x7d5   : > { %p4371_p5 = scmp.ne.s32.totalorder %s4370_s3, 0  ;;  %s2030_s11 = scalar_lea.sflag [#allocation4], %s2029_s10 }
 0x7d7   : > { %p3119_p0 = pnand %p3146_p9, %p4371_p5 }
 0x7d9   : > { %3530 = dma.done.wait (!%p3119_p0), %s2030_s11, 1024  }
 0x7da   : > { %3532 = vsyncadd (!%p3119_p0), %s2030_s11, 4294966272  ;;  %s4372_s5 = sadd.s32 4294967294, %s4368_s6  }
 0x7db   : > { %s2038_s26 = sand.u32 1, %s4372_s5  }
 0x7dc   : > { %s2039_s4 = scalar_lea.sflag [#allocation15], %s2038_s26 }
 0x7dd   : > { %3534 = dma.done.wait (!%p3119_p0), %s2039_s4, 2048  }
 0x7de   : > { %3536 = vsyncadd (!%p3119_p0), %s2039_s4, 4294965248  ;;  %s2057_s17 = scalar_lea.sflag [#allocation18], %s2038_s26 }
 0x7df   : > { %3538 = dma.done.wait (!%p3119_p0), %s2057_s17, 2048  }
 0x7e0   : > { %3540 = vsyncadd (!%p3119_p0), %s2057_s17, 4294965248  ;;  %s4373_s27 = sld [smem:[#allocation30_spill]]  ;;  %s4374_s1 = sld [smem:[#allocation28_spill]] }
 0x7e1   : > { %s4375_s26 = sld [smem:[#allocation31_spill]]  ;;  %s4376_s2 = smov %s3547_s25 }
 0x7e6   : > { %p42_p1 = scmp.ge.s32.totalorder %s4373_s27, 4   ;;  %s4377_s25 = smov %s4374_s1 }
 0x7e8   :  { %44 = sbr.rel (!%p42_p1) target bundleno = 29 (0x1d), region = 212 }
 0x7ef   :  { %2071 = vsyncpa [#allocation3], 1 }
 0x7f0   :  { %2073 = vsyncpa [#allocation3 + $0x1], 1 }
 0x7f1   :  { %2074 = vsyncpa [#allocation6], 1 }
 0x7f2   :  { %2075 = vsyncpa [#allocation9], 1 }
 0x7f3   :  { %2076 = vsyncpa [#allocation12], 1 }
 0x7f4   :  { %2077 = vsyncpa [#allocation4], 1 }
 0x7f5   :  { %2079 = vsyncpa [#allocation4 + $0x1], 1 }
 0x7f6   :  { %2080 = vsyncpa [#allocation15], 1 }
 0x7f7   :  { %2082 = vsyncpa [#allocation15 + $0x1], 1 }
 0x7f8   :  { %2083 = vsyncpa [#allocation18], 1 }
 0x7f9   :  { %2085 = vsyncpa [#allocation18 + $0x1], 1 }

// kernel: tpu_custom_call.1
= control target key start
LH: loop header
LB: loop body
LE: loop exit
PB: predicated region body
PF: predicated region fallthrough
CT: control target
= control target key end

     0   :  { %s4268_s0 = inlined_call_operand.vmem [shape: f32[128,16], index: 0, kind: input, shape index: {}]   ;;  %s4269_s1 = inlined_call_operand.vmem [shape: f32[16,128], index: 1, kind: input, shape index: {}]   ;;  %s4270_s2 = inlined_call_operand.vmem [shape: f32[1,128], index: 2, kind: input, shape index: {}]   ;;  %s4271_s3 = inlined_call_operand.vmem [shape: f32[128,128], index: 3, kind: input, shape index: {}]   ;;  %s4272_s4 = inlined_call_operand.vmem [shape: f32[1,128], index: 4, kind: input, shape index: {}]   ;;  %s4273_s5 = inlined_call_operand.hbm [shape: f32[128,128], index: 5, kind: input, shape index: {}]   ;;  %s4274_s6 = inlined_call_operand.vmem [shape: f32[1,128], index: 6, kind: input, shape index: {}]   ;;  %s4275_s7 = inlined_call_operand.hbm [shape: f32[128,128], index: 7, kind: input, shape index: {}]   ;;  %s4276_s8 = inlined_call_operand.vmem [shape: f32[1,128], index: 8, kind: input, shape index: {}]   ;;  %s4277_s9 = inlined_call_operand.hbm [shape: f32[128,128], index: 9, kind: input, shape index: {}]   ;;  %s4278_s10 = inlined_call_operand.vmem [shape: f32[1,128], index: 10, kind: input, shape index: {}]   ;;  %s4279_s11 = inlined_call_operand.hbm [shape: f32[128,128], index: 11, kind: input, shape index: {}]   ;;  %s4280_s12 = inlined_call_operand.vmem [shape: f32[1,128], index: 12, kind: input, shape index: {}]   ;;  %s4281_s13 = inlined_call_operand.hbm [shape: f32[128,128], index: 13, kind: input, shape index: {}]   ;;  %s4282_s14 = inlined_call_operand.vmem [shape: f32[1,128], index: 14, kind: input, shape index: {}]   ;;  %s4283_s15 = inlined_call_operand.hbm [shape: f32[128,128], index: 15, kind: input, shape index: {}]   ;;  %s4284_s16 = inlined_call_operand.vmem [shape: f32[1,128], index: 16, kind: input, shape index: {}]   ;;  %s4285_s17 = inlined_call_operand.hbm [shape: f32[128,128], index: 17, kind: output, shape index: {0}]   ;;  %s4286_s18 = inlined_call_operand.hbm [shape: f32[128,128], index: 18, kind: output, shape index: {1}]   ;;  %s4287_s19 = inlined_call_operand.hbm [shape: f32[128,128], index: 19, kind: output, shape index: {2}]   ;;  %s4288_s20 = inlined_call_operand.hbm [shape: f32[128,128], index: 20, kind: output, shape index: {3}]   ;;  %s4289_s21 = inlined_call_operand.hbm [shape: f32[128,128], index: 21, kind: output, shape index: {4}]  }
   0x1   :  { %4310 = sst [smem:[#allocation33_spill]] %s4268_s0 }
   0x2   :  { %4311 = sst [smem:[#allocation34_spill]] %s4269_s1 }
   0x3   :  { %4312 = sst [smem:[#allocation35_spill]] %s4270_s2 }
   0x4   :  { %4313 = sst [smem:[#allocation36_spill]] %s4271_s3 }
   0x5   :  { %4314 = sst [smem:[#allocation37_spill]] %s4272_s4 }
   0x6   :  { %4315 = sst [smem:[#allocation38_spill]] %s4273_s5 }
   0x7   :  { %4316 = sst [smem:[#allocation39_spill]] %s4274_s6 }
   0x8   :  { %4317 = sst [smem:[#allocation40_spill]] %s4275_s7 }
   0x9   :  { %4318 = sst [smem:[#allocation41_spill]] %s4276_s8 }
   0xa   :  { %4319 = sst [smem:[#allocation42_spill]] %s4277_s9 }
   0xb   :  { %4320 = sst [smem:[#allocation43_spill]] %s4278_s10 }
   0xc   :  { %4321 = sst [smem:[#allocation44_spill]] %s4279_s11 }
   0xd   :  { %4322 = sst [smem:[#allocation45_spill]] %s4284_s16 }
   0xe   :  { %4323 = sst [smem:[#allocation46_spill]] %s4285_s17 }
   0xf   :  { %4324 = sst [smem:[#allocation47_spill]] %s4287_s19 }
  0x10   :  { %4325 = sst [smem:[#allocation48_spill]] %s4288_s20 }
  0x11   :  { %4326 = sst [smem:[#allocation49_spill]] %s4289_s21 }
  0x12   :  { %27 = vsyncpa [#allocation3], 0 }
  0x13   :  { %28 = vsyncpa [#allocation6], 0 }
  0x14   :  { %29 = vsyncpa [#allocation9], 0 }
  0x15   :  { %30 = vsyncpa [#allocation12], 0 }
  0x16   :  { %31 = vsyncpa [#allocation4], 0 }
  0x17   :  { %33 = vsyncpa [#allocation4 + $0x1], 0 }
  0x18   :  { %34 = vsyncpa [#allocation15], 0 }
  0x19   :  { %36 = vsyncpa [#allocation15 + $0x1], 0 }
  0x1a   :  { %37 = vsyncpa [#allocation18], 0 }
  0x1b   :  { %39 = vsyncpa [#allocation18 + $0x1], 0  ;;  %s3682_s2 = smov 0   ;;  %s3684_s25 = smov 0  }
  0x1c   :  { %s3686_s26 = smov 0   ;;  %s3688_s27 = smov 0  }
  0x1d LB: > { %4327 = sst [smem:[#allocation27_spill]] %s3543_s2  ;;  %s3703_s3 = sadd.s32 4294967295, %s3555_s27   ;;  %s3555_s27 = sphi %s3688_s27, %s4373_s27   ;;  %s3551_s26 = sphi %s3686_s26, %s4375_s26   ;;  %s3547_s25 = sphi %s3684_s25, %s4377_s25   ;;  %s3543_s2 = sphi %s3682_s2, %s4376_s2  }
  0x1e   : > { %4328 = sst [smem:[#allocation28_spill]] %s3551_s26  ;;  %s4293_s28 = sadd.s32 4294967294, %s3555_s27  }
  0x1f   : > { %4329 = sst [smem:[#allocation29_spill]] %s3555_s27  ;;  %s3707_s29 = sadd.s32 1, %s3555_s27  }
  0x20   : > { %4330 = sst [smem:[#allocation30_spill]] %s3707_s29  ;;  %s414_s0 = sadd.s32 1, %s3551_s26 }
  0x21   : > { %s411_s4 = ssub.s32 %s3555_s27, %s3707_s29  ;;  %p424_p0 = scmp.ne.s32.totalorder %s3551_s26, %s3547_s25 }
  0x22   : > { %p412_p1 = scmp.eq.s32.totalorder %s411_s4, 0  ;;  %p425_p2 = scmp.eq.s32.totalorder %s3703_s3, 1 }
  0x23   : > { %p430_p3 = scmp.ne.s32.totalorder %s3547_s25, %s3543_s2  ;;  %p431_p4 = scmp.eq.s32.totalorder %s4293_s28, 1 }
  0x24   : > { %s3720_s30 = scalar_select %p412_p1, %s3551_s26, %s414_s0  }
  0x25   : > { %p3722_p5 = por %p425_p2, %p424_p0  ;;  %p3726_p6 = por %p431_p4, %p430_p3 }
  0x26   : > { %4331 = sst [smem:[#allocation31_spill]] %s3720_s30  ;;  %p2259_p7 = scmp.ge.s32.totalorder %s3555_s27, 1 }
  0x27   : > { %s4332_s5 = scalar_select %p3722_p5, 1, 0 }
  0x28   : > { %s4333_s22 = scalar_select %p3726_p6, 1, 0 }
  0x29   : > { %p542_p8 = scmp.lt.s32.totalorder %s3555_s27, 3  ;;  %p4302_p9 = scmp.eq.s32.totalorder %s3703_s3, 0 }
  0x2a   : > { %4334 = sst [smem:[#allocation32_spill]] %s4333_s22  ;;  %s3557_s1 = smov [#allocation5]  }
  0x2b   : > { %p3733_p10 = pnand %p2259_p7, %p542_p8  ;;  %s582_s24 = sshll.u32 %s3557_s1, 4  ;;  %s3739_s24 = int_to_ptr.vmem [resolvable:$true] %s582_s24 }
  0x2c   : > { %s3558_s4 = smov [#allocation8]   ;;  %s3559_s30 = smov [#allocation2]  }
  0x2d   : > { %s4335_s23 = scalar_select %p3733_p10, 1, 0 }
  0x2e   : > { %p3099_p11 = pneg %p3733_p10  ;;  %s614_s28 = sshll.u32 %s3558_s4, 4  ;;  %s3747_s28 = int_to_ptr.vmem [resolvable:$true] %s614_s28 }
  0x2f   : > { %s3749_s26 = sshll.u32 %s3559_s30, 4  ;;  %s4337_s7 = sld [smem:[#allocation40_spill]]  ;;  %s567_s26 = int_to_ptr.vmem [resolvable:$true] %s3749_s26 }
  0x30   : > { %p3743_p12 = pnand %p4302_p9, %p3099_p11 }
  0x32   : > { %p3759_p0 = pneg %p3743_p12 }
  0x35   : > { %s3189_s2 = scalar_lea.hbm %s4337_s7, 2048 }
  0x36   : > { %p3190_p13 = scmp.ne.s32.totalorder %s4337_s7, %s3189_s2  ;;  %p3196_p3 = scmp.lt.u32.totalorder %s3189_s2, %s4337_s7 }
  0x38   : > { %p3192_p1 = pnand %p3759_p0, %p3190_p13 }
  0x3a   : > { %p3193_p2 = pneg %p3192_p1 }
  0x3c   : > { %p3198_p4 = pnand %p3196_p3, %p3193_p2 }
  0x3e   : > { %3201 = shalt.err (!%p3198_p4)
}
  0x3f   : > { %s3202_s27 = scalar_lea.vmem %s3739_s24, 2048  ;;  %p3210_p9 = scmp.lt.s32.totalorder %s3739_s24, %s3739_s24 }
  0x40   : > { %p3203_p7 = scmp.ne.s32.totalorder %s3739_s24, %s3202_s27  ;;  %p3211_p6 = scmp.lt.s32.totalorder %s3202_s27, %s3202_s27 }
  0x42   : > { %p3205_p8 = pnand %p3203_p7, %p3759_p0  ;;  %p3212_p13 = por %p3211_p6, %p3210_p9 }
  0x44   : > { %p3206_p11 = pneg %p3205_p8 }
  0x46   : > { %p3213_p1 = pnand %p3212_p13, %p3206_p11 }
  0x48   : > { %3216 = shalt.err (!%p3213_p1)
}
  0x49   : > { %s3560_s29 = smov 128   ;;  %s3561_s2 = smov 8  }
  0x4a   : > { %3105 = dma.hbm_to_vmem [thread:$0]  (!%p3743_p12), %s4337_s7, 2048, %s3739_s24, [#allocation6], %s3560_s29, %s3560_s29, %s3561_s2  }
  0x4b   : > { %s4339_s11 = sld [smem:[#allocation44_spill]] }
  0x51   : > { %s3217_s27 = scalar_lea.hbm %s4339_s11, 2048 }
  0x52   : > { %p3218_p6 = scmp.ne.s32.totalorder %s4339_s11, %s3217_s27  ;;  %p3224_p3 = scmp.lt.u32.totalorder %s3217_s27, %s4339_s11 }
  0x54   : > { %p3220_p9 = pnand %p3218_p6, %p3759_p0 }
  0x56   : > { %p3221_p2 = pneg %p3220_p9 }
  0x58   : > { %p3226_p4 = pnand %p3224_p3, %p3221_p2 }
  0x5a   : > { %3229 = shalt.err (!%p3226_p4)
}
  0x5b   : > { %s3230_s24 = scalar_lea.vmem %s3747_s28, 2048  ;;  %p3238_p13 = scmp.lt.s32.totalorder %s3747_s28, %s3747_s28 }
  0x5c   : > { %p3231_p7 = scmp.ne.s32.totalorder %s3747_s28, %s3230_s24  ;;  %p3239_p1 = scmp.lt.s32.totalorder %s3230_s24, %s3230_s24 }
  0x5e   : > { %p3233_p8 = pnand %p3231_p7, %p3759_p0  ;;  %p3240_p6 = por %p3239_p1, %p3238_p13 }
  0x60   : > { %p3234_p11 = pneg %p3233_p8 }
  0x62   : > { %p3241_p9 = pnand %p3240_p6, %p3234_p11 }
  0x64   : > { %3244 = shalt.err (!%p3241_p9)
}
  0x65   : > { %3111 = dma.hbm_to_vmem [thread:$0]  (!%p3743_p12), %s4339_s11, 2048, %s3747_s28, [#allocation9], %s3560_s29, %s3560_s29, %s3561_s2  }
  0x66   : > { %s4340_s22 = sld [smem:[#allocation38_spill]] }
  0x6c   : > { %s3245_s1 = scalar_lea.hbm %s4340_s22, 2048 }
  0x6d   : > { %p3246_p2 = scmp.ne.s32.totalorder %s4340_s22, %s3245_s1  ;;  %p3252_p7 = scmp.lt.u32.totalorder %s3245_s1, %s4340_s22 }
  0x6f   : > { %p3248_p3 = pnand %p3246_p2, %p3759_p0 }
  0x71   : > { %p3249_p4 = pneg %p3248_p3 }
  0x73   : > { %p3254_p8 = pnand %p3252_p7, %p3249_p4 }
  0x75   : > { %3257 = shalt.err (!%p3254_p8)
}
  0x76   : > { %s3258_s16 = scalar_lea.vmem %s567_s26, 2048  ;;  %p3266_p6 = scmp.lt.s32.totalorder %s567_s26, %s567_s26 }
  0x77   : > { %p3259_p11 = scmp.ne.s32.totalorder %s567_s26, %s3258_s16  ;;  %p3267_p9 = scmp.lt.s32.totalorder %s3258_s16, %s3258_s16 }
  0x79   : > { %p3261_p13 = pnand %p3259_p11, %p3759_p0  ;;  %p3268_p5 = por %p3267_p9, %p3266_p6 }
  0x7b   : > { %p3262_p1 = pneg %p3261_p13 }
  0x7d   : > { %p3269_p10 = pnand %p3268_p5, %p3262_p1 }
  0x7f   : > { %3272 = shalt.err (!%p3269_p10)
}
  0x80   : > { %3102 = dma.hbm_to_vmem [thread:$0]  (!%p3743_p12), %s4340_s22, 2048, %s567_s26, [#allocation3], %s3560_s29, %s3560_s29, %s3561_s2  }
  0x81   : > { %s3562_s20 = smov [#allocation7]   ;;  %s3563_s1 = smov [#allocation10]  }
  0x82   : > { %s598_s21 = sshll.u32 %s3562_s20, 4  ;;  %s630_s4 = sshll.u32 %s3563_s1, 4  ;;  %s599_s21 = int_to_ptr.vmem [resolvable:$true] %s598_s21  ;;  %s631_s4 = int_to_ptr.vmem [resolvable:$true] %s630_s4 }
  0x83   : > { %s4341_s9 = sld [smem:[#allocation42_spill]] }
  0x89   : > { %s3273_s24 = scalar_lea.hbm %s4341_s9, 2048 }
  0x8a   : > { %p3274_p5 = scmp.ne.s32.totalorder %s4341_s9, %s3273_s24  ;;  %p3280_p3 = scmp.lt.u32.totalorder %s3273_s24, %s4341_s9 }
  0x8c   : > { %p3276_p10 = pnand %p3274_p5, %p3759_p0 }
  0x8e   : > { %p3277_p2 = pneg %p3276_p10 }
  0x90   : > { %p3282_p4 = pnand %p3280_p3, %p3277_p2 }
  0x92   : > { %3285 = shalt.err (!%p3282_p4)
}
  0x93   : > { %s3286_s26 = scalar_lea.vmem %s599_s21, 2048  ;;  %p3294_p13 = scmp.lt.s32.totalorder %s599_s21, %s599_s21 }
  0x94   : > { %p3287_p7 = scmp.ne.s32.totalorder %s599_s21, %s3286_s26  ;;  %p3295_p1 = scmp.lt.s32.totalorder %s3286_s26, %s3286_s26 }
  0x96   : > { %p3289_p8 = pnand %p3287_p7, %p3759_p0  ;;  %p3296_p6 = por %p3295_p1, %p3294_p13 }
  0x98   : > { %p3290_p11 = pneg %p3289_p8 }
  0x9a   : > { %p3297_p9 = pnand %p3296_p6, %p3290_p11 }
  0x9c   : > { %3300 = shalt.err (!%p3297_p9)
}
  0x9d   : > { %3108 = dma.hbm_to_vmem [thread:$0]  (!%p3743_p12), %s4341_s9, 2048, %s599_s21, [#allocation6], %s3560_s29, %s3560_s29, %s3561_s2  }
  0x9e   : > { %s3301_s1 = scalar_lea.hbm %s4281_s13, 2048 }
  0x9f   : > { %p3302_p5 = scmp.ne.s32.totalorder %s4281_s13, %s3301_s1  ;;  %p3308_p3 = scmp.lt.u32.totalorder %s3301_s1, %s4281_s13 }
  0xa1   : > { %p3304_p10 = pnand %p3302_p5, %p3759_p0 }
  0xa3   : > { %p3305_p2 = pneg %p3304_p10 }
  0xa5   : > { %p3310_p4 = pnand %p3308_p3, %p3305_p2 }
  0xa7   : > { %3313 = shalt.err (!%p3310_p4)
}
  0xa8   : > { %s3314_s28 = scalar_lea.vmem %s631_s4, 2048  ;;  %p3322_p13 = scmp.lt.s32.totalorder %s631_s4, %s631_s4 }
  0xa9   : > { %p3315_p7 = scmp.ne.s32.totalorder %s631_s4, %s3314_s28  ;;  %p3323_p1 = scmp.lt.s32.totalorder %s3314_s28, %s3314_s28 }
  0xab   : > { %p3317_p8 = pnand %p3315_p7, %p3759_p0  ;;  %p3324_p6 = por %p3323_p1, %p3322_p13 }
  0xad   : > { %p3318_p11 = pneg %p3317_p8 }
  0xaf   : > { %p3325_p9 = pnand %p3324_p6, %p3318_p11 }
  0xb1   : > { %3328 = shalt.err (!%p3325_p9)
}
  0xb2   : > { %3114 = dma.hbm_to_vmem [thread:$0]  (!%p3743_p12), %s4281_s13, 2048, %s631_s4, [#allocation9], %s3560_s29, %s3560_s29, %s3561_s2  }
  0xb3   : > { %s3564_s7 = smov [#allocation11]   ;;  %s3329_s1 = scalar_lea.hbm %s4283_s15, 2048 }
  0xb4   : > { %s646_s11 = sshll.u32 %s3564_s7, 4  ;;  %p3330_p5 = scmp.ne.s32.totalorder %s4283_s15, %s3329_s1  ;;  %s647_s11 = int_to_ptr.vmem [resolvable:$true] %s646_s11 }
  0xb5   : > { %p3336_p3 = scmp.lt.u32.totalorder %s3329_s1, %s4283_s15 }
  0xb6   : > { %p3332_p10 = pnand %p3330_p5, %p3759_p0 }
  0xb8   : > { %p3333_p2 = pneg %p3332_p10 }
  0xba   : > { %p3338_p4 = pnand %p3336_p3, %p3333_p2 }
  0xbc   : > { %3341 = shalt.err (!%p3338_p4)
}
  0xbd   : > { %s3342_s4 = scalar_lea.vmem %s647_s11, 2048  ;;  %p3350_p13 = scmp.lt.s32.totalorder %s647_s11, %s647_s11 }
  0xbe   : > { %p3343_p7 = scmp.ne.s32.totalorder %s647_s11, %s3342_s4  ;;  %p3351_p1 = scmp.lt.s32.totalorder %s3342_s4, %s3342_s4 }
  0xc0   : > { %p3345_p8 = pnand %p3343_p7, %p3759_p0  ;;  %p3352_p6 = por %p3351_p1, %p3350_p13 }
  0xc2   : > { %p3346_p11 = pneg %p3345_p8 }
  0xc4   : > { %p3353_p9 = pnand %p3352_p6, %p3346_p11 }
  0xc6   : > { %3356 = shalt.err (!%p3353_p9)
}
  0xc7   : > { %3117 = dma.hbm_to_vmem [thread:$0]  (!%p3743_p12), %s4283_s15, 2048, %s647_s11, [#allocation12], %s3560_s29, %s3560_s29, %s3561_s2  }
  0xc8   : > { %p4342_p5 = scmp.ne.s32.totalorder %s4335_s23, 0 }
  0xc9   : > { %p4343_p0 = scmp.eq.s32.totalorder (!%p4342_p5), %s3703_s3, 0 }
  0xca   : > { %674 = sbr.rel (%p4342_p5) target bundleno = 1998 (0x7ce), region = 88 }
  0xd1   : > { %3514 = dma.done.wait (%p4343_p0), [#allocation3], 2048   ;;  %p4344_p10 = pmov %p4343_p0 }
  0xd2   : > { %p4345_p2 = pmov %p4343_p0 }
  0xd3   : > { %3516 = vsyncadd (%p4344_p10), [#allocation3], 4294965248 }
  0xd4   : > { %3518 = dma.done.wait (%p4345_p2), [#allocation6], 4096   ;;  %p4346_p3 = pmov %p4343_p0 }
  0xd5   : > { %p4347_p4 = pmov %p4343_p0 }
  0xd6   : > { %3520 = vsyncadd (%p4346_p3), [#allocation6], 4294963200 }
  0xd7   : > { %3522 = dma.done.wait (%p4347_p4), [#allocation9], 4096   ;;  %p4348_p12 = pmov %p4343_p0 }
  0xd8   : > { %p4349_p7 = pmov %p4343_p0 }
  0xd9   : > { %3524 = vsyncadd (%p4348_p12), [#allocation9], 4294963200 }
  0xda   : > { %3526 = dma.done.wait (%p4349_p7), [#allocation12], 2048   ;;  %p4350_p8 = pmov %p4343_p0 }
  0xdb   : > { %s2279_s17 = sshll.u32 %s3703_s3, 3  ;;  %vm802_vm0 = vcmask 130048   ;;  %s4351_s2 = sld [smem:[#allocation33_spill]]  ;;  %v1092_v35 = vld [vmem:[#allocation2] sm:$0xff]  ;;  %v1093_v36 = vld [vmem:[#allocation2 + $0x8] sm:$0xff]  ;;  %v1094_v37 = vld [vmem:[#allocation2 + $0x10] sm:$0xff] }
  0xdc   : > { %3528 = vsyncadd (%p4350_p8), [#allocation12], 4294965248  ;;  %p775_p11 = scmp.lt.s32.totalorder %s2279_s17, 15  ;;  %s4352_s19 = sld [smem:[#allocation34_spill]]  ;;  %v2857_v38 = vpack.c.bf16 %v1093_v36, %v1092_v35  ;;  %v1095_v39 = vld [vmem:[#allocation2 + $0x18] sm:$0xff]  ;;  %v1096_v41 = vld [vmem:[#allocation2 + $0x20] sm:$0xff] }
  0xdd   : > { %s4353_s24 = sld [smem:[#allocation36_spill]]  ;;  %v2861_v40 = vpack.c.bf16 %v1095_v39, %v1094_v37  ;;  %v1097_v42 = vld [vmem:[#allocation2 + $0x28] sm:$0xff]  ;;  %v1098_v44 = vld [vmem:[#allocation2 + $0x30] sm:$0xff]  ;;  %v1099_v45 = vld [vmem:[#allocation2 + $0x38] sm:$0xff]  ;;  %s4308_s27 = sand.u32 1, %s3547_s25  }
  0xde   : > { %s4379_s17 = smov (!%p775_p11, %s2279_s17), 15  ;;  %v2865_v43 = vpack.c.bf16 %v1097_v42, %v1096_v41  ;;  %v2869_v46 = vpack.c.bf16 %v1099_v45, %v1098_v44  ;;  %v1100_v47 = vld [vmem:[#allocation2 + $0x40] sm:$0xff]  ;;  %v1101_v48 = vld [vmem:[#allocation2 + $0x48] sm:$0xff]  ;;  %v1102_v50 = vld [vmem:[#allocation2 + $0x50] sm:$0xff]  ;;  %s4354_s28 = sld [smem:[#allocation35_spill]] }
  0xdf   : > { %s2280_s23 = sshll.u32 %s4379_s17, 3  ;;  %v2873_v49 = vpack.c.bf16 %v1101_v48, %v1100_v47  ;;  %v1103_v51 = vld [vmem:[#allocation2 + $0x58] sm:$0xff]  ;;  %v1104_v53 = vld [vmem:[#allocation2 + $0x60] sm:$0xff]  ;;  %v1105_v54 = vld [vmem:[#allocation2 + $0x68] sm:$0xff]  ;;  %s3994_s21 = sshll.u32 %s4308_s27, 6 }
  0xe0   : > { %v2877_v52 = vpack.c.bf16 %v1103_v51, %v1102_v50  ;;  %v2881_v55 = vpack.c.bf16 %v1105_v54, %v1104_v53  ;;  %s3997_s17 = scalar_lea.vmem [#allocation14], %s3994_s21  ;;  %v1246_v35 = vld [vmem:[#allocation5 + $0x50] sm:$0xff]  ;;  %v1247_v36 = vld [vmem:[#allocation5 + $0x58] sm:$0xff]  ;;  %v1249_v39 = vld [vmem:[#allocation5 + $0x68] sm:$0xff]  ;;  %s4355_s29 = sld [smem:[#allocation37_spill]] }
  0xe1   : > { %s3916_s26 = scalar_lea.vmem %s4351_s2, %s2280_s23  ;;  %v2909_v37 = vpack.c.bf16 %v1247_v36, %v1246_v35  ;;  %s4011_s2 = scalar_lea.vmem [#allocation16], %s3994_s21 }
  0xe2   : > { %v793_v0 = vld [vmem:[%s4352_s19] sm:$0xff]  ;;  %v794_v1 = vld [vmem:[%s4352_s19 + $0x8] sm:$0xff]  ;;  %v787_v10 = vld [vmem:[%s3916_s26 + $0x10] sm:$0xff]  ;;  %s4356_s6 = sld [smem:[#allocation39_spill]]  ;;  %s4025_s11 = scalar_lea.vmem [#allocation17], %s3994_s21 }
  0xe3   : > { %v785_v2 = vld [vmem:[%s3916_s26] sm:$0xff]  ;;  %v2821_v3 = vpack.c.bf16 %v794_v1, %v793_v0  ;;  %v949_v5 = vld [vmem:[%s4353_s24 + $0x8] sm:$0xff]  ;;  %v950_v8 = vld [vmem:[%s4353_s24 + $0x10] sm:$0xff]  ;;  %s4357_s8 = sld [smem:[#allocation41_spill]]  ;;  %s4039_s30 = scalar_lea.vmem [#allocation19], %s3994_s21 }
  0xe4   : > { %2501 = vmatprep.mubr.msk.f32.mxu0 %vm802_vm0, %v785_v2  ;;  %v948_v4 = vld [vmem:[%s4353_s24] sm:$0xff]  ;;  %v786_v6 = vld [vmem:[%s3916_s26 + $0x8] sm:$0xff]  ;;  %v951_v9 = vld [vmem:[%s4353_s24 + $0x18] sm:$0xff]  ;;  %s4358_s10 = sld [smem:[#allocation43_spill]]  ;;  %s1982_s7 = sshll.u32 %s4011_s2, 4  ;;  %s4063_s7 = int_to_ptr.vmem [resolvable:$true] %s1982_s7 }
  0xe5   : > { %2822 = vmatprep.subr.bf16.mxu0 %v2821_v3  ;;  %v2825_v7 = vpack.c.bf16 %v949_v5, %v948_v4  ;;  %v2829_v11 = vpack.c.bf16 %v951_v9, %v950_v8  ;;  %v952_v12 = vld [vmem:[%s4353_s24 + $0x20] sm:$0xff]  ;;  %v953_v13 = vld [vmem:[%s4353_s24 + $0x28] sm:$0xff]  ;;  %v788_v14 = vld [vmem:[%s3916_s26 + $0x18] sm:$0xff]  ;;  %s1998_s20 = sshll.u32 %s4025_s11, 4  ;;  %s4309_s16 = sand.u32 1, %s3703_s3   ;;  %s4065_s20 = int_to_ptr.vmem [resolvable:$true] %s1998_s20 }
  0xe6   : > { %2824 = vmatpush3.bf16.msra.mxu0 %v2821_v3  ;;  %v2833_v15 = vpack.c.bf16 %v953_v13, %v952_v12  ;;  %v789_v16 = vld [vmem:[%s3916_s26 + $0x20] sm:$0xff]  ;;  %v954_v17 = vld [vmem:[%s4353_s24 + $0x30] sm:$0xff]  ;;  %v955_v18 = vld [vmem:[%s4353_s24 + $0x38] sm:$0xff]  ;;  %s4070_s4 = sshll.u32 %s3703_s3, 10  ;;  %p4359_p1 = scmp.ne.s32.totalorder %s4332_s5, 0 }
  0xe7   : > { %2826 = vmatprep.subr.bf16.mxu1 %v2825_v7  ;;  %v790_v19 = vld [vmem:[%s3916_s26 + $0x28] sm:$0xff]  ;;  %v2837_v20 = vpack.c.bf16 %v955_v18, %v954_v17  ;;  %v791_v21 = vld [vmem:[%s3916_s26 + $0x30] sm:$0xff]  ;;  %v956_v22 = vld [vmem:[%s4353_s24 + $0x40] sm:$0xff]  ;;  %2858 = vmatprep.subr.bf16.mxu0 %v2857_v38  ;;  %s3565_s0 = smov [#allocation14]  }
  0xe8   : > { %2828 = vmatpush3.bf16.msra.mxu1 %v2825_v7  ;;  %v957_v23 = vld [vmem:[%s4353_s24 + $0x48] sm:$0xff]  ;;  %v792_v24 = vld [vmem:[%s3916_s26 + $0x38] sm:$0xff]  ;;  %v958_v26 = vld [vmem:[%s4353_s24 + $0x50] sm:$0xff]  ;;  %s1966_s26 = sshll.u32 %s3997_s17, 4  ;;  %s4061_s26 = int_to_ptr.vmem [resolvable:$true] %s1966_s26 }
  0xe9   : > { %2502 = vmatmul.mubr.msk.f32.vlgmr.msra.gmra.mrb[0].mxu0 %vm802_vm0, %v786_v6  ;;  %2830 = vmatprep.subr.bf16.mxu1 %v2829_v11  ;;  %v2841_v25 = vpack.c.bf16 %v957_v23, %v956_v22  ;;  %v959_v27 = vld [vmem:[%s4353_s24 + $0x58] sm:$0xff]  ;;  %v960_v29 = vld [vmem:[%s4353_s24 + $0x60] sm:$0xff]  ;;  %v961_v30 = vld [vmem:[%s4353_s24 + $0x68] sm:$0xff] }
  0xea   : > { %2504 = vmatprep.mubr.msk.f32.mxu0 %vm802_vm0, %v787_v10  ;;  %v2845_v28 = vpack.c.bf16 %v959_v27, %v958_v26  ;;  %v2849_v31 = vpack.c.bf16 %v961_v30, %v960_v29  ;;  %v962_v32 = vld [vmem:[%s4353_s24 + $0x70] sm:$0xff]  ;;  %v963_v33 = vld [vmem:[%s4353_s24 + $0x78] sm:$0xff]  ;;  %2860 = vmatpush3.bf16.msra.mxu0 %v2857_v38  ;;  %v2281_v56 = vld [vmem:[%s4354_s28] ss:$0 sm:$0xff] }
  0xeb   : > { %v2853_v34 = vpack.c.bf16 %v963_v33, %v962_v32  ;;  %2862 = vmatprep.subr.bf16.mxu0 %v2861_v40  ;;  %v1106_v17 = vld [vmem:[#allocation2 + $0x70] sm:$0xff]  ;;  %v1107_v18 = vld [vmem:[#allocation2 + $0x78] sm:$0xff]  ;;  %v1240_v26 = vld [vmem:[#allocation5 + $0x20] sm:$0xff] }
  0xec   : > { %2832 = vmatpush3.bf16.msra.mxu1 %v2829_v11  ;;  %v1238_v22 = vld [vmem:[#allocation5 + $0x10] sm:$0xff]  ;;  %v1241_v27 = vld [vmem:[#allocation5 + $0x28] sm:$0xff]  ;;  %v1243_v30 = vld [vmem:[#allocation5 + $0x38] sm:$0xff] }
  0xed   : > { %2505 = vmatmul.mubr.msk.f32.gmra.mrb[2].mxu0 %vm802_vm0, %v788_v14  ;;  %2834 = vmatprep.subr.bf16.mxu1 %v2833_v15  ;;  %v1242_v29 = vld [vmem:[#allocation5 + $0x30] sm:$0xff]  ;;  %v1244_v32 = vld [vmem:[#allocation5 + $0x40] sm:$0xff]  ;;  %v1245_v33 = vld [vmem:[#allocation5 + $0x48] sm:$0xff] }
  0xee   : > { %2507 = vmatprep.mubr.msk.f32.mxu0 %vm802_vm0, %v789_v16  ;;  %2864 = vmatpush3.bf16.msra.mxu0 %v2861_v40  ;;  %v1248_v38 = vld [vmem:[#allocation5 + $0x60] sm:$0xff] }
  0xef   : > { %2866 = vmatprep.subr.bf16.mxu0 %v2865_v43  ;;  %v2913_v40 = vpack.c.bf16 %v1249_v39, %v1248_v38  ;;  %v2290_v41 = vld [vmem:[%s4355_s29] ss:$0 sm:$0xff]  ;;  %s3361_s29 = sshll.u32 %s3565_s0, 4  ;;  %s3362_s29 = int_to_ptr.vmem [resolvable:$false] %s3361_s29 }
  0xf0   : > { %2836 = vmatpush3.bf16.msra.mxu1 %v2833_v15  ;;  %s3363_s27 = scalar_lea.vmem %s3362_s29, 2048  ;;  %p3364_p5 = scmp.lt.s32.totalorder %s4061_s26, %s3362_s29 }
  0xf1   : > { %2508 = vmatmul.mubr.msk.f32.gmra.mrb[4].mxu0 %vm802_vm0, %v790_v19  ;;  %2838 = vmatprep.subr.bf16.mxu1 %v2837_v20  ;;  %v2885_v19 = vpack.c.bf16 %v1107_v18, %v1106_v17  ;;  %v1380_v17 = vld [vmem:[#allocation7 + $0x40] sm:$0xff]  ;;  %v1381_v18 = vld [vmem:[#allocation7 + $0x48] sm:$0xff] }
  0xf2   : > { %2510 = vmatprep.mubr.msk.f32.mxu0 %vm802_vm0, %v791_v21  ;;  %2868 = vmatpush3.bf16.msra.mxu0 %v2865_v43  ;;  %v1237_v21 = vld [vmem:[#allocation5 + $0x8] sm:$0xff] }
  0xf3   : > { %2870 = vmatprep.subr.bf16.mxu0 %v2869_v46 }
  0xf4   : > { %2840 = vmatpush3.bf16.msra.mxu1 %v2837_v20  ;;  %v1236_v20 = vld [vmem:[#allocation5] sm:$0xff] }
  0xf5   : > { %2511 = vmatmul.mubr.msk.f32.gmra.mrb[6].mxu0 %vm802_vm0, %v792_v24  ;;  %2842 = vmatprep.subr.bf16.mxu1 %v2841_v25  ;;  %v2889_v23 = vpack.c.bf16 %v1237_v21, %v1236_v20  ;;  %v1239_v24 = vld [vmem:[#allocation5 + $0x18] sm:$0xff]  ;;  %v1382_v20 = vld [vmem:[#allocation7 + $0x50] sm:$0xff] }
  0xf6   : > { %2872 = vmatpush3.bf16.msra.mxu0 %v2869_v46  ;;  %v1383_v21 = vld [vmem:[#allocation7 + $0x58] sm:$0xff] }
  0xf7   : > { %2874 = vmatprep.subr.bf16.mxu0 %v2873_v49 }
  0xf8   : > { %2844 = vmatpush3.bf16.msra.mxu1 %v2841_v25  ;;  %v2893_v25 = vpack.c.bf16 %v1239_v24, %v1238_v22  ;;  %v2941_v22 = vpack.c.bf16 %v1383_v21, %v1382_v20  ;;  %v1385_v24 = vld [vmem:[#allocation7 + $0x68] sm:$0xff] }
  0xf9   : > { %2846 = vmatprep.subr.bf16.mxu1 %v2845_v28 }
  0xfa   : > { %2876 = vmatpush3.bf16.msra.mxu0 %v2873_v49 }
  0xfb   : > { %2878 = vmatprep.subr.bf16.mxu0 %v2877_v52 }
  0xfc   : > { %2848 = vmatpush3.bf16.msra.mxu1 %v2845_v28  ;;  %v2897_v28 = vpack.c.bf16 %v1241_v27, %v1240_v26  ;;  %v2291_v26 = vld [vmem:[%s4356_s6] ss:$0 sm:$0xff] }
  0xfd   : > { %2850 = vmatprep.subr.bf16.mxu1 %v2849_v31 }
  0xfe   : > { %2880 = vmatpush3.bf16.msra.mxu0 %v2877_v52 }
  0xff   : > { %2882 = vmatprep.subr.bf16.mxu0 %v2881_v55 }
 0x100   : > { %2852 = vmatpush3.bf16.msra.mxu1 %v2849_v31  ;;  %v2901_v31 = vpack.c.bf16 %v1243_v30, %v1242_v29 }
 0x101   : > { %2854 = vmatprep.subr.bf16.mxu1 %v2853_v34 }
 0x102   : > { %2884 = vmatpush3.bf16.msra.mxu0 %v2881_v55 }
 0x103   : > { %2886 = vmatprep.subr.bf16.mxu0 %v2885_v19 }
 0x104   : > { %2856 = vmatpush3.bf16.msra.mxu1 %v2853_v34  ;;  %v2905_v34 = vpack.c.bf16 %v1245_v33, %v1244_v32 }
 0x105   : > { %2890 = vmatprep.subr.bf16.mxu1 %v2889_v23 }
 0x106   : > { %2888 = vmatpush3.bf16.msra.mxu0 %v2885_v19  ;;  %v2937_v19 = vpack.c.bf16 %v1381_v18, %v1380_v17 }
 0x1bc   : > { %v2503_v57 = vpop.f32.mrb[0].mxu0 }
 0x1bd   : > { %v899_v58 = vadd.f32 %v2503_v57, %v2281_v56  ;;  %v893_v59 = vpop.f32.mrb[1].mxu0 }
 0x1be   : > { %v894_v60 = vadd.f32 %v2281_v56, %v893_v59 }
 0x1bf   : > { %v933_v61 = vmax.f32 %v899_v58, 0.0 }
 0x1c0   : > { %v932_v62 = vmax.f32 %v894_v60, 0.0  ;;  %v2506_v63 = vpop.f32.mrb[2].mxu0 }
 0x1c1   : > { %941 = vst [vmem:[%s3997_s17 + $0x8] sm:$0xff] %v933_v61  ;;  %v909_v0 = vadd.f32 %v2506_v63, %v2281_v56  ;;  %v903_v1 = vpop.f32.mrb[3].mxu0 }
 0x1c2   : > { %940 = vst [vmem:[%s3997_s17] sm:$0xff] %v932_v62  ;;  %v904_v2 = vadd.f32 %v2281_v56, %v903_v1  ;;  %2545 = vmatprep.mubr.f32.mxu1 %v932_v62 }
 0x1c3   : > { %v935_v3 = vmax.f32 %v909_v0, 0.0  ;;  %2546 = vmatmul.mubr.f32.vlgmr.msra.gmra.mrb[0].mxu1 %v933_v61 }
 0x1c4   : > { %v934_v4 = vmax.f32 %v904_v2, 0.0  ;;  %v2509_v5 = vpop.f32.mrb[4].mxu0  ;;  %2892 = vmatpush3.bf16.msra.mxu1 %v2889_v23  ;;  %v1250_v2 = vld [vmem:[#allocation5 + $0x70] sm:$0xff]  ;;  %v1384_v23 = vld [vmem:[#allocation7 + $0x60] sm:$0xff] }
 0x1c5   : > { %943 = vst [vmem:[%s3997_s17 + $0x18] sm:$0xff] %v935_v3  ;;  %v919_v6 = vadd.f32 %v2509_v5, %v2281_v56  ;;  %v913_v7 = vpop.f32.mrb[5].mxu0  ;;  %2894 = vmatprep.subr.bf16.mxu1 %v2893_v25  ;;  %v1372_v5 = vld [vmem:[#allocation7] sm:$0xff] }
 0x1c6   : > { %942 = vst [vmem:[%s3997_s17 + $0x10] sm:$0xff] %v934_v4  ;;  %v914_v8 = vadd.f32 %v2281_v56, %v913_v7  ;;  %2548 = vmatprep.mubr.f32.mxu1 %v934_v4  ;;  %v1374_v7 = vld [vmem:[#allocation7 + $0x10] sm:$0xff] }
 0x1c7   : > { %v937_v9 = vmax.f32 %v919_v6, 0.0  ;;  %2549 = vmatmul.mubr.f32.gmra.mrb[2].mxu1 %v935_v3  ;;  %v1251_v3 = vld [vmem:[#allocation5 + $0x78] sm:$0xff]  ;;  %v1373_v6 = vld [vmem:[#allocation7 + $0x8] sm:$0xff] }
 0x1c8   : > { %v936_v10 = vmax.f32 %v914_v8, 0.0  ;;  %v2512_v11 = vpop.f32.mrb[6].mxu0  ;;  %2896 = vmatpush3.bf16.msra.mxu1 %v2893_v25  ;;  %v2917_v4 = vpack.c.bf16 %v1251_v3, %v1250_v2  ;;  %v2921_v8 = vpack.c.bf16 %v1373_v6, %v1372_v5  ;;  %v2945_v25 = vpack.c.bf16 %v1385_v24, %v1384_v23  ;;  %v1516_v2 = vld [vmem:[#allocation8 + $0x40] sm:$0xff]  ;;  %v1517_v3 = vld [vmem:[#allocation8 + $0x48] sm:$0xff]  ;;  %v1518_v5 = vld [vmem:[#allocation8 + $0x50] sm:$0xff] }
 0x1c9   : > { %945 = vst [vmem:[%s3997_s17 + $0x28] sm:$0xff] %v937_v9  ;;  %v929_v12 = vadd.f32 %v2512_v11, %v2281_v56  ;;  %v923_v13 = vpop.f32.mrb[7].mxu0  ;;  %2898 = vmatprep.subr.bf16.mxu1 %v2897_v28  ;;  %v1376_v11 = vld [vmem:[#allocation7 + $0x20] sm:$0xff]  ;;  %v1519_v6 = vld [vmem:[#allocation8 + $0x58] sm:$0xff] }
 0x1ca   : > { %944 = vst [vmem:[%s3997_s17 + $0x20] sm:$0xff] %v936_v10  ;;  %v924_v14 = vadd.f32 %v2281_v56, %v923_v13  ;;  %2551 = vmatprep.mubr.f32.mxu1 %v936_v10  ;;  %2922 = vmatprep.subr.bf16.mxu0 %v2921_v8 }
 0x1cb   : > { %v939_v15 = vmax.f32 %v929_v12, 0.0  ;;  %2552 = vmatmul.mubr.f32.gmra.mrb[4].mxu1 %v937_v9  ;;  %v1375_v9 = vld [vmem:[#allocation7 + $0x18] sm:$0xff]  ;;  %v1377_v12 = vld [vmem:[#allocation7 + $0x28] sm:$0xff] }
 0x1cc   : > { %v938_v16 = vmax.f32 %v924_v14, 0.0  ;;  %2900 = vmatpush3.bf16.msra.mxu1 %v2897_v28  ;;  %v2925_v10 = vpack.c.bf16 %v1375_v9, %v1374_v7  ;;  %v2929_v13 = vpack.c.bf16 %v1377_v12, %v1376_v11  ;;  %v1378_v14 = vld [vmem:[#allocation7 + $0x30] sm:$0xff]  ;;  %v2973_v7 = vpack.c.bf16 %v1519_v6, %v1518_v5  ;;  %v1521_v9 = vld [vmem:[#allocation8 + $0x68] sm:$0xff]  ;;  %v2292_v11 = vld [vmem:[%s4357_s8] ss:$0 sm:$0xff] }
 0x1cd   : > { %947 = vst [vmem:[%s3997_s17 + $0x38] sm:$0xff] %v939_v15  ;;  %2902 = vmatprep.subr.bf16.mxu1 %v2901_v31 }
 0x1ce   : > { %946 = vst [vmem:[%s3997_s17 + $0x30] sm:$0xff] %v938_v16  ;;  %2554 = vmatprep.mubr.f32.mxu1 %v938_v16  ;;  %s4076_s17 = scalar_lea.hbm %s4286_s18, %s4070_s4 }
 0x1cf   : > { %2555 = vmatmul.mubr.f32.gmra.mrb[6].mxu1 %v939_v15  ;;  %v1379_v15 = vld [vmem:[#allocation7 + $0x38] sm:$0xff] }
 0x1d0   : > { %2904 = vmatpush3.bf16.msra.mxu1 %v2901_v31  ;;  %v2933_v16 = vpack.c.bf16 %v1379_v15, %v1378_v14 }
 0x1d1   : > { %2906 = vmatprep.subr.bf16.mxu1 %v2905_v34 }
 0x1d4   : > { %2908 = vmatpush3.bf16.msra.mxu1 %v2905_v34 }
 0x1d5   : > { %2910 = vmatprep.subr.bf16.mxu1 %v2909_v37 }
 0x1d8   : > { %2912 = vmatpush3.bf16.msra.mxu1 %v2909_v37 }
 0x1d9   : > { %2914 = vmatprep.subr.bf16.mxu1 %v2913_v40 }
 0x1dc   : > { %2916 = vmatpush3.bf16.msra.mxu1 %v2913_v40 }
 0x1dd   : > { %2918 = vmatprep.subr.bf16.mxu1 %v2917_v4 }
 0x1e0   : > { %2920 = vmatpush3.bf16.msra.mxu1 %v2917_v4  ;;  %v2969_v4 = vpack.c.bf16 %v1517_v3, %v1516_v2 }
 0x296   : > { %v2547_v42 = vpop.f32.mrb[0].mxu1 }
 0x297   : > { %v1043_v43 = vadd.f32 %v2547_v42, %v2290_v41  ;;  %v1037_v44 = vpop.f32.mrb[1].mxu1 }
 0x298   : > { %v1038_v45 = vadd.f32 %v2290_v41, %v1037_v44 }
 0x299   : > { %v1077_v46 = vmax.f32 %v1043_v43, 0.0 }
 0x29a   : > { %v1076_v47 = vmax.f32 %v1038_v45, 0.0  ;;  %v2550_v48 = vpop.f32.mrb[2].mxu1 }
 0x29b   : > { %1085 = vst [vmem:[%s4011_s2 + $0x8] sm:$0xff] %v1077_v46  ;;  %v1053_v49 = vadd.f32 %v2550_v48, %v2290_v41  ;;  %v1047_v50 = vpop.f32.mrb[3].mxu1 }
 0x29c   : > { %1084 = vst [vmem:[%s4011_s2] sm:$0xff] %v1076_v47  ;;  %v1048_v51 = vadd.f32 %v2290_v41, %v1047_v50  ;;  %2589 = vmatprep.mubr.f32.mxu0 %v1076_v47 }
 0x29d   : > { %v1079_v52 = vmax.f32 %v1053_v49, 0.0  ;;  %2590 = vmatmul.mubr.f32.vlgmr.msra.gmra.mrb[8].mxu0 %v1077_v46 }
 0x29e   : > { %v1078_v53 = vmax.f32 %v1048_v51, 0.0  ;;  %v2553_v54 = vpop.f32.mrb[4].mxu1  ;;  %2924 = vmatpush3.bf16.msra.mxu0 %v2921_v8  ;;  %v1386_v51 = vld [vmem:[#allocation7 + $0x70] sm:$0xff]  ;;  %v1520_v8 = vld [vmem:[#allocation8 + $0x60] sm:$0xff] }
 0x29f   : > { %1087 = vst [vmem:[%s4011_s2 + $0x18] sm:$0xff] %v1079_v52  ;;  %v1063_v55 = vadd.f32 %v2553_v54, %v2290_v41  ;;  %v1057_v56 = vpop.f32.mrb[5].mxu1  ;;  %2926 = vmatprep.subr.bf16.mxu0 %v2925_v10  ;;  %v1508_v54 = vld [vmem:[#allocation8] sm:$0xff] }
 0x2a0   : > { %1086 = vst [vmem:[%s4011_s2 + $0x10] sm:$0xff] %v1078_v53  ;;  %v1058_v57 = vadd.f32 %v2290_v41, %v1057_v56  ;;  %2592 = vmatprep.mubr.f32.mxu0 %v1078_v53  ;;  %v1510_v56 = vld [vmem:[#allocation8 + $0x10] sm:$0xff] }
 0x2a1   : > { %v1081_v58 = vmax.f32 %v1063_v55, 0.0  ;;  %2593 = vmatmul.mubr.f32.gmra.mrb[10].mxu0 %v1079_v52  ;;  %v1387_v52 = vld [vmem:[#allocation7 + $0x78] sm:$0xff]  ;;  %v1509_v55 = vld [vmem:[#allocation8 + $0x8] sm:$0xff] }
 0x2a2   : > { %v1080_v59 = vmax.f32 %v1058_v57, 0.0  ;;  %v2556_v60 = vpop.f32.mrb[6].mxu1  ;;  %2928 = vmatpush3.bf16.msra.mxu0 %v2925_v10  ;;  %v2949_v53 = vpack.c.bf16 %v1387_v52, %v1386_v51  ;;  %v2953_v57 = vpack.c.bf16 %v1509_v55, %v1508_v54  ;;  %v2977_v10 = vpack.c.bf16 %v1521_v9, %v1520_v8  ;;  %v2293_v52 = vld [vmem:[%s4358_s10] ss:$0 sm:$0xff] }
 0x2a3   : > { %1089 = vst [vmem:[%s4011_s2 + $0x28] sm:$0xff] %v1081_v58  ;;  %v1073_v61 = vadd.f32 %v2556_v60, %v2290_v41  ;;  %v1067_v62 = vpop.f32.mrb[7].mxu1  ;;  %2930 = vmatprep.subr.bf16.mxu0 %v2929_v13  ;;  %v1512_v60 = vld [vmem:[#allocation8 + $0x20] sm:$0xff] }
 0x2a4   : > { %1088 = vst [vmem:[%s4011_s2 + $0x20] sm:$0xff] %v1080_v59  ;;  %v1068_v63 = vadd.f32 %v2290_v41, %v1067_v62  ;;  %2595 = vmatprep.mubr.f32.mxu0 %v1080_v59  ;;  %2954 = vmatprep.subr.bf16.mxu1 %v2953_v57 }
 0x2a5   : > { %v1083_v0 = vmax.f32 %v1073_v61, 0.0  ;;  %2596 = vmatmul.mubr.f32.gmra.mrb[12].mxu0 %v1081_v58  ;;  %v1511_v58 = vld [vmem:[#allocation8 + $0x18] sm:$0xff]  ;;  %v1513_v61 = vld [vmem:[#allocation8 + $0x28] sm:$0xff] }
 0x2a6   : > { %v1082_v1 = vmax.f32 %v1068_v63, 0.0  ;;  %2932 = vmatpush3.bf16.msra.mxu0 %v2929_v13  ;;  %v2957_v59 = vpack.c.bf16 %v1511_v58, %v1510_v56  ;;  %v2961_v62 = vpack.c.bf16 %v1513_v61, %v1512_v60  ;;  %v1514_v63 = vld [vmem:[#allocation8 + $0x30] sm:$0xff] }
 0x2a7   : > { %1091 = vst [vmem:[%s4011_s2 + $0x38] sm:$0xff] %v1083_v0  ;;  %2934 = vmatprep.subr.bf16.mxu0 %v2933_v16 }
 0x2a8   : > { %1090 = vst [vmem:[%s4011_s2 + $0x30] sm:$0xff] %v1082_v1  ;;  %2598 = vmatprep.mubr.f32.mxu0 %v1082_v1  ;;  %s4080_s2 = scalar_lea.sflag [#allocation15], %s4309_s16 }
 0x2a9   : > { %2599 = vmatmul.mubr.f32.gmra.mrb[14].mxu0 %v1083_v0  ;;  %v1515_v0 = vld [vmem:[#allocation8 + $0x38] sm:$0xff] }
 0x2aa   : > { %2936 = vmatpush3.bf16.msra.mxu0 %v2933_v16  ;;  %v2965_v1 = vpack.c.bf16 %v1515_v0, %v1514_v63 }
 0x2ab   : > { %2938 = vmatprep.subr.bf16.mxu0 %v2937_v19 }
 0x2ae   : > { %2940 = vmatpush3.bf16.msra.mxu0 %v2937_v19 }
 0x2af   : > { %2942 = vmatprep.subr.bf16.mxu0 %v2941_v22 }
 0x2b2   : > { %2944 = vmatpush3.bf16.msra.mxu0 %v2941_v22 }
 0x2b3   : > { %2946 = vmatprep.subr.bf16.mxu0 %v2945_v25 }
 0x2b6   : > { %2948 = vmatpush3.bf16.msra.mxu0 %v2945_v25 }
 0x2b7   : > { %2950 = vmatprep.subr.bf16.mxu0 %v2949_v53 }
 0x2ba   : > { %2952 = vmatpush3.bf16.msra.mxu0 %v2949_v53 }
 0x370   : > { %v2591_v27 = vpop.f32.mrb[8].mxu0 }
 0x371   : > { %v1187_v28 = vadd.f32 %v2591_v27, %v2291_v26  ;;  %v1181_v29 = vpop.f32.mrb[9].mxu0 }
 0x372   : > { %v1182_v30 = vadd.f32 %v2291_v26, %v1181_v29  ;;  %v1523_v29 = vld [vmem:[#allocation8 + $0x78] sm:$0xff] }
 0x373   : > { %v1221_v31 = vmax.f32 %v1187_v28, 0.0  ;;  %v1522_v28 = vld [vmem:[#allocation8 + $0x70] sm:$0xff] }
 0x374   : > { %v1220_v32 = vmax.f32 %v1182_v30, 0.0  ;;  %v2594_v33 = vpop.f32.mrb[10].mxu0  ;;  %v2981_v30 = vpack.c.bf16 %v1523_v29, %v1522_v28  ;;  %v1788_v28 = vld [vmem:[#allocation11 + $0x40] sm:$0xff]  ;;  %v1789_v29 = vld [vmem:[#allocation11 + $0x48] sm:$0xff] }
 0x375   : > { %1229 = vst [vmem:[%s4025_s11 + $0x8] sm:$0xff] %v1221_v31  ;;  %v1197_v34 = vadd.f32 %v2594_v33, %v2291_v26  ;;  %v1191_v35 = vpop.f32.mrb[11].mxu0  ;;  %v1646_v33 = vld [vmem:[#allocation10 + $0x10] sm:$0xff] }
 0x376   : > { %1228 = vst [vmem:[%s4025_s11] sm:$0xff] %v1220_v32  ;;  %v1192_v36 = vadd.f32 %v2291_v26, %v1191_v35  ;;  %2633 = vmatprep.mubr.f32.mxu1 %v1220_v32  ;;  %v1645_v32 = vld [vmem:[#allocation10 + $0x8] sm:$0xff]  ;;  %v1647_v35 = vld [vmem:[#allocation10 + $0x18] sm:$0xff] }
 0x377   : > { %v1223_v37 = vmax.f32 %v1197_v34, 0.0  ;;  %2634 = vmatmul.mubr.f32.vlgmr.msra.gmra.mrb[8].mxu1 %v1221_v31  ;;  %v1644_v31 = vld [vmem:[#allocation10] sm:$0xff] }
 0x378   : > { %v1222_v38 = vmax.f32 %v1192_v36, 0.0  ;;  %v2597_v39 = vpop.f32.mrb[12].mxu0  ;;  %2956 = vmatpush3.bf16.msra.mxu1 %v2953_v57  ;;  %v2985_v34 = vpack.c.bf16 %v1645_v32, %v1644_v31  ;;  %v2989_v36 = vpack.c.bf16 %v1647_v35, %v1646_v33  ;;  %v1790_v31 = vld [vmem:[#allocation11 + $0x50] sm:$0xff]  ;;  %v1791_v32 = vld [vmem:[#allocation11 + $0x58] sm:$0xff]  ;;  %v1793_v35 = vld [vmem:[#allocation11 + $0x68] sm:$0xff] }
 0x379   : > { %1231 = vst [vmem:[%s4025_s11 + $0x18] sm:$0xff] %v1223_v37  ;;  %v1207_v40 = vadd.f32 %v2597_v39, %v2291_v26  ;;  %v1201_v41 = vpop.f32.mrb[13].mxu0  ;;  %2958 = vmatprep.subr.bf16.mxu1 %v2957_v59  ;;  %v3037_v33 = vpack.c.bf16 %v1791_v32, %v1790_v31 }
 0x37a   : > { %1230 = vst [vmem:[%s4025_s11 + $0x10] sm:$0xff] %v1222_v38  ;;  %v1202_v42 = vadd.f32 %v2291_v26, %v1201_v41  ;;  %2636 = vmatprep.mubr.f32.mxu1 %v1222_v38  ;;  %v1649_v38 = vld [vmem:[#allocation10 + $0x28] sm:$0xff]  ;;  %2986 = vmatprep.subr.bf16.mxu0 %v2985_v34  ;;  %v1651_v41 = vld [vmem:[#allocation10 + $0x38] sm:$0xff] }
 0x37b   : > { %v1225_v43 = vmax.f32 %v1207_v40, 0.0  ;;  %2637 = vmatmul.mubr.f32.gmra.mrb[10].mxu1 %v1223_v37  ;;  %v1648_v37 = vld [vmem:[#allocation10 + $0x20] sm:$0xff]  ;;  %v1650_v40 = vld [vmem:[#allocation10 + $0x30] sm:$0xff] }
 0x37c   : > { %v1224_v44 = vmax.f32 %v1202_v42, 0.0  ;;  %v2600_v45 = vpop.f32.mrb[14].mxu0  ;;  %2960 = vmatpush3.bf16.msra.mxu1 %v2957_v59  ;;  %v2993_v39 = vpack.c.bf16 %v1649_v38, %v1648_v37  ;;  %v2997_v42 = vpack.c.bf16 %v1651_v41, %v1650_v40  ;;  %v2294_v37 = vld [vmem:[%s4280_s12] ss:$0 sm:$0xff] }
 0x37d   : > { %1233 = vst [vmem:[%s4025_s11 + $0x28] sm:$0xff] %v1225_v43  ;;  %v1217_v46 = vadd.f32 %v2600_v45, %v2291_v26  ;;  %v1211_v47 = vpop.f32.mrb[15].mxu0  ;;  %2962 = vmatprep.subr.bf16.mxu1 %v2961_v62 }
 0x37e   : > { %1232 = vst [vmem:[%s4025_s11 + $0x20] sm:$0xff] %v1224_v44  ;;  %v1212_v48 = vadd.f32 %v2291_v26, %v1211_v47  ;;  %2639 = vmatprep.mubr.f32.mxu1 %v1224_v44  ;;  %v1653_v44 = vld [vmem:[#allocation10 + $0x48] sm:$0xff]  ;;  %v1655_v47 = vld [vmem:[#allocation10 + $0x58] sm:$0xff] }
 0x37f   : > { %v1227_v49 = vmax.f32 %v1217_v46, 0.0  ;;  %2640 = vmatmul.mubr.f32.gmra.mrb[12].mxu1 %v1225_v43  ;;  %v1652_v43 = vld [vmem:[#allocation10 + $0x40] sm:$0xff]  ;;  %v1654_v46 = vld [vmem:[#allocation10 + $0x50] sm:$0xff] }
 0x380   : > { %v1226_v50 = vmax.f32 %v1212_v48, 0.0  ;;  %2964 = vmatpush3.bf16.msra.mxu1 %v2961_v62  ;;  %v3001_v45 = vpack.c.bf16 %v1653_v44, %v1652_v43  ;;  %v3005_v48 = vpack.c.bf16 %v1655_v47, %v1654_v46 }
 0x381   : > { %1235 = vst [vmem:[%s4025_s11 + $0x38] sm:$0xff] %v1227_v49  ;;  %2966 = vmatprep.subr.bf16.mxu1 %v2965_v1 }
 0x382   : > { %1234 = vst [vmem:[%s4025_s11 + $0x30] sm:$0xff] %v1226_v50  ;;  %2642 = vmatprep.mubr.f32.mxu1 %v1226_v50  ;;  %v1657_v50 = vld [vmem:[#allocation10 + $0x68] sm:$0xff]  ;;  %s3357_s11 = scalar_lea.vmem %s4061_s26, 1024 }
 0x383   : > { %2643 = vmatmul.mubr.f32.gmra.mrb[14].mxu1 %v1227_v49  ;;  %v1656_v49 = vld [vmem:[#allocation10 + $0x60] sm:$0xff]  ;;  %p3358_p13 = scmp.ne.s32.totalorder %s4061_s26, %s3357_s11  ;;  %p3365_p0 = scmp.lt.s32.totalorder %s3363_s27, %s3357_s11 }
 0x384   : > { %2968 = vmatpush3.bf16.msra.mxu1 %v2965_v1  ;;  %v3009_v51 = vpack.c.bf16 %v1657_v50, %v1656_v49 }
 0x385   : > { %2970 = vmatprep.subr.bf16.mxu1 %v2969_v4  ;;  %p3359_p6 = pnand %p3358_p13, %p4359_p1  ;;  %p3366_p10 = por %p3365_p0, %p3364_p5 }
 0x387   : > { %p3360_p9 = pneg %p3359_p6 }
 0x388   : > { %2972 = vmatpush3.bf16.msra.mxu1 %v2969_v4 }
 0x389   : > { %2974 = vmatprep.subr.bf16.mxu1 %v2973_v7  ;;  %p3367_p2 = pnand %p3366_p10, %p3360_p9 }
 0x38c   : > { %2976 = vmatpush3.bf16.msra.mxu1 %v2973_v7 }
 0x38d   : > { %2978 = vmatprep.subr.bf16.mxu1 %v2977_v10 }
 0x390   : > { %2980 = vmatpush3.bf16.msra.mxu1 %v2977_v10 }
 0x391   : > { %2982 = vmatprep.subr.bf16.mxu1 %v2981_v30 }
 0x394   : > { %2984 = vmatpush3.bf16.msra.mxu1 %v2981_v30  ;;  %v3033_v30 = vpack.c.bf16 %v1789_v29, %v1788_v28 }
 0x44a   : > { %v2635_v12 = vpop.f32.mrb[8].mxu1 }
 0x44b   : > { %v1331_v13 = vadd.f32 %v2635_v12, %v2292_v11  ;;  %v1325_v14 = vpop.f32.mrb[9].mxu1 }
 0x44c   : > { %v1326_v15 = vadd.f32 %v2292_v11, %v1325_v14  ;;  %v1659_v14 = vld [vmem:[#allocation10 + $0x78] sm:$0xff] }
 0x44d   : > { %1365 = vst [vmem:[%s4039_s30 + $0x8] sm:$0xff] %v1331_v13 }
 0x44e   : > { %1364 = vst [vmem:[%s4039_s30] sm:$0xff] %v1326_v15  ;;  %v2638_v16 = vpop.f32.mrb[10].mxu1  ;;  %2677 = vmatprep.mubr.f32.mxu0 %v1326_v15 }
 0x44f   : > { %v1341_v17 = vadd.f32 %v2638_v16, %v2292_v11  ;;  %v1335_v18 = vpop.f32.mrb[11].mxu1  ;;  %2678 = vmatmul.mubr.f32.vlgmr.msra.gmra.mrb[16].mxu0 %v1331_v13  ;;  %v1658_v13 = vld [vmem:[#allocation10 + $0x70] sm:$0xff]  ;;  %v1780_v16 = vld [vmem:[#allocation11] sm:$0xff] }
 0x450   : > { %v1336_v19 = vadd.f32 %v2292_v11, %v1335_v18  ;;  %2988 = vmatpush3.bf16.msra.mxu0 %v2985_v34  ;;  %v3013_v15 = vpack.c.bf16 %v1659_v14, %v1658_v13  ;;  %v1782_v18 = vld [vmem:[#allocation11 + $0x10] sm:$0xff]  ;;  %v1792_v34 = vld [vmem:[#allocation11 + $0x60] sm:$0xff] }
 0x451   : > { %1367 = vst [vmem:[%s4039_s30 + $0x18] sm:$0xff] %v1341_v17  ;;  %2990 = vmatprep.subr.bf16.mxu0 %v2989_v36 }
 0x452   : > { %1366 = vst [vmem:[%s4039_s30 + $0x10] sm:$0xff] %v1336_v19  ;;  %v2641_v20 = vpop.f32.mrb[12].mxu1  ;;  %2680 = vmatprep.mubr.f32.mxu0 %v1336_v19 }
 0x453   : > { %v1351_v21 = vadd.f32 %v2641_v20, %v2292_v11  ;;  %v1345_v22 = vpop.f32.mrb[13].mxu1  ;;  %2681 = vmatmul.mubr.f32.gmra.mrb[18].mxu0 %v1341_v17  ;;  %v1781_v17 = vld [vmem:[#allocation11 + $0x8] sm:$0xff]  ;;  %v1783_v20 = vld [vmem:[#allocation11 + $0x18] sm:$0xff] }
 0x454   : > { %v1346_v23 = vadd.f32 %v2292_v11, %v1345_v22  ;;  %2992 = vmatpush3.bf16.msra.mxu0 %v2989_v36  ;;  %v3017_v19 = vpack.c.bf16 %v1781_v17, %v1780_v16  ;;  %v1784_v22 = vld [vmem:[#allocation11 + $0x20] sm:$0xff]  ;;  %v3041_v36 = vpack.c.bf16 %v1793_v35, %v1792_v34 }
 0x455   : > { %1369 = vst [vmem:[%s4039_s30 + $0x28] sm:$0xff] %v1351_v21  ;;  %2994 = vmatprep.subr.bf16.mxu0 %v2993_v39 }
 0x456   : > { %1368 = vst [vmem:[%s4039_s30 + $0x20] sm:$0xff] %v1346_v23  ;;  %v2644_v24 = vpop.f32.mrb[14].mxu1  ;;  %2683 = vmatprep.mubr.f32.mxu0 %v1346_v23  ;;  %3049 = vmatprep.subr.bf16.mxu1 %v3017_v19  ;;  %v1785_v23 = vld [vmem:[#allocation11 + $0x28] sm:$0xff] }
 0x457   : > { %v1361_v25 = vadd.f32 %v2644_v24, %v2292_v11  ;;  %v1355_v26 = vpop.f32.mrb[15].mxu1  ;;  %2684 = vmatmul.mubr.f32.gmra.mrb[20].mxu0 %v1351_v21  ;;  %v3021_v21 = vpack.c.bf16 %v1783_v20, %v1782_v18  ;;  %v3025_v24 = vpack.c.bf16 %v1785_v23, %v1784_v22 }
 0x458   : > { %v1356_v27 = vadd.f32 %v2292_v11, %v1355_v26  ;;  %2996 = vmatpush3.bf16.msra.mxu0 %v2993_v39  ;;  %v1787_v26 = vld [vmem:[#allocation11 + $0x38] sm:$0xff] }
 0x459   : > { %1371 = vst [vmem:[%s4039_s30 + $0x38] sm:$0xff] %v1361_v25  ;;  %2998 = vmatprep.subr.bf16.mxu0 %v2997_v42 }
 0x45a   : > { %1370 = vst [vmem:[%s4039_s30 + $0x30] sm:$0xff] %v1356_v27  ;;  %2686 = vmatprep.mubr.f32.mxu0 %v1356_v27 }
 0x45b   : > { %2687 = vmatmul.mubr.f32.gmra.mrb[22].mxu0 %v1361_v25  ;;  %v1786_v25 = vld [vmem:[#allocation11 + $0x30] sm:$0xff] }
 0x45c   : > { %3000 = vmatpush3.bf16.msra.mxu0 %v2997_v42  ;;  %v3029_v27 = vpack.c.bf16 %v1787_v26, %v1786_v25 }
 0x45d   : > { %3002 = vmatprep.subr.bf16.mxu0 %v3001_v45 }
 0x460   : > { %3004 = vmatpush3.bf16.msra.mxu0 %v3001_v45 }
 0x461   : > { %3006 = vmatprep.subr.bf16.mxu0 %v3005_v48 }
 0x464   : > { %3008 = vmatpush3.bf16.msra.mxu0 %v3005_v48 }
 0x465   : > { %3010 = vmatprep.subr.bf16.mxu0 %v3009_v51 }
 0x468   : > { %3012 = vmatpush3.bf16.msra.mxu0 %v3009_v51 }
 0x469   : > { %3014 = vmatprep.subr.bf16.mxu0 %v3013_v15 }
 0x46c   : > { %3016 = vmatpush3.bf16.msra.mxu0 %v3013_v15 }
 0x46d   : > { %3018 = vmatprep.subr.bf16.mxu0 %v3017_v19 }
 0x522   : > { %v2679_v53 = vpop.f32.mrb[16].mxu0 }
 0x523   : > { %v1467_v54 = vadd.f32 %v2679_v53, %v2293_v52  ;;  %v1461_v55 = vpop.f32.mrb[17].mxu0 }
 0x524   : > { %v1462_v56 = vadd.f32 %v2293_v52, %v1461_v55 }
 0x525   : > { %v1501_v59 = vmax.f32 %v1467_v54, 0.0 }
 0x526   : > { %v1500_v57 = vmax.f32 %v1462_v56, 0.0  ;;  %v2682_v58 = vpop.f32.mrb[18].mxu0 }
 0x527   : > { %v1477_v60 = vadd.f32 %v2682_v58, %v2293_v52  ;;  %v1471_v61 = vpop.f32.mrb[19].mxu0 }
 0x528   : > { %v1472_v62 = vadd.f32 %v2293_v52, %v1471_v61  ;;  %2721 = vmatprep.mubr.f32.mxu1 %v1500_v57 }
 0x529   : > { %2722 = vmatmul.mubr.f32.vlgmr.msra.gmra.mrb[16].mxu1 %v1501_v59  ;;  %v1503_v1 = vmax.f32 %v1477_v60, 0.0 }
 0x52a   : > { %v1502_v63 = vmax.f32 %v1472_v62, 0.0  ;;  %v2685_v0 = vpop.f32.mrb[20].mxu0  ;;  %3057 = vmatpush3.bf16.msra.mxu1 %v3017_v19  ;;  %v1794_v62 = vld [vmem:[#allocation11 + $0x70] sm:$0xff] }
 0x52b   : > { %v1487_v2 = vadd.f32 %v2685_v0, %v2293_v52  ;;  %v1481_v3 = vpop.f32.mrb[21].mxu0  ;;  %3050 = vmatprep.subr.bf16.mxu1 %v3021_v21 }
 0x52c   : > { %v1482_v4 = vadd.f32 %v2293_v52, %v1481_v3  ;;  %2724 = vmatprep.mubr.f32.mxu1 %v1502_v63  ;;  %v1795_v63 = vld [vmem:[#allocation11 + $0x78] sm:$0xff] }
 0x52d   : > { %2725 = vmatmul.mubr.f32.gmra.mrb[18].mxu1 %v1503_v1  ;;  %v1505_v7 = vmax.f32 %v1487_v2, 0.0  ;;  %v3045_v0 = vpack.c.bf16 %v1795_v63, %v1794_v62  ;;  %v2295_v1 = vld [vmem:[%s4282_s14] ss:$0 sm:$0xff] }
 0x52e   : > { %v1504_v5 = vmax.f32 %v1482_v4, 0.0  ;;  %v2688_v6 = vpop.f32.mrb[22].mxu0  ;;  %3058 = vmatpush3.bf16.msra.mxu1 %v3021_v21 }
 0x52f   : > { %v1497_v8 = vadd.f32 %v2688_v6, %v2293_v52  ;;  %v1491_v9 = vpop.f32.mrb[23].mxu0  ;;  %3051 = vmatprep.subr.bf16.mxu1 %v3025_v24 }
 0x530   : > { %v1492_v10 = vadd.f32 %v2293_v52, %v1491_v9  ;;  %2727 = vmatprep.mubr.f32.mxu1 %v1504_v5 }
 0x531   : > { %2728 = vmatmul.mubr.f32.gmra.mrb[20].mxu1 %v1505_v7  ;;  %v1507_v12 = vmax.f32 %v1497_v8, 0.0 }
 0x532   : > { %v1506_v11 = vmax.f32 %v1492_v10, 0.0  ;;  %3059 = vmatpush3.bf16.msra.mxu1 %v3025_v24 }
 0x533   : > { %3052 = vmatprep.subr.bf16.mxu1 %v3029_v27 }
 0x534   : > { %2730 = vmatprep.mubr.f32.mxu1 %v1506_v11 }
 0x535   : > { %2731 = vmatmul.mubr.f32.gmra.mrb[22].mxu1 %v1507_v12 }
 0x536   : > { %3060 = vmatpush3.bf16.msra.mxu1 %v3029_v27 }
 0x537   : > { %3053 = vmatprep.subr.bf16.mxu1 %v3033_v30 }
 0x53a   : > { %3061 = vmatpush3.bf16.msra.mxu1 %v3033_v30 }
 0x53b   : > { %3054 = vmatprep.subr.bf16.mxu1 %v3037_v33 }
 0x53e   : > { %3062 = vmatpush3.bf16.msra.mxu1 %v3037_v33 }
 0x53f   : > { %3055 = vmatprep.subr.bf16.mxu1 %v3041_v36 }
 0x542   : > { %3063 = vmatpush3.bf16.msra.mxu1 %v3041_v36 }
 0x543   : > { %3056 = vmatprep.subr.bf16.mxu1 %v3045_v0 }
 0x546   : > { %3064 = vmatpush3.bf16.msra.mxu1 %v3045_v0 }
 0x5fc   : > { %v2723_v38 = vpop.f32.mrb[16].mxu1 }
 0x5fd   : > { %v1603_v39 = vadd.f32 %v2723_v38, %v2294_v37  ;;  %v1597_v40 = vpop.f32.mrb[17].mxu1 }
 0x5fe   : > { %v1598_v41 = vadd.f32 %v2294_v37, %v1597_v40 }
 0x5ff   : > { %v1637_v44 = vmax.f32 %v1603_v39, 0.0 }
 0x600   : > { %v1636_v42 = vmax.f32 %v1598_v41, 0.0  ;;  %v2726_v43 = vpop.f32.mrb[18].mxu1 }
 0x601   : > { %v1613_v45 = vadd.f32 %v2726_v43, %v2294_v37  ;;  %v1607_v46 = vpop.f32.mrb[19].mxu1 }
 0x602   : > { %v1608_v47 = vadd.f32 %v2294_v37, %v1607_v46  ;;  %2765 = vmatprep.mubr.f32.mxu0 %v1636_v42 }
 0x603   : > { %2766 = vmatmul.mubr.f32.vlgmr.msra.gmra.mrb[24].mxu0 %v1637_v44  ;;  %v1639_v50 = vmax.f32 %v1613_v45, 0.0 }
 0x604   : > { %v1638_v48 = vmax.f32 %v1608_v47, 0.0  ;;  %v2729_v49 = vpop.f32.mrb[20].mxu1  ;;  %3020 = vmatpush3.bf16.msra.mxu0 %v3017_v19 }
 0x605   : > { %v1623_v51 = vadd.f32 %v2729_v49, %v2294_v37  ;;  %v1617_v52 = vpop.f32.mrb[21].mxu1  ;;  %3022 = vmatprep.subr.bf16.mxu0 %v3021_v21 }
 0x606   : > { %v1618_v53 = vadd.f32 %v2294_v37, %v1617_v52  ;;  %2768 = vmatprep.mubr.f32.mxu0 %v1638_v48 }
 0x607   : > { %2769 = vmatmul.mubr.f32.gmra.mrb[26].mxu0 %v1639_v50  ;;  %v1641_v56 = vmax.f32 %v1623_v51, 0.0 }
 0x608   : > { %v1640_v54 = vmax.f32 %v1618_v53, 0.0  ;;  %v2732_v55 = vpop.f32.mrb[22].mxu1  ;;  %3024 = vmatpush3.bf16.msra.mxu0 %v3021_v21 }
 0x609   : > { %v1633_v57 = vadd.f32 %v2732_v55, %v2294_v37  ;;  %v1627_v58 = vpop.f32.mrb[23].mxu1  ;;  %3026 = vmatprep.subr.bf16.mxu0 %v3025_v24 }
 0x60a   : > { %v1628_v59 = vadd.f32 %v2294_v37, %v1627_v58  ;;  %2771 = vmatprep.mubr.f32.mxu0 %v1640_v54 }
 0x60b   : > { %2772 = vmatmul.mubr.f32.gmra.mrb[28].mxu0 %v1641_v56  ;;  %v1643_v61 = vmax.f32 %v1633_v57, 0.0 }
 0x60c   : > { %v1642_v60 = vmax.f32 %v1628_v59, 0.0  ;;  %3028 = vmatpush3.bf16.msra.mxu0 %v3025_v24 }
 0x60d   : > { %3030 = vmatprep.subr.bf16.mxu0 %v3029_v27 }
 0x60e   : > { %2774 = vmatprep.mubr.f32.mxu0 %v1642_v60 }
 0x60f   : > { %2775 = vmatmul.mubr.f32.gmra.mrb[30].mxu0 %v1643_v61 }
 0x610   : > { %3032 = vmatpush3.bf16.msra.mxu0 %v3029_v27 }
 0x611   : > { %3034 = vmatprep.subr.bf16.mxu0 %v3033_v30 }
 0x614   : > { %3036 = vmatpush3.bf16.msra.mxu0 %v3033_v30 }
 0x615   : > { %3038 = vmatprep.subr.bf16.mxu0 %v3037_v33 }
 0x618   : > { %3040 = vmatpush3.bf16.msra.mxu0 %v3037_v33 }
 0x619   : > { %3042 = vmatprep.subr.bf16.mxu0 %v3041_v36 }
 0x61c   : > { %3044 = vmatpush3.bf16.msra.mxu0 %v3041_v36 }
 0x61d   : > { %3046 = vmatprep.subr.bf16.mxu0 %v3045_v0 }
 0x620   : > { %3048 = vmatpush3.bf16.msra.mxu0 %v3045_v0 }
 0x6d6   : > { %v2767_v2 = vpop.f32.mrb[24].mxu0 }
 0x6d7   : > { %v1739_v3 = vadd.f32 %v2767_v2, %v2295_v1  ;;  %v1733_v4 = vpop.f32.mrb[25].mxu0 }
 0x6d8   : > { %v1734_v5 = vadd.f32 %v2295_v1, %v1733_v4 }
 0x6d9   : > { %v1773_v8 = vmax.f32 %v1739_v3, 0.0 }
 0x6da   : > { %v1772_v6 = vmax.f32 %v1734_v5, 0.0  ;;  %v2770_v7 = vpop.f32.mrb[26].mxu0 }
 0x6db   : > { %v1749_v9 = vadd.f32 %v2770_v7, %v2295_v1  ;;  %v1743_v10 = vpop.f32.mrb[27].mxu0 }
 0x6dc   : > { %v1744_v11 = vadd.f32 %v2295_v1, %v1743_v10  ;;  %2809 = vmatprep.mubr.f32.mxu0 %v1772_v6 }
 0x6dd   : > { %2810 = vmatmul.mubr.f32.vlgmr.msra.gmra.mrb[32].mxu0 %v1773_v8  ;;  %v1775_v14 = vmax.f32 %v1749_v9, 0.0 }
 0x6de   : > { %v1774_v12 = vmax.f32 %v1744_v11, 0.0  ;;  %v2773_v13 = vpop.f32.mrb[28].mxu0 }
 0x6df   : > { %v1759_v15 = vadd.f32 %v2773_v13, %v2295_v1  ;;  %v1753_v16 = vpop.f32.mrb[29].mxu0 }
 0x6e0   : > { %v1754_v17 = vadd.f32 %v2295_v1, %v1753_v16  ;;  %2812 = vmatprep.mubr.f32.mxu1 %v1774_v12 }
 0x6e1   : > { %2813 = vmatmul.mubr.f32.vlgmr.msra.gmra.mrb[24].mxu1 %v1775_v14  ;;  %v1777_v20 = vmax.f32 %v1759_v15, 0.0 }
 0x6e2   : > { %v1776_v18 = vmax.f32 %v1754_v17, 0.0  ;;  %v2776_v19 = vpop.f32.mrb[30].mxu0 }
 0x6e3   : > { %v1769_v21 = vadd.f32 %v2776_v19, %v2295_v1  ;;  %v1763_v22 = vpop.f32.mrb[31].mxu0 }
 0x6e4   : > { %v1764_v23 = vadd.f32 %v2295_v1, %v1763_v22  ;;  %2815 = vmatprep.mubr.f32.mxu1 %v1776_v18 }
 0x6e5   : > { %2816 = vmatmul.mubr.f32.gmra.mrb[26].mxu1 %v1777_v20  ;;  %v1779_v25 = vmax.f32 %v1769_v21, 0.0 }
 0x6e6   : > { %v1778_v24 = vmax.f32 %v1764_v23, 0.0 }
 0x6e8   : > { %2818 = vmatprep.mubr.f32.mxu1 %v1778_v24 }
 0x6e9   : > { %2819 = vmatmul.mubr.f32.gmra.mrb[28].mxu1 %v1779_v25 }
 0x6ea   : > { %3370 = shalt.err (!%p3367_p2)
}
 0x6eb   : > { %s3371_s28 = scalar_lea.hbm %s4076_s17, 1024  ;;  %s3375_s0 = scalar_lea.hbm %s4286_s18, 2048 }
 0x6ec   : > { %p3372_p3 = scmp.ne.s32.totalorder %s4076_s17, %s3371_s28  ;;  %p3376_p7 = scmp.lt.u32.totalorder %s4076_s17, %s4286_s18 }
 0x6ed   : > { %p3377_p8 = scmp.lt.u32.totalorder %s3375_s0, %s3371_s28  ;;  %p3379_p13 = scmp.lt.u32.totalorder %s3371_s28, %s4076_s17 }
 0x6ee   : > { %p3373_p4 = pnand %p3372_p3, %p4359_p1 }
 0x6ef   : > { %p3378_p11 = por %p3377_p8, %p3376_p7 }
 0x6f0   : > { %p3374_p12 = pneg %p3373_p4 }
 0x6f1   : > { %p3380_p6 = por %p3379_p13, %p3378_p11 }
 0x6f3   : > { %p3381_p9 = pnand %p3380_p6, %p3374_p12 }
 0x6f5   : > { %3384 = shalt.err (!%p3381_p9)
}
 0x6f6   : > { %s3566_s27 = smov 128   ;;  %s3567_s1 = smov 8  }
 0x6f7   : > { %3090 = dma.vmem_to_hbm [thread:$0]  (%p4359_p1), %s4061_s26, 1024, %s4076_s17, %s4080_s2, %s3566_s27, %s3566_s27, %s3567_s1  }
 0x6f8   : > { %s4360_s28 = sld [smem:[#allocation48_spill]]  ;;  %s4361_s0 = sand.u32 1, %s3703_s3  }
 0x6f9   : > { %s4115_s29 = scalar_lea.sflag [#allocation18], %s4361_s0  ;;  %s3385_s6 = scalar_lea.vmem %s4065_s20, 1024 }
 0x6fa   : > { %p3386_p5 = scmp.ne.s32.totalorder %s4065_s20, %s3385_s6  ;;  %s3568_s8 = smov [#allocation17]  }
 0x6fb   : > { %s3389_s9 = sshll.u32 %s3568_s8, 4  ;;  %s3390_s9 = int_to_ptr.vmem [resolvable:$false] %s3389_s9 }
 0x6fc   : > { %p3387_p0 = pnand %p3386_p5, %p4359_p1  ;;  %s3391_s10 = scalar_lea.vmem %s3390_s9, 2048 }
 0x6fd   : > { %p3392_p2 = scmp.lt.s32.totalorder %s4065_s20, %s3390_s9  ;;  %p3393_p3 = scmp.lt.s32.totalorder %s3391_s10, %s3385_s6 }
 0x6fe   : > { %s4111_s23 = scalar_lea.hbm %s4360_s28, %s4070_s4  ;;  %p3388_p10 = pneg %p3387_p0 }
 0x6ff   : > { %p3394_p4 = por %p3393_p3, %p3392_p2 }
 0x701   : > { %p3395_p12 = pnand %p3394_p4, %p3388_p10 }
 0x703   : > { %3398 = shalt.err (!%p3395_p12)
}
 0x704   : > { %s3399_s3 = scalar_lea.hbm %s4111_s23, 1024  ;;  %s3403_s8 = scalar_lea.hbm %s4360_s28, 2048 }
 0x705   : > { %p3400_p7 = scmp.ne.s32.totalorder %s4111_s23, %s3399_s3  ;;  %p3404_p13 = scmp.lt.u32.totalorder %s4111_s23, %s4360_s28 }
 0x706   : > { %p3405_p6 = scmp.lt.u32.totalorder %s3403_s8, %s3399_s3  ;;  %p3407_p5 = scmp.lt.u32.totalorder %s3399_s3, %s4111_s23 }
 0x707   : > { %p3401_p8 = pnand %p3400_p7, %p4359_p1 }
 0x708   : > { %p3406_p9 = por %p3405_p6, %p3404_p13 }
 0x709   : > { %p3402_p11 = pneg %p3401_p8 }
 0x70a   : > { %p3408_p0 = por %p3407_p5, %p3406_p9 }
 0x70c   : > { %p3409_p10 = pnand %p3408_p0, %p3402_p11 }
 0x70e   : > { %3412 = shalt.err (!%p3409_p10)
}
 0x70f   : > { %3092 = dma.vmem_to_hbm [thread:$0]  (%p4359_p1), %s4065_s20, 1024, %s4111_s23, %s4115_s29, %s3566_s27, %s3566_s27, %s3567_s1  }
 0x710   : > { %s4362_s6 = sshll.u32 %s4039_s30, 4  ;;  %s4363_s0 = sld [smem:[#allocation47_spill]]  ;;  %s4144_s6 = int_to_ptr.vmem [resolvable:$true] %s4362_s6 }
 0x711   : > { %s3413_s26 = scalar_lea.vmem %s4063_s7, 1024  ;;  %s3569_s17 = smov [#allocation16]  }
 0x712   : > { %p3414_p2 = scmp.ne.s32.totalorder %s4063_s7, %s3413_s26  ;;  %s3417_s8 = sshll.u32 %s3569_s17, 4  ;;  %s3418_s8 = int_to_ptr.vmem [resolvable:$false] %s3417_s8 }
 0x713   : > { %s3419_s16 = scalar_lea.vmem %s3418_s8, 2048  ;;  %p3420_p12 = scmp.lt.s32.totalorder %s4063_s7, %s3418_s8 }
 0x714   : > { %p3415_p3 = pnand %p3414_p2, %p4359_p1  ;;  %p3421_p7 = scmp.lt.s32.totalorder %s3419_s16, %s3413_s26 }
 0x716   : > { %s4150_s3 = scalar_lea.hbm %s4363_s0, %s4070_s4  ;;  %p3416_p4 = pneg %p3415_p3 }
 0x717   : > { %p3422_p8 = por %p3421_p7, %p3420_p12 }
 0x719   : > { %p3423_p11 = pnand %p3422_p8, %p3416_p4 }
 0x71b   : > { %3426 = shalt.err (!%p3423_p11)
}
 0x71c   : > { %s3427_s30 = scalar_lea.hbm %s4150_s3, 1024  ;;  %s3431_s9 = scalar_lea.hbm %s4363_s0, 2048 }
 0x71d   : > { %p3428_p13 = scmp.ne.s32.totalorder %s4150_s3, %s3427_s30  ;;  %p3432_p5 = scmp.lt.u32.totalorder %s4150_s3, %s4363_s0 }
 0x71e   : > { %p3433_p0 = scmp.lt.u32.totalorder %s3431_s9, %s3427_s30  ;;  %p3435_p2 = scmp.lt.u32.totalorder %s3427_s30, %s4150_s3 }
 0x71f   : > { %p3429_p6 = pnand %p3428_p13, %p4359_p1 }
 0x720   : > { %p3434_p10 = por %p3433_p0, %p3432_p5 }
 0x721   : > { %p3430_p9 = pneg %p3429_p6 }
 0x722   : > { %p3436_p3 = por %p3435_p2, %p3434_p10 }
 0x724   : > { %p3437_p4 = pnand %p3436_p3, %p3430_p9 }
 0x726   : > { %3440 = shalt.err (!%p3437_p4)
}
 0x727   : > { %3091 = dma.vmem_to_hbm [thread:$0]  (%p4359_p1), %s4063_s7, 1024, %s4150_s3, %s4080_s2, %s3566_s27, %s3566_s27, %s3567_s1  }
 0x728   : > { %s4364_s8 = sld [smem:[#allocation49_spill]]  ;;  %s3441_s30 = scalar_lea.vmem %s4144_s6, 1024 }
 0x729   : > { %p3442_p12 = scmp.ne.s32.totalorder %s4144_s6, %s3441_s30  ;;  %s3570_s20 = smov [#allocation19]  }
 0x72a   : > { %s3445_s23 = sshll.u32 %s3570_s20, 4  ;;  %s3446_s23 = int_to_ptr.vmem [resolvable:$false] %s3445_s23 }
 0x72b   : > { %p3443_p7 = pnand %p3442_p12, %p4359_p1  ;;  %s3447_s9 = scalar_lea.vmem %s3446_s23, 2048 }
 0x72c   : > { %p3448_p11 = scmp.lt.s32.totalorder %s4144_s6, %s3446_s23  ;;  %p3449_p13 = scmp.lt.s32.totalorder %s3447_s9, %s3441_s30 }
 0x72d   : > { %p3444_p8 = pneg %p3443_p7 }
 0x72e   : > { %s4181_s16 = scalar_lea.hbm %s4364_s8, %s4070_s4  ;;  %p3450_p6 = por %p3449_p13, %p3448_p11 }
 0x730   : > { %p3451_p9 = pnand %p3450_p6, %p3444_p8 }
 0x732   : > { %3454 = shalt.err (!%p3451_p9)
}
 0x733   : > { %s3455_s7 = scalar_lea.hbm %s4181_s16, 1024  ;;  %s3459_s10 = scalar_lea.hbm %s4364_s8, 2048 }
 0x734   : > { %p3456_p5 = scmp.ne.s32.totalorder %s4181_s16, %s3455_s7  ;;  %p3460_p2 = scmp.lt.u32.totalorder %s4181_s16, %s4364_s8 }
 0x735   : > { %p3461_p3 = scmp.lt.u32.totalorder %s3459_s10, %s3455_s7  ;;  %p3463_p12 = scmp.lt.u32.totalorder %s3455_s7, %s4181_s16 }
 0x736   : > { %p3457_p0 = pnand %p3456_p5, %p4359_p1 }
 0x737   : > { %p3462_p4 = por %p3461_p3, %p3460_p2 }
 0x738   : > { %p3458_p10 = pneg %p3457_p0 }
 0x739   : > { %p3464_p7 = por %p3463_p12, %p3462_p4 }
 0x73b   : > { %p3465_p8 = pnand %p3464_p7, %p3458_p10 }
 0x73d   : > { %3468 = shalt.err (!%p3465_p8)
}
 0x73e   : > { %3093 = dma.vmem_to_hbm [thread:$0]  (%p4359_p1), %s4144_s6, 1024, %s4181_s16, %s4115_s29, %s3566_s27, %s3566_s27, %s3567_s1  }
 0x73f   : > { %s4365_s20 = sld [smem:[#allocation45_spill]]  ;;  %s745_s23 = scalar_lea.vmem [#allocation13], %s3994_s21 }
 0x740   : > { %s1950_s29 = sshll.u32 %s745_s23, 4  ;;  %s4366_s16 = sld [smem:[#allocation46_spill]]  ;;  %s4212_s29 = int_to_ptr.vmem [resolvable:$true] %s1950_s29 }
 0x741   : > { %s4367_s7 = sand.u32 1, %s3547_s25   ;;  %s3469_s3 = scalar_lea.vmem %s4212_s29, 1024 }
 0x742   : > { %s4222_s2 = scalar_lea.sflag [#allocation4], %s4367_s7  ;;  %p3470_p11 = scmp.ne.s32.totalorder %s4212_s29, %s3469_s3 }
 0x743   : > { %s3571_s10 = smov [#allocation13]  }
 0x744   : > { %p3471_p13 = pnand %p3470_p11, %p4359_p1  ;;  %s3473_s11 = sshll.u32 %s3571_s10, 4  ;;  %s3474_s11 = int_to_ptr.vmem [resolvable:$false] %s3473_s11 }
 0x745   : > { %v2296_v26 = vld [vmem:[%s4365_s20] ss:$0 sm:$0xff]  ;;  %s3475_s26 = scalar_lea.vmem %s3474_s11, 2048  ;;  %p3476_p9 = scmp.lt.s32.totalorder %s4212_s29, %s3474_s11 }
 0x746   : > { %s4218_s9 = scalar_lea.hbm %s4366_s16, %s4070_s4  ;;  %p3472_p6 = pneg %p3471_p13 }
 0x747   : > { %p3477_p5 = scmp.lt.s32.totalorder %s3475_s26, %s3469_s3 }
 0x749   : > { %p3478_p0 = por %p3477_p5, %p3476_p9 }
 0x74b   : > { %p3479_p10 = pnand %p3478_p0, %p3472_p6 }
 0x7b0   : > { %v2811_v27 = vpop.f32.mrb[32].mxu0 }
 0x7b1   : > { %v1875_v28 = vadd.f32 %v2811_v27, %v2296_v26  ;;  %v1869_v29 = vpop.f32.mrb[33].mxu0 }
 0x7b2   : > { %v1870_v30 = vadd.f32 %v2296_v26, %v1869_v29 }
 0x7b3   : > { %1909 = vst [vmem:[%s745_s23 + $0x8] sm:$0xff] %v1875_v28 }
 0x7b4   : > { %1908 = vst [vmem:[%s745_s23] sm:$0xff] %v1870_v30  ;;  %v2814_v31 = vpop.f32.mrb[24].mxu1 }
 0x7b5   : > { %v1885_v32 = vadd.f32 %v2814_v31, %v2296_v26  ;;  %v1879_v33 = vpop.f32.mrb[25].mxu1 }
 0x7b6   : > { %v1880_v34 = vadd.f32 %v2296_v26, %v1879_v33 }
 0x7b7   : > { %1911 = vst [vmem:[%s745_s23 + $0x18] sm:$0xff] %v1885_v32 }
 0x7b8   : > { %1910 = vst [vmem:[%s745_s23 + $0x10] sm:$0xff] %v1880_v34  ;;  %v2817_v35 = vpop.f32.mrb[26].mxu1 }
 0x7b9   : > { %v1895_v36 = vadd.f32 %v2817_v35, %v2296_v26  ;;  %v1889_v37 = vpop.f32.mrb[27].mxu1 }
 0x7ba   : > { %v1890_v38 = vadd.f32 %v2296_v26, %v1889_v37 }
 0x7bb   : > { %1913 = vst [vmem:[%s745_s23 + $0x28] sm:$0xff] %v1895_v36 }
 0x7bc   : > { %1912 = vst [vmem:[%s745_s23 + $0x20] sm:$0xff] %v1890_v38  ;;  %v2820_v39 = vpop.f32.mrb[28].mxu1 }
 0x7bd   : > { %v1905_v40 = vadd.f32 %v2820_v39, %v2296_v26  ;;  %v1899_v41 = vpop.f32.mrb[29].mxu1 }
 0x7be   : > { %v1900_v42 = vadd.f32 %v2296_v26, %v1899_v41 }
 0x7bf   : > { %1915 = vst [vmem:[%s745_s23 + $0x38] sm:$0xff] %v1905_v40 }
 0x7c0   : > { %1914 = vst [vmem:[%s745_s23 + $0x30] sm:$0xff] %v1900_v42 }
 0x7c1   : > { %3482 = shalt.err (!%p3479_p10)
}
 0x7c2   : > { %s3483_s4 = scalar_lea.hbm %s4218_s9, 1024  ;;  %s3487_s20 = scalar_lea.hbm %s4366_s16, 2048 }
 0x7c3   : > { %p3484_p2 = scmp.ne.s32.totalorder %s4218_s9, %s3483_s4  ;;  %p3488_p12 = scmp.lt.u32.totalorder %s4218_s9, %s4366_s16 }
 0x7c4   : > { %p3489_p7 = scmp.lt.u32.totalorder %s3487_s20, %s3483_s4  ;;  %p3491_p11 = scmp.lt.u32.totalorder %s3483_s4, %s4218_s9 }
 0x7c5   : > { %p3485_p3 = pnand %p3484_p2, %p4359_p1 }
 0x7c6   : > { %p3490_p8 = por %p3489_p7, %p3488_p12 }
 0x7c7   : > { %p3486_p4 = pneg %p3485_p3 }
 0x7c8   : > { %p3492_p13 = por %p3491_p11, %p3490_p8 }
 0x7ca   : > { %p3493_p6 = pnand %p3492_p13, %p3486_p4 }
 0x7cc   : > { %3496 = shalt.err (!%p3493_p6)
}
 0x7cd   : > { %3089 = dma.vmem_to_hbm [thread:$0]  (%p4359_p1), %s4212_s29, 1024, %s4218_s9, %s4222_s2, %s3566_s27, %s3566_s27, %s3567_s1  }
 0x7ce PF: > { %s4368_s6 = sld [smem:[#allocation29_spill]]  ;;  %s4369_s7 = sld [smem:[#allocation27_spill]] }
 0x7cf   : > { %s4370_s3 = sld [smem:[#allocation32_spill]] }
 0x7d4   : > { %p3146_p9 = scmp.ge.s32.totalorder %s4368_s6, 2  ;;  %s2029_s10 = sand.u32 1, %s4369_s7  }
 0x7d5   : > { %p4371_p5 = scmp.ne.s32.totalorder %s4370_s3, 0  ;;  %s2030_s11 = scalar_lea.sflag [#allocation4], %s2029_s10 }
 0x7d7   : > { %p3119_p0 = pnand %p3146_p9, %p4371_p5 }
 0x7d9   : > { %3530 = dma.done.wait (!%p3119_p0), %s2030_s11, 1024  }
 0x7da   : > { %3532 = vsyncadd (!%p3119_p0), %s2030_s11, 4294966272  ;;  %s4372_s5 = sadd.s32 4294967294, %s4368_s6  }
 0x7db   : > { %s2038_s26 = sand.u32 1, %s4372_s5  }
 0x7dc   : > { %s2039_s4 = scalar_lea.sflag [#allocation15], %s2038_s26 }
 0x7dd   : > { %3534 = dma.done.wait (!%p3119_p0), %s2039_s4, 2048  }
 0x7de   : > { %3536 = vsyncadd (!%p3119_p0), %s2039_s4, 4294965248  ;;  %s2057_s17 = scalar_lea.sflag [#allocation18], %s2038_s26 }
 0x7df   : > { %3538 = dma.done.wait (!%p3119_p0), %s2057_s17, 2048  }
 0x7e0   : > { %3540 = vsyncadd (!%p3119_p0), %s2057_s17, 4294965248  ;;  %s4373_s27 = sld [smem:[#allocation30_spill]]  ;;  %s4374_s1 = sld [smem:[#allocation28_spill]] }
 0x7e1   : > { %s4375_s26 = sld [smem:[#allocation31_spill]]  ;;  %s4376_s2 = smov %s3547_s25 }
 0x7e6   : > { %p42_p1 = scmp.ge.s32.totalorder %s4373_s27, 4   ;;  %s4377_s25 = smov %s4374_s1 }
 0x7e8   :  { %44 = sbr.rel (!%p42_p1) target bundleno = 29 (0x1d), region = 212 }
 0x7ef   :  { %2071 = vsyncpa [#allocation3], 1 }
 0x7f0   :  { %2073 = vsyncpa [#allocation3 + $0x1], 1 }
 0x7f1   :  { %2074 = vsyncpa [#allocation6], 1 }
 0x7f2   :  { %2075 = vsyncpa [#allocation9], 1 }
 0x7f3   :  { %2076 = vsyncpa [#allocation12], 1 }
 0x7f4   :  { %2077 = vsyncpa [#allocation4], 1 }
 0x7f5   :  { %2079 = vsyncpa [#allocation4 + $0x1], 1 }
 0x7f6   :  { %2080 = vsyncpa [#allocation15], 1 }
 0x7f7   :  { %2082 = vsyncpa [#allocation15 + $0x1], 1 }
 0x7f8   :  { %2083 = vsyncpa [#allocation18], 1 }
 0x7f9   :  { %2085 = vsyncpa [#allocation18 + $0x1], 1 }

</bundles_post_ra>
